<compile_context>
chip_gen: v5e
topology: v5e:2x2
jax: 0.10.0
libtpu: 0.0.40
codegen_flags: <defaults>
</compile_context>

<pallas_src>
import functools

import jax
import jax.numpy as jnp
from jax.experimental import pallas as pl
from jax.experimental.pallas import tpu as pltpu


def _spatial_attention_kernel(x_ref, w_ref, b_ref, o_ref,
                              pad_avg, pad_max, red_rows,
                              col_avg, col_max, attn_plane, attn_row,
                              *, Bt, C, H, W, K, P):
    # x_ref      : (Bt, C, H*W) VMEM block (lane-dense flattened spatial dims)
    # w_ref      : (2*K*K,) SMEM conv weights, flattened [channel(avg,max), ki, kj]
    # b_ref      : (1,) SMEM conv bias
    # o_ref      : (Bt, C, H*W) VMEM output block
    # pad_avg/pad_max : (H+2P, W+2P) zero-padded conv input planes (scratch)
    # red_rows   : (2, H*W) lane-dense avg/max rows (scratch)
    # col_avg/col_max : (H+2P, W) kj-shifted column slabs (scratch)
    # attn_plane : (H, W) sigmoid(conv) plane (scratch)
    # attn_row   : (1, H*W) lane-dense attention row used for gating (scratch)
    HW = H * W
    Hp = H + 2 * P
    inv_c = 1.0 / C

    # Zero the padded planes once per grid step; the interior is overwritten
    # for every batch element below and the border stays zero.
    pad_avg[...] = jnp.zeros_like(pad_avg)
    pad_max[...] = jnp.zeros_like(pad_max)

    for b in range(Bt):
        # ---- lane-dense channel reductions (always accumulate in f32) ----
        xf = x_ref[b].astype(jnp.float32)                      # (C, HW)
        red_rows[pl.ds(0, 1), :] = jnp.sum(xf, axis=0, keepdims=True) * inv_c
        red_rows[pl.ds(1, 1), :] = jnp.max(xf, axis=0, keepdims=True)

        # ---- scatter the flat rows into the padded (H, W) conv planes ----
        for h in range(H):
            pad_avg[pl.ds(P + h, 1), pl.ds(P, W)] = red_rows[pl.ds(0, 1), pl.ds(h * W, W)]
            pad_max[pl.ds(P + h, 1), pl.ds(P, W)] = red_rows[pl.ds(1, 1), pl.ds(h * W, W)]

        # ---- 7x7 conv over (avg, max); lane shift kj hoisted to outer loop ----
        acc = jnp.zeros((H, W), dtype=jnp.float32)
        for kj in range(K):
            # One lane-shifted read per kj per plane; inner loop is sublane-only.
            col_avg[...] = pad_avg[pl.ds(0, Hp), pl.ds(kj, W)]
            col_max[...] = pad_max[pl.ds(0, Hp), pl.ds(kj, W)]
            for ki in range(K):
                acc = acc + col_avg[pl.ds(ki, H), :] * w_ref[ki * K + kj]
                acc = acc + col_max[pl.ds(ki, H), :] * w_ref[K * K + ki * K + kj]
        acc = acc + b_ref[0]
        attn_plane[...] = jax.nn.sigmoid(acc)                  # (H, W)

        # ---- gather the attention plane back into a lane-dense row ----
        for h in range(H):
            attn_row[pl.ds(0, 1), pl.ds(h * W, W)] = attn_plane[pl.ds(h, 1), :]

        # ---- lane-dense gating of all C planes (single dense mul + store) ----
        o_ref[b] = (xf * attn_row[...]).astype(o_ref.dtype)


def spatial_attention(x, conv_w, conv_b, *, kernel_size=7,
                      vmem_block_budget_bytes=8 * 1024 * 1024):
    """x: (B, C, H, W); conv_w: (1, 2, K, K); conv_b: (1,)."""
    B, C, H, W = x.shape
    K = kernel_size
    P = K // 2
    HW = H * W

    x_flat = x.reshape(B, C, HW)                            # free for NCHW
    w_flat = conv_w.reshape(-1).astype(jnp.float32)         # (2*K*K,) [c, ki, kj]
    b_flat = conv_b.reshape(-1).astype(jnp.float32)         # (1,)

    # Batch elements per grid step: input + output blocks are each double
    # buffered (~4 * Bt * C * HW * itemsize bytes live).  Keep >= 2 grid steps
    # when B >= 2 so dual-TensorCore chips (v7x) can shard the parallel axis.
    itemsize = jnp.dtype(x.dtype).itemsize
    per_batch = 4 * C * HW * itemsize
    bt = max(1, min(B, vmem_block_budget_bytes // max(per_batch, 1)))
    if B >= 2:
        bt = min(bt, max(1, B // 2))
    while B % bt:                                           # whole blocks only
        bt -= 1
    grid = (B // bt,)

    kernel = functools.partial(_spatial_attention_kernel,
                               Bt=bt, C=C, H=H, W=W, K=K, P=P)

    cost = pl.CostEstimate(
        flops=B * HW * (2 * C + 4 * K * K + 2 * C),
        transcendentals=B * HW,
        bytes_accessed=2 * B * C * HW * itemsize + (2 * K * K + 1) * 4,
    )

    out_flat = pl.pallas_call(
        kernel,
        out_shape=jax.ShapeDtypeStruct((B, C, HW), x.dtype),
        grid=grid,
        in_specs=[
            pl.BlockSpec((bt, C, HW), lambda i: (i, 0, 0)),
            pl.BlockSpec(memory_space=pltpu.MemorySpace.SMEM),
            pl.BlockSpec(memory_space=pltpu.MemorySpace.SMEM),
        ],
        out_specs=pl.BlockSpec((bt, C, HW), lambda i: (i, 0, 0)),
        scratch_shapes=[
            pltpu.VMEM((H + 2 * P, W + 2 * P), jnp.float32),   # pad_avg
            pltpu.VMEM((H + 2 * P, W + 2 * P), jnp.float32),   # pad_max
            pltpu.VMEM((2, HW), jnp.float32),                  # red_rows
            pltpu.VMEM((H + 2 * P, W), jnp.float32),           # col_avg
            pltpu.VMEM((H + 2 * P, W), jnp.float32),           # col_max
            pltpu.VMEM((H, W), jnp.float32),                   # attn_plane
            pltpu.VMEM((1, HW), jnp.float32),                  # attn_row
        ],
        compiler_params=pltpu.CompilerParams(
            dimension_semantics=("parallel",),
            vmem_limit_bytes=48 * 1024 * 1024,
        ),
        cost_estimate=cost,
    )(x_flat, w_flat, b_flat)

    return out_flat.reshape(B, C, H, W)


def _reference(x, conv_w, conv_b):
    avg = jnp.mean(x, axis=1, keepdims=True)
    mx = jnp.max(x, axis=1, keepdims=True)
    attn_in = jnp.concatenate([avg, mx], axis=1)
    conv = jax.lax.conv_general_dilated(
        attn_in, conv_w, window_strides=(1, 1),
        padding=[(3, 3), (3, 3)],
        dimension_numbers=("NCHW", "OIHW", "NCHW"),
    ) + conv_b.reshape(1, 1, 1, 1)
    return x * jax.nn.sigmoid(conv)


if __name__ == "__main__":
    key = jax.random.PRNGKey(0)
    kx, kw, kb = jax.random.split(key, 3)

    B, C, H, W = 2, 4, 16, 16
    K = 7

    x = jax.random.normal(kx, (B, C, H, W), dtype=jnp.float32)
    # Deterministic synthetic conv params (shapes from nn.Conv2d(2, 1, 7)).
    conv_w = jax.random.normal(kw, (1, 2, K, K), dtype=jnp.float32) * 0.05
    conv_b = jax.random.normal(kb, (1,), dtype=jnp.float32) * 0.05

    out = spatial_attention(x, conv_w, conv_b, kernel_size=K)
    out = jax.block_until_ready(out)

    ref = _reference(x, conv_w, conv_b)
    assert out.shape == (B, C, H, W)
    assert jnp.allclose(out, ref, atol=1e-5, rtol=1e-5), "mismatch vs reference"

    print("KERNEL_OK")
</pallas_src>

<mosaic_0001>
module attributes {stable_mosaic.version = 11 : i64} {
  func.func @_spatial_attention_kernel(%arg0: i32, %arg1: memref<1x4x256xf32, #tpu.memory_space<vmem>>, %arg2: memref<98xf32, #tpu.memory_space<smem>>, %arg3: memref<1xf32, #tpu.memory_space<smem>>, %arg4: memref<1x4x256xf32, #tpu.memory_space<vmem>>, %arg5: memref<22x22xf32, #tpu.memory_space<vmem>>, %arg6: memref<22x22xf32, #tpu.memory_space<vmem>>, %arg7: memref<2x256xf32, #tpu.memory_space<vmem>>, %arg8: memref<22x16xf32, #tpu.memory_space<vmem>>, %arg9: memref<22x16xf32, #tpu.memory_space<vmem>>, %arg10: memref<16x16xf32, #tpu.memory_space<vmem>>, %arg11: memref<1x256xf32, #tpu.memory_space<vmem>>) attributes {dimension_semantics = [#tpu.dimension_semantics<parallel>], iteration_bounds = array<i64: 2>, scalar_prefetch = 0 : i64, scratch_operands = 7 : i64, tpu.core_type = #tpu.core_type<tc>, window_params = [{transform_indices = @transform_0, window_bounds = array<i64: 1, 4, 256>}, {transform_indices = @transform_1, window_bounds = array<i64: 98>}, {transform_indices = @transform_2, window_bounds = array<i64: 1>}, {transform_indices = @transform_3, window_bounds = array<i64: 1, 4, 256>}]} {
    %cst = arith.constant 0.000000e+00 : f32
    %0 = vector.broadcast %cst : f32 to vector<22x22xf32>
    %c0 = arith.constant 0 : index
    %c0_0 = arith.constant 0 : index
    %1 = vector.load %arg5[%c0, %c0_0] : memref<22x22xf32, #tpu.memory_space<vmem>>, vector<22x22xf32>
    tpu.vector_store %arg5[%c0, %c0_0], %0 {strides = array<i32>} : memref<22x22xf32, #tpu.memory_space<vmem>>, vector<22x22xf32>,
    %cst_1 = arith.constant 0.000000e+00 : f32
    %2 = vector.broadcast %cst_1 : f32 to vector<22x22xf32>
    %c0_2 = arith.constant 0 : index
    %c0_3 = arith.constant 0 : index
    %3 = vector.load %arg6[%c0_2, %c0_3] : memref<22x22xf32, #tpu.memory_space<vmem>>, vector<22x22xf32>
    tpu.vector_store %arg6[%c0_2, %c0_3], %2 {strides = array<i32>} : memref<22x22xf32, #tpu.memory_space<vmem>>, vector<22x22xf32>,
    %c0_4 = arith.constant 0 : index
    %c0_5 = arith.constant 0 : index
    %c0_6 = arith.constant 0 : index
    %4 = vector.load %arg1[%c0_4, %c0_5, %c0_6] : memref<1x4x256xf32, #tpu.memory_space<vmem>>, vector<1x4x256xf32>
    %5 = vector.shape_cast %4 : vector<1x4x256xf32> to vector<4x256xf32>
    %cst_7 = arith.constant dense<0.000000e+00> : vector<256xf32>
    %6 = vector.multi_reduction <add>, %5, %cst_7 [0] : vector<4x256xf32> to vector<256xf32>
    %7 = vector.shape_cast %6 : vector<256xf32> to vector<1x256xf32>
    %cst_8 = arith.constant 2.500000e-01 : f32
    %8 = vector.broadcast %cst_8 : f32 to vector<1x256xf32>
    %9 = arith.mulf %7, %8 : vector<1x256xf32>
    %c0_9 = arith.constant 0 : index
    %c0_10 = arith.constant 0 : index
    %10 = vector.load %arg7[%c0_9, %c0_10] : memref<2x256xf32, #tpu.memory_space<vmem>>, vector<1x256xf32>
    tpu.vector_store %arg7[%c0_9, %c0_10], %9 {strides = array<i32>} : memref<2x256xf32, #tpu.memory_space<vmem>>, vector<1x256xf32>,
    %cst_11 = arith.constant dense<0xFF800000> : vector<256xf32>
    %11 = vector.multi_reduction <maximumf>, %5, %cst_11 [0] : vector<4x256xf32> to vector<256xf32>
    %12 = vector.shape_cast %11 : vector<256xf32> to vector<1x256xf32>
    %c1 = arith.constant 1 : index
    %c0_12 = arith.constant 0 : index
    %13 = vector.load %arg7[%c1, %c0_12] : memref<2x256xf32, #tpu.memory_space<vmem>>, vector<1x256xf32>
    tpu.vector_store %arg7[%c1, %c0_12], %12 {strides = array<i32>} : memref<2x256xf32, #tpu.memory_space<vmem>>, vector<1x256xf32>,
    %c0_13 = arith.constant 0 : index
    %c0_14 = arith.constant 0 : index
    %14 = vector.load %arg7[%c0_13, %c0_14] : memref<2x256xf32, #tpu.memory_space<vmem>>, vector<1x16xf32>
    %c3 = arith.constant 3 : index
    %c3_15 = arith.constant 3 : index
    %15 = vector.load %arg5[%c3, %c3_15] : memref<22x22xf32, #tpu.memory_space<vmem>>, vector<1x16xf32>
    tpu.vector_store %arg5[%c3, %c3_15], %14 {strides = array<i32>} : memref<22x22xf32, #tpu.memory_space<vmem>>, vector<1x16xf32>,
    %c1_16 = arith.constant 1 : index
    %c0_17 = arith.constant 0 : index
    %16 = vector.load %arg7[%c1_16, %c0_17] : memref<2x256xf32, #tpu.memory_space<vmem>>, vector<1x16xf32>
    %c3_18 = arith.constant 3 : index
    %c3_19 = arith.constant 3 : index
    %17 = vector.load %arg6[%c3_18, %c3_19] : memref<22x22xf32, #tpu.memory_space<vmem>>, vector<1x16xf32>
    tpu.vector_store %arg6[%c3_18, %c3_19], %16 {strides = array<i32>} : memref<22x22xf32, #tpu.memory_space<vmem>>, vector<1x16xf32>,
    %c0_20 = arith.constant 0 : index
    %c16 = arith.constant 16 : index
    %18 = vector.load %arg7[%c0_20, %c16] : memref<2x256xf32, #tpu.memory_space<vmem>>, vector<1x16xf32>
    %c4 = arith.constant 4 : index
    %c3_21 = arith.constant 3 : index
    %19 = vector.load %arg5[%c4, %c3_21] : memref<22x22xf32, #tpu.memory_space<vmem>>, vector<1x16xf32>
    tpu.vector_store %arg5[%c4, %c3_21], %18 {strides = array<i32>} : memref<22x22xf32, #tpu.memory_space<vmem>>, vector<1x16xf32>,
    %c1_22 = arith.constant 1 : index
    %c16_23 = arith.constant 16 : index
    %20 = vector.load %arg7[%c1_22, %c16_23] : memref<2x256xf32, #tpu.memory_space<vmem>>, vector<1x16xf32>
    %c4_24 = arith.constant 4 : index
    %c3_25 = arith.constant 3 : index
    %21 = vector.load %arg6[%c4_24, %c3_25] : memref<22x22xf32, #tpu.memory_space<vmem>>, vector<1x16xf32>
    tpu.vector_store %arg6[%c4_24, %c3_25], %20 {strides = array<i32>} : memref<22x22xf32, #tpu.memory_space<vmem>>, vector<1x16xf32>,
    %c0_26 = arith.constant 0 : index
    %c32 = arith.constant 32 : index
    %22 = vector.load %arg7[%c0_26, %c32] : memref<2x256xf32, #tpu.memory_space<vmem>>, vector<1x16xf32>
    %c5 = arith.constant 5 : index
    %c3_27 = arith.constant 3 : index
    %23 = vector.load %arg5[%c5, %c3_27] : memref<22x22xf32, #tpu.memory_space<vmem>>, vector<1x16xf32>
    tpu.vector_store %arg5[%c5, %c3_27], %22 {strides = array<i32>} : memref<22x22xf32, #tpu.memory_space<vmem>>, vector<1x16xf32>,
    %c1_28 = arith.constant 1 : index
    %c32_29 = arith.constant 32 : index
    %24 = vector.load %arg7[%c1_28, %c32_29] : memref<2x256xf32, #tpu.memory_space<vmem>>, vector<1x16xf32>
    %c5_30 = arith.constant 5 : index
    %c3_31 = arith.constant 3 : index
    %25 = vector.load %arg6[%c5_30, %c3_31] : memref<22x22xf32, #tpu.memory_space<vmem>>, vector<1x16xf32>
    tpu.vector_store %arg6[%c5_30, %c3_31], %24 {strides = array<i32>} : memref<22x22xf32, #tpu.memory_space<vmem>>, vector<1x16xf32>,
    %c0_32 = arith.constant 0 : index
    %c48 = arith.constant 48 : index
    %26 = vector.load %arg7[%c0_32, %c48] : memref<2x256xf32, #tpu.memory_space<vmem>>, vector<1x16xf32>
    %c6 = arith.constant 6 : index
    %c3_33 = arith.constant 3 : index
    %27 = vector.load %arg5[%c6, %c3_33] : memref<22x22xf32, #tpu.memory_space<vmem>>, vector<1x16xf32>
    tpu.vector_store %arg5[%c6, %c3_33], %26 {strides = array<i32>} : memref<22x22xf32, #tpu.memory_space<vmem>>, vector<1x16xf32>,
    %c1_34 = arith.constant 1 : index
    %c48_35 = arith.constant 48 : index
    %28 = vector.load %arg7[%c1_34, %c48_35] : memref<2x256xf32, #tpu.memory_space<vmem>>, vector<1x16xf32>
    %c6_36 = arith.constant 6 : index
    %c3_37 = arith.constant 3 : index
    %29 = vector.load %arg6[%c6_36, %c3_37] : memref<22x22xf32, #tpu.memory_space<vmem>>, vector<1x16xf32>
    tpu.vector_store %arg6[%c6_36, %c3_37], %28 {strides = array<i32>} : memref<22x22xf32, #tpu.memory_space<vmem>>, vector<1x16xf32>,
    %c0_38 = arith.constant 0 : index
    %c64 = arith.constant 64 : index
    %30 = vector.load %arg7[%c0_38, %c64] : memref<2x256xf32, #tpu.memory_space<vmem>>, vector<1x16xf32>
    %c7 = arith.constant 7 : index
    %c3_39 = arith.constant 3 : index
    %31 = vector.load %arg5[%c7, %c3_39] : memref<22x22xf32, #tpu.memory_space<vmem>>, vector<1x16xf32>
    tpu.vector_store %arg5[%c7, %c3_39], %30 {strides = array<i32>} : memref<22x22xf32, #tpu.memory_space<vmem>>, vector<1x16xf32>,
    %c1_40 = arith.constant 1 : index
    %c64_41 = arith.constant 64 : index
    %32 = vector.load %arg7[%c1_40, %c64_41] : memref<2x256xf32, #tpu.memory_space<vmem>>, vector<1x16xf32>
    %c7_42 = arith.constant 7 : index
    %c3_43 = arith.constant 3 : index
    %33 = vector.load %arg6[%c7_42, %c3_43] : memref<22x22xf32, #tpu.memory_space<vmem>>, vector<1x16xf32>
    tpu.vector_store %arg6[%c7_42, %c3_43], %32 {strides = array<i32>} : memref<22x22xf32, #tpu.memory_space<vmem>>, vector<1x16xf32>,
    %c0_44 = arith.constant 0 : index
    %c80 = arith.constant 80 : index
    %34 = vector.load %arg7[%c0_44, %c80] : memref<2x256xf32, #tpu.memory_space<vmem>>, vector<1x16xf32>
    %c8 = arith.constant 8 : index
    %c3_45 = arith.constant 3 : index
    %35 = vector.load %arg5[%c8, %c3_45] : memref<22x22xf32, #tpu.memory_space<vmem>>, vector<1x16xf32>
    tpu.vector_store %arg5[%c8, %c3_45], %34 {strides = array<i32>} : memref<22x22xf32, #tpu.memory_space<vmem>>, vector<1x16xf32>,
    %c1_46 = arith.constant 1 : index
    %c80_47 = arith.constant 80 : index
    %36 = vector.load %arg7[%c1_46, %c80_47] : memref<2x256xf32, #tpu.memory_space<vmem>>, vector<1x16xf32>
    %c8_48 = arith.constant 8 : index
    %c3_49 = arith.constant 3 : index
    %37 = vector.load %arg6[%c8_48, %c3_49] : memref<22x22xf32, #tpu.memory_space<vmem>>, vector<1x16xf32>
    tpu.vector_store %arg6[%c8_48, %c3_49], %36 {strides = array<i32>} : memref<22x22xf32, #tpu.memory_space<vmem>>, vector<1x16xf32>,
    %c0_50 = arith.constant 0 : index
    %c96 = arith.constant 96 : index
    %38 = vector.load %arg7[%c0_50, %c96] : memref<2x256xf32, #tpu.memory_space<vmem>>, vector<1x16xf32>
    %c9 = arith.constant 9 : index
    %c3_51 = arith.constant 3 : index
    %39 = vector.load %arg5[%c9, %c3_51] : memref<22x22xf32, #tpu.memory_space<vmem>>, vector<1x16xf32>
    tpu.vector_store %arg5[%c9, %c3_51], %38 {strides = array<i32>} : memref<22x22xf32, #tpu.memory_space<vmem>>, vector<1x16xf32>,
    %c1_52 = arith.constant 1 : index
    %c96_53 = arith.constant 96 : index
    %40 = vector.load %arg7[%c1_52, %c96_53] : memref<2x256xf32, #tpu.memory_space<vmem>>, vector<1x16xf32>
    %c9_54 = arith.constant 9 : index
    %c3_55 = arith.constant 3 : index
    %41 = vector.load %arg6[%c9_54, %c3_55] : memref<22x22xf32, #tpu.memory_space<vmem>>, vector<1x16xf32>
    tpu.vector_store %arg6[%c9_54, %c3_55], %40 {strides = array<i32>} : memref<22x22xf32, #tpu.memory_space<vmem>>, vector<1x16xf32>,
    %c0_56 = arith.constant 0 : index
    %c112 = arith.constant 112 : index
    %42 = vector.load %arg7[%c0_56, %c112] : memref<2x256xf32, #tpu.memory_space<vmem>>, vector<1x16xf32>
    %c10 = arith.constant 10 : index
    %c3_57 = arith.constant 3 : index
    %43 = vector.load %arg5[%c10, %c3_57] : memref<22x22xf32, #tpu.memory_space<vmem>>, vector<1x16xf32>
    tpu.vector_store %arg5[%c10, %c3_57], %42 {strides = array<i32>} : memref<22x22xf32, #tpu.memory_space<vmem>>, vector<1x16xf32>,
    %c1_58 = arith.constant 1 : index
    %c112_59 = arith.constant 112 : index
    %44 = vector.load %arg7[%c1_58, %c112_59] : memref<2x256xf32, #tpu.memory_space<vmem>>, vector<1x16xf32>
    %c10_60 = arith.constant 10 : index
    %c3_61 = arith.constant 3 : index
    %45 = vector.load %arg6[%c10_60, %c3_61] : memref<22x22xf32, #tpu.memory_space<vmem>>, vector<1x16xf32>
    tpu.vector_store %arg6[%c10_60, %c3_61], %44 {strides = array<i32>} : memref<22x22xf32, #tpu.memory_space<vmem>>, vector<1x16xf32>,
    %c0_62 = arith.constant 0 : index
    %c128 = arith.constant 128 : index
    %46 = vector.load %arg7[%c0_62, %c128] : memref<2x256xf32, #tpu.memory_space<vmem>>, vector<1x16xf32>
    %c11 = arith.constant 11 : index
    %c3_63 = arith.constant 3 : index
    %47 = vector.load %arg5[%c11, %c3_63] : memref<22x22xf32, #tpu.memory_space<vmem>>, vector<1x16xf32>
    tpu.vector_store %arg5[%c11, %c3_63], %46 {strides = array<i32>} : memref<22x22xf32, #tpu.memory_space<vmem>>, vector<1x16xf32>,
    %c1_64 = arith.constant 1 : index
    %c128_65 = arith.constant 128 : index
    %48 = vector.load %arg7[%c1_64, %c128_65] : memref<2x256xf32, #tpu.memory_space<vmem>>, vector<1x16xf32>
    %c11_66 = arith.constant 11 : index
    %c3_67 = arith.constant 3 : index
    %49 = vector.load %arg6[%c11_66, %c3_67] : memref<22x22xf32, #tpu.memory_space<vmem>>, vector<1x16xf32>
    tpu.vector_store %arg6[%c11_66, %c3_67], %48 {strides = array<i32>} : memref<22x22xf32, #tpu.memory_space<vmem>>, vector<1x16xf32>,
    %c0_68 = arith.constant 0 : index
    %c144 = arith.constant 144 : index
    %50 = vector.load %arg7[%c0_68, %c144] : memref<2x256xf32, #tpu.memory_space<vmem>>, vector<1x16xf32>
    %c12 = arith.constant 12 : index
    %c3_69 = arith.constant 3 : index
    %51 = vector.load %arg5[%c12, %c3_69] : memref<22x22xf32, #tpu.memory_space<vmem>>, vector<1x16xf32>
    tpu.vector_store %arg5[%c12, %c3_69], %50 {strides = array<i32>} : memref<22x22xf32, #tpu.memory_space<vmem>>, vector<1x16xf32>,
    %c1_70 = arith.constant 1 : index
    %c144_71 = arith.constant 144 : index
    %52 = vector.load %arg7[%c1_70, %c144_71] : memref<2x256xf32, #tpu.memory_space<vmem>>, vector<1x16xf32>
    %c12_72 = arith.constant 12 : index
    %c3_73 = arith.constant 3 : index
    %53 = vector.load %arg6[%c12_72, %c3_73] : memref<22x22xf32, #tpu.memory_space<vmem>>, vector<1x16xf32>
    tpu.vector_store %arg6[%c12_72, %c3_73], %52 {strides = array<i32>} : memref<22x22xf32, #tpu.memory_space<vmem>>, vector<1x16xf32>,
    %c0_74 = arith.constant 0 : index
    %c160 = arith.constant 160 : index
    %54 = vector.load %arg7[%c0_74, %c160] : memref<2x256xf32, #tpu.memory_space<vmem>>, vector<1x16xf32>
    %c13 = arith.constant 13 : index
    %c3_75 = arith.constant 3 : index
    %55 = vector.load %arg5[%c13, %c3_75] : memref<22x22xf32, #tpu.memory_space<vmem>>, vector<1x16xf32>
    tpu.vector_store %arg5[%c13, %c3_75], %54 {strides = array<i32>} : memref<22x22xf32, #tpu.memory_space<vmem>>, vector<1x16xf32>,
    %c1_76 = arith.constant 1 : index
    %c160_77 = arith.constant 160 : index
    %56 = vector.load %arg7[%c1_76, %c160_77] : memref<2x256xf32, #tpu.memory_space<vmem>>, vector<1x16xf32>
    %c13_78 = arith.constant 13 : index
    %c3_79 = arith.constant 3 : index
    %57 = vector.load %arg6[%c13_78, %c3_79] : memref<22x22xf32, #tpu.memory_space<vmem>>, vector<1x16xf32>
    tpu.vector_store %arg6[%c13_78, %c3_79], %56 {strides = array<i32>} : memref<22x22xf32, #tpu.memory_space<vmem>>, vector<1x16xf32>,
    %c0_80 = arith.constant 0 : index
    %c176 = arith.constant 176 : index
    %58 = vector.load %arg7[%c0_80, %c176] : memref<2x256xf32, #tpu.memory_space<vmem>>, vector<1x16xf32>
    %c14 = arith.constant 14 : index
    %c3_81 = arith.constant 3 : index
    %59 = vector.load %arg5[%c14, %c3_81] : memref<22x22xf32, #tpu.memory_space<vmem>>, vector<1x16xf32>
    tpu.vector_store %arg5[%c14, %c3_81], %58 {strides = array<i32>} : memref<22x22xf32, #tpu.memory_space<vmem>>, vector<1x16xf32>,
    %c1_82 = arith.constant 1 : index
    %c176_83 = arith.constant 176 : index
    %60 = vector.load %arg7[%c1_82, %c176_83] : memref<2x256xf32, #tpu.memory_space<vmem>>, vector<1x16xf32>
    %c14_84 = arith.constant 14 : index
    %c3_85 = arith.constant 3 : index
    %61 = vector.load %arg6[%c14_84, %c3_85] : memref<22x22xf32, #tpu.memory_space<vmem>>, vector<1x16xf32>
    tpu.vector_store %arg6[%c14_84, %c3_85], %60 {strides = array<i32>} : memref<22x22xf32, #tpu.memory_space<vmem>>, vector<1x16xf32>,
    %c0_86 = arith.constant 0 : index
    %c192 = arith.constant 192 : index
    %62 = vector.load %arg7[%c0_86, %c192] : memref<2x256xf32, #tpu.memory_space<vmem>>, vector<1x16xf32>
    %c15 = arith.constant 15 : index
    %c3_87 = arith.constant 3 : index
    %63 = vector.load %arg5[%c15, %c3_87] : memref<22x22xf32, #tpu.memory_space<vmem>>, vector<1x16xf32>
    tpu.vector_store %arg5[%c15, %c3_87], %62 {strides = array<i32>} : memref<22x22xf32, #tpu.memory_space<vmem>>, vector<1x16xf32>,
    %c1_88 = arith.constant 1 : index
    %c192_89 = arith.constant 192 : index
    %64 = vector.load %arg7[%c1_88, %c192_89] : memref<2x256xf32, #tpu.memory_space<vmem>>, vector<1x16xf32>
    %c15_90 = arith.constant 15 : index
    %c3_91 = arith.constant 3 : index
    %65 = vector.load %arg6[%c15_90, %c3_91] : memref<22x22xf32, #tpu.memory_space<vmem>>, vector<1x16xf32>
    tpu.vector_store %arg6[%c15_90, %c3_91], %64 {strides = array<i32>} : memref<22x22xf32, #tpu.memory_space<vmem>>, vector<1x16xf32>,
    %c0_92 = arith.constant 0 : index
    %c208 = arith.constant 208 : index
    %66 = vector.load %arg7[%c0_92, %c208] : memref<2x256xf32, #tpu.memory_space<vmem>>, vector<1x16xf32>
    %c16_93 = arith.constant 16 : index
    %c3_94 = arith.constant 3 : index
    %67 = vector.load %arg5[%c16_93, %c3_94] : memref<22x22xf32, #tpu.memory_space<vmem>>, vector<1x16xf32>
    tpu.vector_store %arg5[%c16_93, %c3_94], %66 {strides = array<i32>} : memref<22x22xf32, #tpu.memory_space<vmem>>, vector<1x16xf32>,
    %c1_95 = arith.constant 1 : index
    %c208_96 = arith.constant 208 : index
    %68 = vector.load %arg7[%c1_95, %c208_96] : memref<2x256xf32, #tpu.memory_space<vmem>>, vector<1x16xf32>
    %c16_97 = arith.constant 16 : index
    %c3_98 = arith.constant 3 : index
    %69 = vector.load %arg6[%c16_97, %c3_98] : memref<22x22xf32, #tpu.memory_space<vmem>>, vector<1x16xf32>
    tpu.vector_store %arg6[%c16_97, %c3_98], %68 {strides = array<i32>} : memref<22x22xf32, #tpu.memory_space<vmem>>, vector<1x16xf32>,
    %c0_99 = arith.constant 0 : index
    %c224 = arith.constant 224 : index
    %70 = vector.load %arg7[%c0_99, %c224] : memref<2x256xf32, #tpu.memory_space<vmem>>, vector<1x16xf32>
    %c17 = arith.constant 17 : index
    %c3_100 = arith.constant 3 : index
    %71 = vector.load %arg5[%c17, %c3_100] : memref<22x22xf32, #tpu.memory_space<vmem>>, vector<1x16xf32>
    tpu.vector_store %arg5[%c17, %c3_100], %70 {strides = array<i32>} : memref<22x22xf32, #tpu.memory_space<vmem>>, vector<1x16xf32>,
    %c1_101 = arith.constant 1 : index
    %c224_102 = arith.constant 224 : index
    %72 = vector.load %arg7[%c1_101, %c224_102] : memref<2x256xf32, #tpu.memory_space<vmem>>, vector<1x16xf32>
    %c17_103 = arith.constant 17 : index
    %c3_104 = arith.constant 3 : index
    %73 = vector.load %arg6[%c17_103, %c3_104] : memref<22x22xf32, #tpu.memory_space<vmem>>, vector<1x16xf32>
    tpu.vector_store %arg6[%c17_103, %c3_104], %72 {strides = array<i32>} : memref<22x22xf32, #tpu.memory_space<vmem>>, vector<1x16xf32>,
    %c0_105 = arith.constant 0 : index
    %c240 = arith.constant 240 : index
    %74 = vector.load %arg7[%c0_105, %c240] : memref<2x256xf32, #tpu.memory_space<vmem>>, vector<1x16xf32>
    %c18 = arith.constant 18 : index
    %c3_106 = arith.constant 3 : index
    %75 = vector.load %arg5[%c18, %c3_106] : memref<22x22xf32, #tpu.memory_space<vmem>>, vector<1x16xf32>
    tpu.vector_store %arg5[%c18, %c3_106], %74 {strides = array<i32>} : memref<22x22xf32, #tpu.memory_space<vmem>>, vector<1x16xf32>,
    %c1_107 = arith.constant 1 : index
    %c240_108 = arith.constant 240 : index
    %76 = vector.load %arg7[%c1_107, %c240_108] : memref<2x256xf32, #tpu.memory_space<vmem>>, vector<1x16xf32>
    %c18_109 = arith.constant 18 : index
    %c3_110 = arith.constant 3 : index
    %77 = vector.load %arg6[%c18_109, %c3_110] : memref<22x22xf32, #tpu.memory_space<vmem>>, vector<1x16xf32>
    tpu.vector_store %arg6[%c18_109, %c3_110], %76 {strides = array<i32>} : memref<22x22xf32, #tpu.memory_space<vmem>>, vector<1x16xf32>,
    %cst_111 = arith.constant 0.000000e+00 : f32
    %78 = vector.broadcast %cst_111 : f32 to vector<16x16xf32>
    %c0_112 = arith.constant 0 : index
    %c0_113 = arith.constant 0 : index
    %79 = vector.load %arg5[%c0_112, %c0_113] : memref<22x22xf32, #tpu.memory_space<vmem>>, vector<22x16xf32>
    %c0_114 = arith.constant 0 : index
    %c0_115 = arith.constant 0 : index
    %80 = vector.load %arg8[%c0_114, %c0_115] : memref<22x16xf32, #tpu.memory_space<vmem>>, vector<22x16xf32>
    tpu.vector_store %arg8[%c0_114, %c0_115], %79 {strides = array<i32>} : memref<22x16xf32, #tpu.memory_space<vmem>>, vector<22x16xf32>,
    %c0_116 = arith.constant 0 : index
    %c0_117 = arith.constant 0 : index
    %81 = vector.load %arg6[%c0_116, %c0_117] : memref<22x22xf32, #tpu.memory_space<vmem>>, vector<22x16xf32>
    %c0_118 = arith.constant 0 : index
    %c0_119 = arith.constant 0 : index
    %82 = vector.load %arg9[%c0_118, %c0_119] : memref<22x16xf32, #tpu.memory_space<vmem>>, vector<22x16xf32>
    tpu.vector_store %arg9[%c0_118, %c0_119], %81 {strides = array<i32>} : memref<22x16xf32, #tpu.memory_space<vmem>>, vector<22x16xf32>,
    %c0_120 = arith.constant 0 : index
    %c0_121 = arith.constant 0 : index
    %83 = vector.load %arg8[%c0_120, %c0_121] : memref<22x16xf32, #tpu.memory_space<vmem>>, vector<16x16xf32>
    %c0_122 = arith.constant 0 : index
    %84 = memref.load %arg2[%c0_122] : memref<98xf32, #tpu.memory_space<smem>>
    %85 = vector.broadcast %84 : f32 to vector<16x16xf32>
    %86 = arith.mulf %83, %85 : vector<16x16xf32>
    %87 = arith.addf %78, %86 : vector<16x16xf32>
    %c0_123 = arith.constant 0 : index
    %c0_124 = arith.constant 0 : index
    %88 = vector.load %arg9[%c0_123, %c0_124] : memref<22x16xf32, #tpu.memory_space<vmem>>, vector<16x16xf32>
    %c49 = arith.constant 49 : index
    %89 = memref.load %arg2[%c49] : memref<98xf32, #tpu.memory_space<smem>>
    %90 = vector.broadcast %89 : f32 to vector<16x16xf32>
    %91 = arith.mulf %88, %90 : vector<16x16xf32>
    %92 = arith.addf %87, %91 : vector<16x16xf32>
    %c1_125 = arith.constant 1 : index
    %c0_126 = arith.constant 0 : index
    %93 = vector.load %arg8[%c1_125, %c0_126] : memref<22x16xf32, #tpu.memory_space<vmem>>, vector<16x16xf32>
    %c7_127 = arith.constant 7 : index
    %94 = memref.load %arg2[%c7_127] : memref<98xf32, #tpu.memory_space<smem>>
    %95 = vector.broadcast %94 : f32 to vector<16x16xf32>
    %96 = arith.mulf %93, %95 : vector<16x16xf32>
    %97 = arith.addf %92, %96 : vector<16x16xf32>
    %c1_128 = arith.constant 1 : index
    %c0_129 = arith.constant 0 : index
    %98 = vector.load %arg9[%c1_128, %c0_129] : memref<22x16xf32, #tpu.memory_space<vmem>>, vector<16x16xf32>
    %c56 = arith.constant 56 : index
    %99 = memref.load %arg2[%c56] : memref<98xf32, #tpu.memory_space<smem>>
    %100 = vector.broadcast %99 : f32 to vector<16x16xf32>
    %101 = arith.mulf %98, %100 : vector<16x16xf32>
    %102 = arith.addf %97, %101 : vector<16x16xf32>
    %c2 = arith.constant 2 : index
    %c0_130 = arith.constant 0 : index
    %103 = vector.load %arg8[%c2, %c0_130] : memref<22x16xf32, #tpu.memory_space<vmem>>, vector<16x16xf32>
    %c14_131 = arith.constant 14 : index
    %104 = memref.load %arg2[%c14_131] : memref<98xf32, #tpu.memory_space<smem>>
    %105 = vector.broadcast %104 : f32 to vector<16x16xf32>
    %106 = arith.mulf %103, %105 : vector<16x16xf32>
    %107 = arith.addf %102, %106 : vector<16x16xf32>
    %c2_132 = arith.constant 2 : index
    %c0_133 = arith.constant 0 : index
    %108 = vector.load %arg9[%c2_132, %c0_133] : memref<22x16xf32, #tpu.memory_space<vmem>>, vector<16x16xf32>
    %c63 = arith.constant 63 : index
    %109 = memref.load %arg2[%c63] : memref<98xf32, #tpu.memory_space<smem>>
    %110 = vector.broadcast %109 : f32 to vector<16x16xf32>
    %111 = arith.mulf %108, %110 : vector<16x16xf32>
    %112 = arith.addf %107, %111 : vector<16x16xf32>
    %c3_134 = arith.constant 3 : index
    %c0_135 = arith.constant 0 : index
    %113 = vector.load %arg8[%c3_134, %c0_135] : memref<22x16xf32, #tpu.memory_space<vmem>>, vector<16x16xf32>
    %c21 = arith.constant 21 : index
    %114 = memref.load %arg2[%c21] : memref<98xf32, #tpu.memory_space<smem>>
    %115 = vector.broadcast %114 : f32 to vector<16x16xf32>
    %116 = arith.mulf %113, %115 : vector<16x16xf32>
    %117 = arith.addf %112, %116 : vector<16x16xf32>
    %c3_136 = arith.constant 3 : index
    %c0_137 = arith.constant 0 : index
    %118 = vector.load %arg9[%c3_136, %c0_137] : memref<22x16xf32, #tpu.memory_space<vmem>>, vector<16x16xf32>
    %c70 = arith.constant 70 : index
    %119 = memref.load %arg2[%c70] : memref<98xf32, #tpu.memory_space<smem>>
    %120 = vector.broadcast %119 : f32 to vector<16x16xf32>
    %121 = arith.mulf %118, %120 : vector<16x16xf32>
    %122 = arith.addf %117, %121 : vector<16x16xf32>
    %c4_138 = arith.constant 4 : index
    %c0_139 = arith.constant 0 : index
    %123 = vector.load %arg8[%c4_138, %c0_139] : memref<22x16xf32, #tpu.memory_space<vmem>>, vector<16x16xf32>
    %c28 = arith.constant 28 : index
    %124 = memref.load %arg2[%c28] : memref<98xf32, #tpu.memory_space<smem>>
    %125 = vector.broadcast %124 : f32 to vector<16x16xf32>
    %126 = arith.mulf %123, %125 : vector<16x16xf32>
    %127 = arith.addf %122, %126 : vector<16x16xf32>
    %c4_140 = arith.constant 4 : index
    %c0_141 = arith.constant 0 : index
    %128 = vector.load %arg9[%c4_140, %c0_141] : memref<22x16xf32, #tpu.memory_space<vmem>>, vector<16x16xf32>
    %c77 = arith.constant 77 : index
    %129 = memref.load %arg2[%c77] : memref<98xf32, #tpu.memory_space<smem>>
    %130 = vector.broadcast %129 : f32 to vector<16x16xf32>
    %131 = arith.mulf %128, %130 : vector<16x16xf32>
    %132 = arith.addf %127, %131 : vector<16x16xf32>
    %c5_142 = arith.constant 5 : index
    %c0_143 = arith.constant 0 : index
    %133 = vector.load %arg8[%c5_142, %c0_143] : memref<22x16xf32, #tpu.memory_space<vmem>>, vector<16x16xf32>
    %c35 = arith.constant 35 : index
    %134 = memref.load %arg2[%c35] : memref<98xf32, #tpu.memory_space<smem>>
    %135 = vector.broadcast %134 : f32 to vector<16x16xf32>
    %136 = arith.mulf %133, %135 : vector<16x16xf32>
    %137 = arith.addf %132, %136 : vector<16x16xf32>
    %c5_144 = arith.constant 5 : index
    %c0_145 = arith.constant 0 : index
    %138 = vector.load %arg9[%c5_144, %c0_145] : memref<22x16xf32, #tpu.memory_space<vmem>>, vector<16x16xf32>
    %c84 = arith.constant 84 : index
    %139 = memref.load %arg2[%c84] : memref<98xf32, #tpu.memory_space<smem>>
    %140 = vector.broadcast %139 : f32 to vector<16x16xf32>
    %141 = arith.mulf %138, %140 : vector<16x16xf32>
    %142 = arith.addf %137, %141 : vector<16x16xf32>
    %c6_146 = arith.constant 6 : index
    %c0_147 = arith.constant 0 : index
    %143 = vector.load %arg8[%c6_146, %c0_147] : memref<22x16xf32, #tpu.memory_space<vmem>>, vector<16x16xf32>
    %c42 = arith.constant 42 : index
    %144 = memref.load %arg2[%c42] : memref<98xf32, #tpu.memory_space<smem>>
    %145 = vector.broadcast %144 : f32 to vector<16x16xf32>
    %146 = arith.mulf %143, %145 : vector<16x16xf32>
    %147 = arith.addf %142, %146 : vector<16x16xf32>
    %c6_148 = arith.constant 6 : index
    %c0_149 = arith.constant 0 : index
    %148 = vector.load %arg9[%c6_148, %c0_149] : memref<22x16xf32, #tpu.memory_space<vmem>>, vector<16x16xf32>
    %c91 = arith.constant 91 : index
    %149 = memref.load %arg2[%c91] : memref<98xf32, #tpu.memory_space<smem>>
    %150 = vector.broadcast %149 : f32 to vector<16x16xf32>
    %151 = arith.mulf %148, %150 : vector<16x16xf32>
    %152 = arith.addf %147, %151 : vector<16x16xf32>
    %c0_150 = arith.constant 0 : index
    %c1_151 = arith.constant 1 : index
    %153 = vector.load %arg5[%c0_150, %c1_151] : memref<22x22xf32, #tpu.memory_space<vmem>>, vector<22x16xf32>
    %c0_152 = arith.constant 0 : index
    %c0_153 = arith.constant 0 : index
    %154 = vector.load %arg8[%c0_152, %c0_153] : memref<22x16xf32, #tpu.memory_space<vmem>>, vector<22x16xf32>
    tpu.vector_store %arg8[%c0_152, %c0_153], %153 {strides = array<i32>} : memref<22x16xf32, #tpu.memory_space<vmem>>, vector<22x16xf32>,
    %c0_154 = arith.constant 0 : index
    %c1_155 = arith.constant 1 : index
    %155 = vector.load %arg6[%c0_154, %c1_155] : memref<22x22xf32, #tpu.memory_space<vmem>>, vector<22x16xf32>
    %c0_156 = arith.constant 0 : index
    %c0_157 = arith.constant 0 : index
    %156 = vector.load %arg9[%c0_156, %c0_157] : memref<22x16xf32, #tpu.memory_space<vmem>>, vector<22x16xf32>
    tpu.vector_store %arg9[%c0_156, %c0_157], %155 {strides = array<i32>} : memref<22x16xf32, #tpu.memory_space<vmem>>, vector<22x16xf32>,
    %c0_158 = arith.constant 0 : index
    %c0_159 = arith.constant 0 : index
    %157 = vector.load %arg8[%c0_158, %c0_159] : memref<22x16xf32, #tpu.memory_space<vmem>>, vector<16x16xf32>
    %c1_160 = arith.constant 1 : index
    %158 = memref.load %arg2[%c1_160] : memref<98xf32, #tpu.memory_space<smem>>
    %159 = vector.broadcast %158 : f32 to vector<16x16xf32>
    %160 = arith.mulf %157, %159 : vector<16x16xf32>
    %161 = arith.addf %152, %160 : vector<16x16xf32>
    %c0_161 = arith.constant 0 : index
    %c0_162 = arith.constant 0 : index
    %162 = vector.load %arg9[%c0_161, %c0_162] : memref<22x16xf32, #tpu.memory_space<vmem>>, vector<16x16xf32>
    %c50 = arith.constant 50 : index
    %163 = memref.load %arg2[%c50] : memref<98xf32, #tpu.memory_space<smem>>
    %164 = vector.broadcast %163 : f32 to vector<16x16xf32>
    %165 = arith.mulf %162, %164 : vector<16x16xf32>
    %166 = arith.addf %161, %165 : vector<16x16xf32>
    %c1_163 = arith.constant 1 : index
    %c0_164 = arith.constant 0 : index
    %167 = vector.load %arg8[%c1_163, %c0_164] : memref<22x16xf32, #tpu.memory_space<vmem>>, vector<16x16xf32>
    %c8_165 = arith.constant 8 : index
    %168 = memref.load %arg2[%c8_165] : memref<98xf32, #tpu.memory_space<smem>>
    %169 = vector.broadcast %168 : f32 to vector<16x16xf32>
    %170 = arith.mulf %167, %169 : vector<16x16xf32>
    %171 = arith.addf %166, %170 : vector<16x16xf32>
    %c1_166 = arith.constant 1 : index
    %c0_167 = arith.constant 0 : index
    %172 = vector.load %arg9[%c1_166, %c0_167] : memref<22x16xf32, #tpu.memory_space<vmem>>, vector<16x16xf32>
    %c57 = arith.constant 57 : index
    %173 = memref.load %arg2[%c57] : memref<98xf32, #tpu.memory_space<smem>>
    %174 = vector.broadcast %173 : f32 to vector<16x16xf32>
    %175 = arith.mulf %172, %174 : vector<16x16xf32>
    %176 = arith.addf %171, %175 : vector<16x16xf32>
    %c2_168 = arith.constant 2 : index
    %c0_169 = arith.constant 0 : index
    %177 = vector.load %arg8[%c2_168, %c0_169] : memref<22x16xf32, #tpu.memory_space<vmem>>, vector<16x16xf32>
    %c15_170 = arith.constant 15 : index
    %178 = memref.load %arg2[%c15_170] : memref<98xf32, #tpu.memory_space<smem>>
    %179 = vector.broadcast %178 : f32 to vector<16x16xf32>
    %180 = arith.mulf %177, %179 : vector<16x16xf32>
    %181 = arith.addf %176, %180 : vector<16x16xf32>
    %c2_171 = arith.constant 2 : index
    %c0_172 = arith.constant 0 : index
    %182 = vector.load %arg9[%c2_171, %c0_172] : memref<22x16xf32, #tpu.memory_space<vmem>>, vector<16x16xf32>
    %c64_173 = arith.constant 64 : index
    %183 = memref.load %arg2[%c64_173] : memref<98xf32, #tpu.memory_space<smem>>
    %184 = vector.broadcast %183 : f32 to vector<16x16xf32>
    %185 = arith.mulf %182, %184 : vector<16x16xf32>
    %186 = arith.addf %181, %185 : vector<16x16xf32>
    %c3_174 = arith.constant 3 : index
    %c0_175 = arith.constant 0 : index
    %187 = vector.load %arg8[%c3_174, %c0_175] : memref<22x16xf32, #tpu.memory_space<vmem>>, vector<16x16xf32>
    %c22 = arith.constant 22 : index
    %188 = memref.load %arg2[%c22] : memref<98xf32, #tpu.memory_space<smem>>
    %189 = vector.broadcast %188 : f32 to vector<16x16xf32>
    %190 = arith.mulf %187, %189 : vector<16x16xf32>
    %191 = arith.addf %186, %190 : vector<16x16xf32>
    %c3_176 = arith.constant 3 : index
    %c0_177 = arith.constant 0 : index
    %192 = vector.load %arg9[%c3_176, %c0_177] : memref<22x16xf32, #tpu.memory_space<vmem>>, vector<16x16xf32>
    %c71 = arith.constant 71 : index
    %193 = memref.load %arg2[%c71] : memref<98xf32, #tpu.memory_space<smem>>
    %194 = vector.broadcast %193 : f32 to vector<16x16xf32>
    %195 = arith.mulf %192, %194 : vector<16x16xf32>
    %196 = arith.addf %191, %195 : vector<16x16xf32>
    %c4_178 = arith.constant 4 : index
    %c0_179 = arith.constant 0 : index
    %197 = vector.load %arg8[%c4_178, %c0_179] : memref<22x16xf32, #tpu.memory_space<vmem>>, vector<16x16xf32>
    %c29 = arith.constant 29 : index
    %198 = memref.load %arg2[%c29] : memref<98xf32, #tpu.memory_space<smem>>
    %199 = vector.broadcast %198 : f32 to vector<16x16xf32>
    %200 = arith.mulf %197, %199 : vector<16x16xf32>
    %201 = arith.addf %196, %200 : vector<16x16xf32>
    %c4_180 = arith.constant 4 : index
    %c0_181 = arith.constant 0 : index
    %202 = vector.load %arg9[%c4_180, %c0_181] : memref<22x16xf32, #tpu.memory_space<vmem>>, vector<16x16xf32>
    %c78 = arith.constant 78 : index
    %203 = memref.load %arg2[%c78] : memref<98xf32, #tpu.memory_space<smem>>
    %204 = vector.broadcast %203 : f32 to vector<16x16xf32>
    %205 = arith.mulf %202, %204 : vector<16x16xf32>
    %206 = arith.addf %201, %205 : vector<16x16xf32>
    %c5_182 = arith.constant 5 : index
    %c0_183 = arith.constant 0 : index
    %207 = vector.load %arg8[%c5_182, %c0_183] : memref<22x16xf32, #tpu.memory_space<vmem>>, vector<16x16xf32>
    %c36 = arith.constant 36 : index
    %208 = memref.load %arg2[%c36] : memref<98xf32, #tpu.memory_space<smem>>
    %209 = vector.broadcast %208 : f32 to vector<16x16xf32>
    %210 = arith.mulf %207, %209 : vector<16x16xf32>
    %211 = arith.addf %206, %210 : vector<16x16xf32>
    %c5_184 = arith.constant 5 : index
    %c0_185 = arith.constant 0 : index
    %212 = vector.load %arg9[%c5_184, %c0_185] : memref<22x16xf32, #tpu.memory_space<vmem>>, vector<16x16xf32>
    %c85 = arith.constant 85 : index
    %213 = memref.load %arg2[%c85] : memref<98xf32, #tpu.memory_space<smem>>
    %214 = vector.broadcast %213 : f32 to vector<16x16xf32>
    %215 = arith.mulf %212, %214 : vector<16x16xf32>
    %216 = arith.addf %211, %215 : vector<16x16xf32>
    %c6_186 = arith.constant 6 : index
    %c0_187 = arith.constant 0 : index
    %217 = vector.load %arg8[%c6_186, %c0_187] : memref<22x16xf32, #tpu.memory_space<vmem>>, vector<16x16xf32>
    %c43 = arith.constant 43 : index
    %218 = memref.load %arg2[%c43] : memref<98xf32, #tpu.memory_space<smem>>
    %219 = vector.broadcast %218 : f32 to vector<16x16xf32>
    %220 = arith.mulf %217, %219 : vector<16x16xf32>
    %221 = arith.addf %216, %220 : vector<16x16xf32>
    %c6_188 = arith.constant 6 : index
    %c0_189 = arith.constant 0 : index
    %222 = vector.load %arg9[%c6_188, %c0_189] : memref<22x16xf32, #tpu.memory_space<vmem>>, vector<16x16xf32>
    %c92 = arith.constant 92 : index
    %223 = memref.load %arg2[%c92] : memref<98xf32, #tpu.memory_space<smem>>
    %224 = vector.broadcast %223 : f32 to vector<16x16xf32>
    %225 = arith.mulf %222, %224 : vector<16x16xf32>
    %226 = arith.addf %221, %225 : vector<16x16xf32>
    %c0_190 = arith.constant 0 : index
    %c2_191 = arith.constant 2 : index
    %227 = vector.load %arg5[%c0_190, %c2_191] : memref<22x22xf32, #tpu.memory_space<vmem>>, vector<22x16xf32>
    %c0_192 = arith.constant 0 : index
    %c0_193 = arith.constant 0 : index
    %228 = vector.load %arg8[%c0_192, %c0_193] : memref<22x16xf32, #tpu.memory_space<vmem>>, vector<22x16xf32>
    tpu.vector_store %arg8[%c0_192, %c0_193], %227 {strides = array<i32>} : memref<22x16xf32, #tpu.memory_space<vmem>>, vector<22x16xf32>,
    %c0_194 = arith.constant 0 : index
    %c2_195 = arith.constant 2 : index
    %229 = vector.load %arg6[%c0_194, %c2_195] : memref<22x22xf32, #tpu.memory_space<vmem>>, vector<22x16xf32>
    %c0_196 = arith.constant 0 : index
    %c0_197 = arith.constant 0 : index
    %230 = vector.load %arg9[%c0_196, %c0_197] : memref<22x16xf32, #tpu.memory_space<vmem>>, vector<22x16xf32>
    tpu.vector_store %arg9[%c0_196, %c0_197], %229 {strides = array<i32>} : memref<22x16xf32, #tpu.memory_space<vmem>>, vector<22x16xf32>,
    %c0_198 = arith.constant 0 : index
    %c0_199 = arith.constant 0 : index
    %231 = vector.load %arg8[%c0_198, %c0_199] : memref<22x16xf32, #tpu.memory_space<vmem>>, vector<16x16xf32>
    %c2_200 = arith.constant 2 : index
    %232 = memref.load %arg2[%c2_200] : memref<98xf32, #tpu.memory_space<smem>>
    %233 = vector.broadcast %232 : f32 to vector<16x16xf32>
    %234 = arith.mulf %231, %233 : vector<16x16xf32>
    %235 = arith.addf %226, %234 : vector<16x16xf32>
    %c0_201 = arith.constant 0 : index
    %c0_202 = arith.constant 0 : index
    %236 = vector.load %arg9[%c0_201, %c0_202] : memref<22x16xf32, #tpu.memory_space<vmem>>, vector<16x16xf32>
    %c51 = arith.constant 51 : index
    %237 = memref.load %arg2[%c51] : memref<98xf32, #tpu.memory_space<smem>>
    %238 = vector.broadcast %237 : f32 to vector<16x16xf32>
    %239 = arith.mulf %236, %238 : vector<16x16xf32>
    %240 = arith.addf %235, %239 : vector<16x16xf32>
    %c1_203 = arith.constant 1 : index
    %c0_204 = arith.constant 0 : index
    %241 = vector.load %arg8[%c1_203, %c0_204] : memref<22x16xf32, #tpu.memory_space<vmem>>, vector<16x16xf32>
    %c9_205 = arith.constant 9 : index
    %242 = memref.load %arg2[%c9_205] : memref<98xf32, #tpu.memory_space<smem>>
    %243 = vector.broadcast %242 : f32 to vector<16x16xf32>
    %244 = arith.mulf %241, %243 : vector<16x16xf32>
    %245 = arith.addf %240, %244 : vector<16x16xf32>
    %c1_206 = arith.constant 1 : index
    %c0_207 = arith.constant 0 : index
    %246 = vector.load %arg9[%c1_206, %c0_207] : memref<22x16xf32, #tpu.memory_space<vmem>>, vector<16x16xf32>
    %c58 = arith.constant 58 : index
    %247 = memref.load %arg2[%c58] : memref<98xf32, #tpu.memory_space<smem>>
    %248 = vector.broadcast %247 : f32 to vector<16x16xf32>
    %249 = arith.mulf %246, %248 : vector<16x16xf32>
    %250 = arith.addf %245, %249 : vector<16x16xf32>
    %c2_208 = arith.constant 2 : index
    %c0_209 = arith.constant 0 : index
    %251 = vector.load %arg8[%c2_208, %c0_209] : memref<22x16xf32, #tpu.memory_space<vmem>>, vector<16x16xf32>
    %c16_210 = arith.constant 16 : index
    %252 = memref.load %arg2[%c16_210] : memref<98xf32, #tpu.memory_space<smem>>
    %253 = vector.broadcast %252 : f32 to vector<16x16xf32>
    %254 = arith.mulf %251, %253 : vector<16x16xf32>
    %255 = arith.addf %250, %254 : vector<16x16xf32>
    %c2_211 = arith.constant 2 : index
    %c0_212 = arith.constant 0 : index
    %256 = vector.load %arg9[%c2_211, %c0_212] : memref<22x16xf32, #tpu.memory_space<vmem>>, vector<16x16xf32>
    %c65 = arith.constant 65 : index
    %257 = memref.load %arg2[%c65] : memref<98xf32, #tpu.memory_space<smem>>
    %258 = vector.broadcast %257 : f32 to vector<16x16xf32>
    %259 = arith.mulf %256, %258 : vector<16x16xf32>
    %260 = arith.addf %255, %259 : vector<16x16xf32>
    %c3_213 = arith.constant 3 : index
    %c0_214 = arith.constant 0 : index
    %261 = vector.load %arg8[%c3_213, %c0_214] : memref<22x16xf32, #tpu.memory_space<vmem>>, vector<16x16xf32>
    %c23 = arith.constant 23 : index
    %262 = memref.load %arg2[%c23] : memref<98xf32, #tpu.memory_space<smem>>
    %263 = vector.broadcast %262 : f32 to vector<16x16xf32>
    %264 = arith.mulf %261, %263 : vector<16x16xf32>
    %265 = arith.addf %260, %264 : vector<16x16xf32>
    %c3_215 = arith.constant 3 : index
    %c0_216 = arith.constant 0 : index
    %266 = vector.load %arg9[%c3_215, %c0_216] : memref<22x16xf32, #tpu.memory_space<vmem>>, vector<16x16xf32>
    %c72 = arith.constant 72 : index
    %267 = memref.load %arg2[%c72] : memref<98xf32, #tpu.memory_space<smem>>
    %268 = vector.broadcast %267 : f32 to vector<16x16xf32>
    %269 = arith.mulf %266, %268 : vector<16x16xf32>
    %270 = arith.addf %265, %269 : vector<16x16xf32>
    %c4_217 = arith.constant 4 : index
    %c0_218 = arith.constant 0 : index
    %271 = vector.load %arg8[%c4_217, %c0_218] : memref<22x16xf32, #tpu.memory_space<vmem>>, vector<16x16xf32>
    %c30 = arith.constant 30 : index
    %272 = memref.load %arg2[%c30] : memref<98xf32, #tpu.memory_space<smem>>
    %273 = vector.broadcast %272 : f32 to vector<16x16xf32>
    %274 = arith.mulf %271, %273 : vector<16x16xf32>
    %275 = arith.addf %270, %274 : vector<16x16xf32>
    %c4_219 = arith.constant 4 : index
    %c0_220 = arith.constant 0 : index
    %276 = vector.load %arg9[%c4_219, %c0_220] : memref<22x16xf32, #tpu.memory_space<vmem>>, vector<16x16xf32>
    %c79 = arith.constant 79 : index
    %277 = memref.load %arg2[%c79] : memref<98xf32, #tpu.memory_space<smem>>
    %278 = vector.broadcast %277 : f32 to vector<16x16xf32>
    %279 = arith.mulf %276, %278 : vector<16x16xf32>
    %280 = arith.addf %275, %279 : vector<16x16xf32>
    %c5_221 = arith.constant 5 : index
    %c0_222 = arith.constant 0 : index
    %281 = vector.load %arg8[%c5_221, %c0_222] : memref<22x16xf32, #tpu.memory_space<vmem>>, vector<16x16xf32>
    %c37 = arith.constant 37 : index
    %282 = memref.load %arg2[%c37] : memref<98xf32, #tpu.memory_space<smem>>
    %283 = vector.broadcast %282 : f32 to vector<16x16xf32>
    %284 = arith.mulf %281, %283 : vector<16x16xf32>
    %285 = arith.addf %280, %284 : vector<16x16xf32>
    %c5_223 = arith.constant 5 : index
    %c0_224 = arith.constant 0 : index
    %286 = vector.load %arg9[%c5_223, %c0_224] : memref<22x16xf32, #tpu.memory_space<vmem>>, vector<16x16xf32>
    %c86 = arith.constant 86 : index
    %287 = memref.load %arg2[%c86] : memref<98xf32, #tpu.memory_space<smem>>
    %288 = vector.broadcast %287 : f32 to vector<16x16xf32>
    %289 = arith.mulf %286, %288 : vector<16x16xf32>
    %290 = arith.addf %285, %289 : vector<16x16xf32>
    %c6_225 = arith.constant 6 : index
    %c0_226 = arith.constant 0 : index
    %291 = vector.load %arg8[%c6_225, %c0_226] : memref<22x16xf32, #tpu.memory_space<vmem>>, vector<16x16xf32>
    %c44 = arith.constant 44 : index
    %292 = memref.load %arg2[%c44] : memref<98xf32, #tpu.memory_space<smem>>
    %293 = vector.broadcast %292 : f32 to vector<16x16xf32>
    %294 = arith.mulf %291, %293 : vector<16x16xf32>
    %295 = arith.addf %290, %294 : vector<16x16xf32>
    %c6_227 = arith.constant 6 : index
    %c0_228 = arith.constant 0 : index
    %296 = vector.load %arg9[%c6_227, %c0_228] : memref<22x16xf32, #tpu.memory_space<vmem>>, vector<16x16xf32>
    %c93 = arith.constant 93 : index
    %297 = memref.load %arg2[%c93] : memref<98xf32, #tpu.memory_space<smem>>
    %298 = vector.broadcast %297 : f32 to vector<16x16xf32>
    %299 = arith.mulf %296, %298 : vector<16x16xf32>
    %300 = arith.addf %295, %299 : vector<16x16xf32>
    %c0_229 = arith.constant 0 : index
    %c3_230 = arith.constant 3 : index
    %301 = vector.load %arg5[%c0_229, %c3_230] : memref<22x22xf32, #tpu.memory_space<vmem>>, vector<22x16xf32>
    %c0_231 = arith.constant 0 : index
    %c0_232 = arith.constant 0 : index
    %302 = vector.load %arg8[%c0_231, %c0_232] : memref<22x16xf32, #tpu.memory_space<vmem>>, vector<22x16xf32>
    tpu.vector_store %arg8[%c0_231, %c0_232], %301 {strides = array<i32>} : memref<22x16xf32, #tpu.memory_space<vmem>>, vector<22x16xf32>,
    %c0_233 = arith.constant 0 : index
    %c3_234 = arith.constant 3 : index
    %303 = vector.load %arg6[%c0_233, %c3_234] : memref<22x22xf32, #tpu.memory_space<vmem>>, vector<22x16xf32>
    %c0_235 = arith.constant 0 : index
    %c0_236 = arith.constant 0 : index
    %304 = vector.load %arg9[%c0_235, %c0_236] : memref<22x16xf32, #tpu.memory_space<vmem>>, vector<22x16xf32>
    tpu.vector_store %arg9[%c0_235, %c0_236], %303 {strides = array<i32>} : memref<22x16xf32, #tpu.memory_space<vmem>>, vector<22x16xf32>,
    %c0_237 = arith.constant 0 : index
    %c0_238 = arith.constant 0 : index
    %305 = vector.load %arg8[%c0_237, %c0_238] : memref<22x16xf32, #tpu.memory_space<vmem>>, vector<16x16xf32>
    %c3_239 = arith.constant 3 : index
    %306 = memref.load %arg2[%c3_239] : memref<98xf32, #tpu.memory_space<smem>>
    %307 = vector.broadcast %306 : f32 to vector<16x16xf32>
    %308 = arith.mulf %305, %307 : vector<16x16xf32>
    %309 = arith.addf %300, %308 : vector<16x16xf32>
    %c0_240 = arith.constant 0 : index
    %c0_241 = arith.constant 0 : index
    %310 = vector.load %arg9[%c0_240, %c0_241] : memref<22x16xf32, #tpu.memory_space<vmem>>, vector<16x16xf32>
    %c52 = arith.constant 52 : index
    %311 = memref.load %arg2[%c52] : memref<98xf32, #tpu.memory_space<smem>>
    %312 = vector.broadcast %311 : f32 to vector<16x16xf32>
    %313 = arith.mulf %310, %312 : vector<16x16xf32>
    %314 = arith.addf %309, %313 : vector<16x16xf32>
    %c1_242 = arith.constant 1 : index
    %c0_243 = arith.constant 0 : index
    %315 = vector.load %arg8[%c1_242, %c0_243] : memref<22x16xf32, #tpu.memory_space<vmem>>, vector<16x16xf32>
    %c10_244 = arith.constant 10 : index
    %316 = memref.load %arg2[%c10_244] : memref<98xf32, #tpu.memory_space<smem>>
    %317 = vector.broadcast %316 : f32 to vector<16x16xf32>
    %318 = arith.mulf %315, %317 : vector<16x16xf32>
    %319 = arith.addf %314, %318 : vector<16x16xf32>
    %c1_245 = arith.constant 1 : index
    %c0_246 = arith.constant 0 : index
    %320 = vector.load %arg9[%c1_245, %c0_246] : memref<22x16xf32, #tpu.memory_space<vmem>>, vector<16x16xf32>
    %c59 = arith.constant 59 : index
    %321 = memref.load %arg2[%c59] : memref<98xf32, #tpu.memory_space<smem>>
    %322 = vector.broadcast %321 : f32 to vector<16x16xf32>
    %323 = arith.mulf %320, %322 : vector<16x16xf32>
    %324 = arith.addf %319, %323 : vector<16x16xf32>
    %c2_247 = arith.constant 2 : index
    %c0_248 = arith.constant 0 : index
    %325 = vector.load %arg8[%c2_247, %c0_248] : memref<22x16xf32, #tpu.memory_space<vmem>>, vector<16x16xf32>
    %c17_249 = arith.constant 17 : index
    %326 = memref.load %arg2[%c17_249] : memref<98xf32, #tpu.memory_space<smem>>
    %327 = vector.broadcast %326 : f32 to vector<16x16xf32>
    %328 = arith.mulf %325, %327 : vector<16x16xf32>
    %329 = arith.addf %324, %328 : vector<16x16xf32>
    %c2_250 = arith.constant 2 : index
    %c0_251 = arith.constant 0 : index
    %330 = vector.load %arg9[%c2_250, %c0_251] : memref<22x16xf32, #tpu.memory_space<vmem>>, vector<16x16xf32>
    %c66 = arith.constant 66 : index
    %331 = memref.load %arg2[%c66] : memref<98xf32, #tpu.memory_space<smem>>
    %332 = vector.broadcast %331 : f32 to vector<16x16xf32>
    %333 = arith.mulf %330, %332 : vector<16x16xf32>
    %334 = arith.addf %329, %333 : vector<16x16xf32>
    %c3_252 = arith.constant 3 : index
    %c0_253 = arith.constant 0 : index
    %335 = vector.load %arg8[%c3_252, %c0_253] : memref<22x16xf32, #tpu.memory_space<vmem>>, vector<16x16xf32>
    %c24 = arith.constant 24 : index
    %336 = memref.load %arg2[%c24] : memref<98xf32, #tpu.memory_space<smem>>
    %337 = vector.broadcast %336 : f32 to vector<16x16xf32>
    %338 = arith.mulf %335, %337 : vector<16x16xf32>
    %339 = arith.addf %334, %338 : vector<16x16xf32>
    %c3_254 = arith.constant 3 : index
    %c0_255 = arith.constant 0 : index
    %340 = vector.load %arg9[%c3_254, %c0_255] : memref<22x16xf32, #tpu.memory_space<vmem>>, vector<16x16xf32>
    %c73 = arith.constant 73 : index
    %341 = memref.load %arg2[%c73] : memref<98xf32, #tpu.memory_space<smem>>
    %342 = vector.broadcast %341 : f32 to vector<16x16xf32>
    %343 = arith.mulf %340, %342 : vector<16x16xf32>
    %344 = arith.addf %339, %343 : vector<16x16xf32>
    %c4_256 = arith.constant 4 : index
    %c0_257 = arith.constant 0 : index
    %345 = vector.load %arg8[%c4_256, %c0_257] : memref<22x16xf32, #tpu.memory_space<vmem>>, vector<16x16xf32>
    %c31 = arith.constant 31 : index
    %346 = memref.load %arg2[%c31] : memref<98xf32, #tpu.memory_space<smem>>
    %347 = vector.broadcast %346 : f32 to vector<16x16xf32>
    %348 = arith.mulf %345, %347 : vector<16x16xf32>
    %349 = arith.addf %344, %348 : vector<16x16xf32>
    %c4_258 = arith.constant 4 : index
    %c0_259 = arith.constant 0 : index
    %350 = vector.load %arg9[%c4_258, %c0_259] : memref<22x16xf32, #tpu.memory_space<vmem>>, vector<16x16xf32>
    %c80_260 = arith.constant 80 : index
    %351 = memref.load %arg2[%c80_260] : memref<98xf32, #tpu.memory_space<smem>>
    %352 = vector.broadcast %351 : f32 to vector<16x16xf32>
    %353 = arith.mulf %350, %352 : vector<16x16xf32>
    %354 = arith.addf %349, %353 : vector<16x16xf32>
    %c5_261 = arith.constant 5 : index
    %c0_262 = arith.constant 0 : index
    %355 = vector.load %arg8[%c5_261, %c0_262] : memref<22x16xf32, #tpu.memory_space<vmem>>, vector<16x16xf32>
    %c38 = arith.constant 38 : index
    %356 = memref.load %arg2[%c38] : memref<98xf32, #tpu.memory_space<smem>>
    %357 = vector.broadcast %356 : f32 to vector<16x16xf32>
    %358 = arith.mulf %355, %357 : vector<16x16xf32>
    %359 = arith.addf %354, %358 : vector<16x16xf32>
    %c5_263 = arith.constant 5 : index
    %c0_264 = arith.constant 0 : index
    %360 = vector.load %arg9[%c5_263, %c0_264] : memref<22x16xf32, #tpu.memory_space<vmem>>, vector<16x16xf32>
    %c87 = arith.constant 87 : index
    %361 = memref.load %arg2[%c87] : memref<98xf32, #tpu.memory_space<smem>>
    %362 = vector.broadcast %361 : f32 to vector<16x16xf32>
    %363 = arith.mulf %360, %362 : vector<16x16xf32>
    %364 = arith.addf %359, %363 : vector<16x16xf32>
    %c6_265 = arith.constant 6 : index
    %c0_266 = arith.constant 0 : index
    %365 = vector.load %arg8[%c6_265, %c0_266] : memref<22x16xf32, #tpu.memory_space<vmem>>, vector<16x16xf32>
    %c45 = arith.constant 45 : index
    %366 = memref.load %arg2[%c45] : memref<98xf32, #tpu.memory_space<smem>>
    %367 = vector.broadcast %366 : f32 to vector<16x16xf32>
    %368 = arith.mulf %365, %367 : vector<16x16xf32>
    %369 = arith.addf %364, %368 : vector<16x16xf32>
    %c6_267 = arith.constant 6 : index
    %c0_268 = arith.constant 0 : index
    %370 = vector.load %arg9[%c6_267, %c0_268] : memref<22x16xf32, #tpu.memory_space<vmem>>, vector<16x16xf32>
    %c94 = arith.constant 94 : index
    %371 = memref.load %arg2[%c94] : memref<98xf32, #tpu.memory_space<smem>>
    %372 = vector.broadcast %371 : f32 to vector<16x16xf32>
    %373 = arith.mulf %370, %372 : vector<16x16xf32>
    %374 = arith.addf %369, %373 : vector<16x16xf32>
    %c0_269 = arith.constant 0 : index
    %c4_270 = arith.constant 4 : index
    %375 = vector.load %arg5[%c0_269, %c4_270] : memref<22x22xf32, #tpu.memory_space<vmem>>, vector<22x16xf32>
    %c0_271 = arith.constant 0 : index
    %c0_272 = arith.constant 0 : index
    %376 = vector.load %arg8[%c0_271, %c0_272] : memref<22x16xf32, #tpu.memory_space<vmem>>, vector<22x16xf32>
    tpu.vector_store %arg8[%c0_271, %c0_272], %375 {strides = array<i32>} : memref<22x16xf32, #tpu.memory_space<vmem>>, vector<22x16xf32>,
    %c0_273 = arith.constant 0 : index
    %c4_274 = arith.constant 4 : index
    %377 = vector.load %arg6[%c0_273, %c4_274] : memref<22x22xf32, #tpu.memory_space<vmem>>, vector<22x16xf32>
    %c0_275 = arith.constant 0 : index
    %c0_276 = arith.constant 0 : index
    %378 = vector.load %arg9[%c0_275, %c0_276] : memref<22x16xf32, #tpu.memory_space<vmem>>, vector<22x16xf32>
    tpu.vector_store %arg9[%c0_275, %c0_276], %377 {strides = array<i32>} : memref<22x16xf32, #tpu.memory_space<vmem>>, vector<22x16xf32>,
    %c0_277 = arith.constant 0 : index
    %c0_278 = arith.constant 0 : index
    %379 = vector.load %arg8[%c0_277, %c0_278] : memref<22x16xf32, #tpu.memory_space<vmem>>, vector<16x16xf32>
    %c4_279 = arith.constant 4 : index
    %380 = memref.load %arg2[%c4_279] : memref<98xf32, #tpu.memory_space<smem>>
    %381 = vector.broadcast %380 : f32 to vector<16x16xf32>
    %382 = arith.mulf %379, %381 : vector<16x16xf32>
    %383 = arith.addf %374, %382 : vector<16x16xf32>
    %c0_280 = arith.constant 0 : index
    %c0_281 = arith.constant 0 : index
    %384 = vector.load %arg9[%c0_280, %c0_281] : memref<22x16xf32, #tpu.memory_space<vmem>>, vector<16x16xf32>
    %c53 = arith.constant 53 : index
    %385 = memref.load %arg2[%c53] : memref<98xf32, #tpu.memory_space<smem>>
    %386 = vector.broadcast %385 : f32 to vector<16x16xf32>
    %387 = arith.mulf %384, %386 : vector<16x16xf32>
    %388 = arith.addf %383, %387 : vector<16x16xf32>
    %c1_282 = arith.constant 1 : index
    %c0_283 = arith.constant 0 : index
    %389 = vector.load %arg8[%c1_282, %c0_283] : memref<22x16xf32, #tpu.memory_space<vmem>>, vector<16x16xf32>
    %c11_284 = arith.constant 11 : index
    %390 = memref.load %arg2[%c11_284] : memref<98xf32, #tpu.memory_space<smem>>
    %391 = vector.broadcast %390 : f32 to vector<16x16xf32>
    %392 = arith.mulf %389, %391 : vector<16x16xf32>
    %393 = arith.addf %388, %392 : vector<16x16xf32>
    %c1_285 = arith.constant 1 : index
    %c0_286 = arith.constant 0 : index
    %394 = vector.load %arg9[%c1_285, %c0_286] : memref<22x16xf32, #tpu.memory_space<vmem>>, vector<16x16xf32>
    %c60 = arith.constant 60 : index
    %395 = memref.load %arg2[%c60] : memref<98xf32, #tpu.memory_space<smem>>
    %396 = vector.broadcast %395 : f32 to vector<16x16xf32>
    %397 = arith.mulf %394, %396 : vector<16x16xf32>
    %398 = arith.addf %393, %397 : vector<16x16xf32>
    %c2_287 = arith.constant 2 : index
    %c0_288 = arith.constant 0 : index
    %399 = vector.load %arg8[%c2_287, %c0_288] : memref<22x16xf32, #tpu.memory_space<vmem>>, vector<16x16xf32>
    %c18_289 = arith.constant 18 : index
    %400 = memref.load %arg2[%c18_289] : memref<98xf32, #tpu.memory_space<smem>>
    %401 = vector.broadcast %400 : f32 to vector<16x16xf32>
    %402 = arith.mulf %399, %401 : vector<16x16xf32>
    %403 = arith.addf %398, %402 : vector<16x16xf32>
    %c2_290 = arith.constant 2 : index
    %c0_291 = arith.constant 0 : index
    %404 = vector.load %arg9[%c2_290, %c0_291] : memref<22x16xf32, #tpu.memory_space<vmem>>, vector<16x16xf32>
    %c67 = arith.constant 67 : index
    %405 = memref.load %arg2[%c67] : memref<98xf32, #tpu.memory_space<smem>>
    %406 = vector.broadcast %405 : f32 to vector<16x16xf32>
    %407 = arith.mulf %404, %406 : vector<16x16xf32>
    %408 = arith.addf %403, %407 : vector<16x16xf32>
    %c3_292 = arith.constant 3 : index
    %c0_293 = arith.constant 0 : index
    %409 = vector.load %arg8[%c3_292, %c0_293] : memref<22x16xf32, #tpu.memory_space<vmem>>, vector<16x16xf32>
    %c25 = arith.constant 25 : index
    %410 = memref.load %arg2[%c25] : memref<98xf32, #tpu.memory_space<smem>>
    %411 = vector.broadcast %410 : f32 to vector<16x16xf32>
    %412 = arith.mulf %409, %411 : vector<16x16xf32>
    %413 = arith.addf %408, %412 : vector<16x16xf32>
    %c3_294 = arith.constant 3 : index
    %c0_295 = arith.constant 0 : index
    %414 = vector.load %arg9[%c3_294, %c0_295] : memref<22x16xf32, #tpu.memory_space<vmem>>, vector<16x16xf32>
    %c74 = arith.constant 74 : index
    %415 = memref.load %arg2[%c74] : memref<98xf32, #tpu.memory_space<smem>>
    %416 = vector.broadcast %415 : f32 to vector<16x16xf32>
    %417 = arith.mulf %414, %416 : vector<16x16xf32>
    %418 = arith.addf %413, %417 : vector<16x16xf32>
    %c4_296 = arith.constant 4 : index
    %c0_297 = arith.constant 0 : index
    %419 = vector.load %arg8[%c4_296, %c0_297] : memref<22x16xf32, #tpu.memory_space<vmem>>, vector<16x16xf32>
    %c32_298 = arith.constant 32 : index
    %420 = memref.load %arg2[%c32_298] : memref<98xf32, #tpu.memory_space<smem>>
    %421 = vector.broadcast %420 : f32 to vector<16x16xf32>
    %422 = arith.mulf %419, %421 : vector<16x16xf32>
    %423 = arith.addf %418, %422 : vector<16x16xf32>
    %c4_299 = arith.constant 4 : index
    %c0_300 = arith.constant 0 : index
    %424 = vector.load %arg9[%c4_299, %c0_300] : memref<22x16xf32, #tpu.memory_space<vmem>>, vector<16x16xf32>
    %c81 = arith.constant 81 : index
    %425 = memref.load %arg2[%c81] : memref<98xf32, #tpu.memory_space<smem>>
    %426 = vector.broadcast %425 : f32 to vector<16x16xf32>
    %427 = arith.mulf %424, %426 : vector<16x16xf32>
    %428 = arith.addf %423, %427 : vector<16x16xf32>
    %c5_301 = arith.constant 5 : index
    %c0_302 = arith.constant 0 : index
    %429 = vector.load %arg8[%c5_301, %c0_302] : memref<22x16xf32, #tpu.memory_space<vmem>>, vector<16x16xf32>
    %c39 = arith.constant 39 : index
    %430 = memref.load %arg2[%c39] : memref<98xf32, #tpu.memory_space<smem>>
    %431 = vector.broadcast %430 : f32 to vector<16x16xf32>
    %432 = arith.mulf %429, %431 : vector<16x16xf32>
    %433 = arith.addf %428, %432 : vector<16x16xf32>
    %c5_303 = arith.constant 5 : index
    %c0_304 = arith.constant 0 : index
    %434 = vector.load %arg9[%c5_303, %c0_304] : memref<22x16xf32, #tpu.memory_space<vmem>>, vector<16x16xf32>
    %c88 = arith.constant 88 : index
    %435 = memref.load %arg2[%c88] : memref<98xf32, #tpu.memory_space<smem>>
    %436 = vector.broadcast %435 : f32 to vector<16x16xf32>
    %437 = arith.mulf %434, %436 : vector<16x16xf32>
    %438 = arith.addf %433, %437 : vector<16x16xf32>
    %c6_305 = arith.constant 6 : index
    %c0_306 = arith.constant 0 : index
    %439 = vector.load %arg8[%c6_305, %c0_306] : memref<22x16xf32, #tpu.memory_space<vmem>>, vector<16x16xf32>
    %c46 = arith.constant 46 : index
    %440 = memref.load %arg2[%c46] : memref<98xf32, #tpu.memory_space<smem>>
    %441 = vector.broadcast %440 : f32 to vector<16x16xf32>
    %442 = arith.mulf %439, %441 : vector<16x16xf32>
    %443 = arith.addf %438, %442 : vector<16x16xf32>
    %c6_307 = arith.constant 6 : index
    %c0_308 = arith.constant 0 : index
    %444 = vector.load %arg9[%c6_307, %c0_308] : memref<22x16xf32, #tpu.memory_space<vmem>>, vector<16x16xf32>
    %c95 = arith.constant 95 : index
    %445 = memref.load %arg2[%c95] : memref<98xf32, #tpu.memory_space<smem>>
    %446 = vector.broadcast %445 : f32 to vector<16x16xf32>
    %447 = arith.mulf %444, %446 : vector<16x16xf32>
    %448 = arith.addf %443, %447 : vector<16x16xf32>
    %c0_309 = arith.constant 0 : index
    %c5_310 = arith.constant 5 : index
    %449 = vector.load %arg5[%c0_309, %c5_310] : memref<22x22xf32, #tpu.memory_space<vmem>>, vector<22x16xf32>
    %c0_311 = arith.constant 0 : index
    %c0_312 = arith.constant 0 : index
    %450 = vector.load %arg8[%c0_311, %c0_312] : memref<22x16xf32, #tpu.memory_space<vmem>>, vector<22x16xf32>
    tpu.vector_store %arg8[%c0_311, %c0_312], %449 {strides = array<i32>} : memref<22x16xf32, #tpu.memory_space<vmem>>, vector<22x16xf32>,
    %c0_313 = arith.constant 0 : index
    %c5_314 = arith.constant 5 : index
    %451 = vector.load %arg6[%c0_313, %c5_314] : memref<22x22xf32, #tpu.memory_space<vmem>>, vector<22x16xf32>
    %c0_315 = arith.constant 0 : index
    %c0_316 = arith.constant 0 : index
    %452 = vector.load %arg9[%c0_315, %c0_316] : memref<22x16xf32, #tpu.memory_space<vmem>>, vector<22x16xf32>
    tpu.vector_store %arg9[%c0_315, %c0_316], %451 {strides = array<i32>} : memref<22x16xf32, #tpu.memory_space<vmem>>, vector<22x16xf32>,
    %c0_317 = arith.constant 0 : index
    %c0_318 = arith.constant 0 : index
    %453 = vector.load %arg8[%c0_317, %c0_318] : memref<22x16xf32, #tpu.memory_space<vmem>>, vector<16x16xf32>
    %c5_319 = arith.constant 5 : index
    %454 = memref.load %arg2[%c5_319] : memref<98xf32, #tpu.memory_space<smem>>
    %455 = vector.broadcast %454 : f32 to vector<16x16xf32>
    %456 = arith.mulf %453, %455 : vector<16x16xf32>
    %457 = arith.addf %448, %456 : vector<16x16xf32>
    %c0_320 = arith.constant 0 : index
    %c0_321 = arith.constant 0 : index
    %458 = vector.load %arg9[%c0_320, %c0_321] : memref<22x16xf32, #tpu.memory_space<vmem>>, vector<16x16xf32>
    %c54 = arith.constant 54 : index
    %459 = memref.load %arg2[%c54] : memref<98xf32, #tpu.memory_space<smem>>
    %460 = vector.broadcast %459 : f32 to vector<16x16xf32>
    %461 = arith.mulf %458, %460 : vector<16x16xf32>
    %462 = arith.addf %457, %461 : vector<16x16xf32>
    %c1_322 = arith.constant 1 : index
    %c0_323 = arith.constant 0 : index
    %463 = vector.load %arg8[%c1_322, %c0_323] : memref<22x16xf32, #tpu.memory_space<vmem>>, vector<16x16xf32>
    %c12_324 = arith.constant 12 : index
    %464 = memref.load %arg2[%c12_324] : memref<98xf32, #tpu.memory_space<smem>>
    %465 = vector.broadcast %464 : f32 to vector<16x16xf32>
    %466 = arith.mulf %463, %465 : vector<16x16xf32>
    %467 = arith.addf %462, %466 : vector<16x16xf32>
    %c1_325 = arith.constant 1 : index
    %c0_326 = arith.constant 0 : index
    %468 = vector.load %arg9[%c1_325, %c0_326] : memref<22x16xf32, #tpu.memory_space<vmem>>, vector<16x16xf32>
    %c61 = arith.constant 61 : index
    %469 = memref.load %arg2[%c61] : memref<98xf32, #tpu.memory_space<smem>>
    %470 = vector.broadcast %469 : f32 to vector<16x16xf32>
    %471 = arith.mulf %468, %470 : vector<16x16xf32>
    %472 = arith.addf %467, %471 : vector<16x16xf32>
    %c2_327 = arith.constant 2 : index
    %c0_328 = arith.constant 0 : index
    %473 = vector.load %arg8[%c2_327, %c0_328] : memref<22x16xf32, #tpu.memory_space<vmem>>, vector<16x16xf32>
    %c19 = arith.constant 19 : index
    %474 = memref.load %arg2[%c19] : memref<98xf32, #tpu.memory_space<smem>>
    %475 = vector.broadcast %474 : f32 to vector<16x16xf32>
    %476 = arith.mulf %473, %475 : vector<16x16xf32>
    %477 = arith.addf %472, %476 : vector<16x16xf32>
    %c2_329 = arith.constant 2 : index
    %c0_330 = arith.constant 0 : index
    %478 = vector.load %arg9[%c2_329, %c0_330] : memref<22x16xf32, #tpu.memory_space<vmem>>, vector<16x16xf32>
    %c68 = arith.constant 68 : index
    %479 = memref.load %arg2[%c68] : memref<98xf32, #tpu.memory_space<smem>>
    %480 = vector.broadcast %479 : f32 to vector<16x16xf32>
    %481 = arith.mulf %478, %480 : vector<16x16xf32>
    %482 = arith.addf %477, %481 : vector<16x16xf32>
    %c3_331 = arith.constant 3 : index
    %c0_332 = arith.constant 0 : index
    %483 = vector.load %arg8[%c3_331, %c0_332] : memref<22x16xf32, #tpu.memory_space<vmem>>, vector<16x16xf32>
    %c26 = arith.constant 26 : index
    %484 = memref.load %arg2[%c26] : memref<98xf32, #tpu.memory_space<smem>>
    %485 = vector.broadcast %484 : f32 to vector<16x16xf32>
    %486 = arith.mulf %483, %485 : vector<16x16xf32>
    %487 = arith.addf %482, %486 : vector<16x16xf32>
    %c3_333 = arith.constant 3 : index
    %c0_334 = arith.constant 0 : index
    %488 = vector.load %arg9[%c3_333, %c0_334] : memref<22x16xf32, #tpu.memory_space<vmem>>, vector<16x16xf32>
    %c75 = arith.constant 75 : index
    %489 = memref.load %arg2[%c75] : memref<98xf32, #tpu.memory_space<smem>>
    %490 = vector.broadcast %489 : f32 to vector<16x16xf32>
    %491 = arith.mulf %488, %490 : vector<16x16xf32>
    %492 = arith.addf %487, %491 : vector<16x16xf32>
    %c4_335 = arith.constant 4 : index
    %c0_336 = arith.constant 0 : index
    %493 = vector.load %arg8[%c4_335, %c0_336] : memref<22x16xf32, #tpu.memory_space<vmem>>, vector<16x16xf32>
    %c33 = arith.constant 33 : index
    %494 = memref.load %arg2[%c33] : memref<98xf32, #tpu.memory_space<smem>>
    %495 = vector.broadcast %494 : f32 to vector<16x16xf32>
    %496 = arith.mulf %493, %495 : vector<16x16xf32>
    %497 = arith.addf %492, %496 : vector<16x16xf32>
    %c4_337 = arith.constant 4 : index
    %c0_338 = arith.constant 0 : index
    %498 = vector.load %arg9[%c4_337, %c0_338] : memref<22x16xf32, #tpu.memory_space<vmem>>, vector<16x16xf32>
    %c82 = arith.constant 82 : index
    %499 = memref.load %arg2[%c82] : memref<98xf32, #tpu.memory_space<smem>>
    %500 = vector.broadcast %499 : f32 to vector<16x16xf32>
    %501 = arith.mulf %498, %500 : vector<16x16xf32>
    %502 = arith.addf %497, %501 : vector<16x16xf32>
    %c5_339 = arith.constant 5 : index
    %c0_340 = arith.constant 0 : index
    %503 = vector.load %arg8[%c5_339, %c0_340] : memref<22x16xf32, #tpu.memory_space<vmem>>, vector<16x16xf32>
    %c40 = arith.constant 40 : index
    %504 = memref.load %arg2[%c40] : memref<98xf32, #tpu.memory_space<smem>>
    %505 = vector.broadcast %504 : f32 to vector<16x16xf32>
    %506 = arith.mulf %503, %505 : vector<16x16xf32>
    %507 = arith.addf %502, %506 : vector<16x16xf32>
    %c5_341 = arith.constant 5 : index
    %c0_342 = arith.constant 0 : index
    %508 = vector.load %arg9[%c5_341, %c0_342] : memref<22x16xf32, #tpu.memory_space<vmem>>, vector<16x16xf32>
    %c89 = arith.constant 89 : index
    %509 = memref.load %arg2[%c89] : memref<98xf32, #tpu.memory_space<smem>>
    %510 = vector.broadcast %509 : f32 to vector<16x16xf32>
    %511 = arith.mulf %508, %510 : vector<16x16xf32>
    %512 = arith.addf %507, %511 : vector<16x16xf32>
    %c6_343 = arith.constant 6 : index
    %c0_344 = arith.constant 0 : index
    %513 = vector.load %arg8[%c6_343, %c0_344] : memref<22x16xf32, #tpu.memory_space<vmem>>, vector<16x16xf32>
    %c47 = arith.constant 47 : index
    %514 = memref.load %arg2[%c47] : memref<98xf32, #tpu.memory_space<smem>>
    %515 = vector.broadcast %514 : f32 to vector<16x16xf32>
    %516 = arith.mulf %513, %515 : vector<16x16xf32>
    %517 = arith.addf %512, %516 : vector<16x16xf32>
    %c6_345 = arith.constant 6 : index
    %c0_346 = arith.constant 0 : index
    %518 = vector.load %arg9[%c6_345, %c0_346] : memref<22x16xf32, #tpu.memory_space<vmem>>, vector<16x16xf32>
    %c96_347 = arith.constant 96 : index
    %519 = memref.load %arg2[%c96_347] : memref<98xf32, #tpu.memory_space<smem>>
    %520 = vector.broadcast %519 : f32 to vector<16x16xf32>
    %521 = arith.mulf %518, %520 : vector<16x16xf32>
    %522 = arith.addf %517, %521 : vector<16x16xf32>
    %c0_348 = arith.constant 0 : index
    %c6_349 = arith.constant 6 : index
    %523 = vector.load %arg5[%c0_348, %c6_349] : memref<22x22xf32, #tpu.memory_space<vmem>>, vector<22x16xf32>
    %c0_350 = arith.constant 0 : index
    %c0_351 = arith.constant 0 : index
    %524 = vector.load %arg8[%c0_350, %c0_351] : memref<22x16xf32, #tpu.memory_space<vmem>>, vector<22x16xf32>
    tpu.vector_store %arg8[%c0_350, %c0_351], %523 {strides = array<i32>} : memref<22x16xf32, #tpu.memory_space<vmem>>, vector<22x16xf32>,
    %c0_352 = arith.constant 0 : index
    %c6_353 = arith.constant 6 : index
    %525 = vector.load %arg6[%c0_352, %c6_353] : memref<22x22xf32, #tpu.memory_space<vmem>>, vector<22x16xf32>
    %c0_354 = arith.constant 0 : index
    %c0_355 = arith.constant 0 : index
    %526 = vector.load %arg9[%c0_354, %c0_355] : memref<22x16xf32, #tpu.memory_space<vmem>>, vector<22x16xf32>
    tpu.vector_store %arg9[%c0_354, %c0_355], %525 {strides = array<i32>} : memref<22x16xf32, #tpu.memory_space<vmem>>, vector<22x16xf32>,
    %c0_356 = arith.constant 0 : index
    %c0_357 = arith.constant 0 : index
    %527 = vector.load %arg8[%c0_356, %c0_357] : memref<22x16xf32, #tpu.memory_space<vmem>>, vector<16x16xf32>
    %c6_358 = arith.constant 6 : index
    %528 = memref.load %arg2[%c6_358] : memref<98xf32, #tpu.memory_space<smem>>
    %529 = vector.broadcast %528 : f32 to vector<16x16xf32>
    %530 = arith.mulf %527, %529 : vector<16x16xf32>
    %531 = arith.addf %522, %530 : vector<16x16xf32>
    %c0_359 = arith.constant 0 : index
    %c0_360 = arith.constant 0 : index
    %532 = vector.load %arg9[%c0_359, %c0_360] : memref<22x16xf32, #tpu.memory_space<vmem>>, vector<16x16xf32>
    %c55 = arith.constant 55 : index
    %533 = memref.load %arg2[%c55] : memref<98xf32, #tpu.memory_space<smem>>
    %534 = vector.broadcast %533 : f32 to vector<16x16xf32>
    %535 = arith.mulf %532, %534 : vector<16x16xf32>
    %536 = arith.addf %531, %535 : vector<16x16xf32>
    %c1_361 = arith.constant 1 : index
    %c0_362 = arith.constant 0 : index
    %537 = vector.load %arg8[%c1_361, %c0_362] : memref<22x16xf32, #tpu.memory_space<vmem>>, vector<16x16xf32>
    %c13_363 = arith.constant 13 : index
    %538 = memref.load %arg2[%c13_363] : memref<98xf32, #tpu.memory_space<smem>>
    %539 = vector.broadcast %538 : f32 to vector<16x16xf32>
    %540 = arith.mulf %537, %539 : vector<16x16xf32>
    %541 = arith.addf %536, %540 : vector<16x16xf32>
    %c1_364 = arith.constant 1 : index
    %c0_365 = arith.constant 0 : index
    %542 = vector.load %arg9[%c1_364, %c0_365] : memref<22x16xf32, #tpu.memory_space<vmem>>, vector<16x16xf32>
    %c62 = arith.constant 62 : index
    %543 = memref.load %arg2[%c62] : memref<98xf32, #tpu.memory_space<smem>>
    %544 = vector.broadcast %543 : f32 to vector<16x16xf32>
    %545 = arith.mulf %542, %544 : vector<16x16xf32>
    %546 = arith.addf %541, %545 : vector<16x16xf32>
    %c2_366 = arith.constant 2 : index
    %c0_367 = arith.constant 0 : index
    %547 = vector.load %arg8[%c2_366, %c0_367] : memref<22x16xf32, #tpu.memory_space<vmem>>, vector<16x16xf32>
    %c20 = arith.constant 20 : index
    %548 = memref.load %arg2[%c20] : memref<98xf32, #tpu.memory_space<smem>>
    %549 = vector.broadcast %548 : f32 to vector<16x16xf32>
    %550 = arith.mulf %547, %549 : vector<16x16xf32>
    %551 = arith.addf %546, %550 : vector<16x16xf32>
    %c2_368 = arith.constant 2 : index
    %c0_369 = arith.constant 0 : index
    %552 = vector.load %arg9[%c2_368, %c0_369] : memref<22x16xf32, #tpu.memory_space<vmem>>, vector<16x16xf32>
    %c69 = arith.constant 69 : index
    %553 = memref.load %arg2[%c69] : memref<98xf32, #tpu.memory_space<smem>>
    %554 = vector.broadcast %553 : f32 to vector<16x16xf32>
    %555 = arith.mulf %552, %554 : vector<16x16xf32>
    %556 = arith.addf %551, %555 : vector<16x16xf32>
    %c3_370 = arith.constant 3 : index
    %c0_371 = arith.constant 0 : index
    %557 = vector.load %arg8[%c3_370, %c0_371] : memref<22x16xf32, #tpu.memory_space<vmem>>, vector<16x16xf32>
    %c27 = arith.constant 27 : index
    %558 = memref.load %arg2[%c27] : memref<98xf32, #tpu.memory_space<smem>>
    %559 = vector.broadcast %558 : f32 to vector<16x16xf32>
    %560 = arith.mulf %557, %559 : vector<16x16xf32>
    %561 = arith.addf %556, %560 : vector<16x16xf32>
    %c3_372 = arith.constant 3 : index
    %c0_373 = arith.constant 0 : index
    %562 = vector.load %arg9[%c3_372, %c0_373] : memref<22x16xf32, #tpu.memory_space<vmem>>, vector<16x16xf32>
    %c76 = arith.constant 76 : index
    %563 = memref.load %arg2[%c76] : memref<98xf32, #tpu.memory_space<smem>>
    %564 = vector.broadcast %563 : f32 to vector<16x16xf32>
    %565 = arith.mulf %562, %564 : vector<16x16xf32>
    %566 = arith.addf %561, %565 : vector<16x16xf32>
    %c4_374 = arith.constant 4 : index
    %c0_375 = arith.constant 0 : index
    %567 = vector.load %arg8[%c4_374, %c0_375] : memref<22x16xf32, #tpu.memory_space<vmem>>, vector<16x16xf32>
    %c34 = arith.constant 34 : index
    %568 = memref.load %arg2[%c34] : memref<98xf32, #tpu.memory_space<smem>>
    %569 = vector.broadcast %568 : f32 to vector<16x16xf32>
    %570 = arith.mulf %567, %569 : vector<16x16xf32>
    %571 = arith.addf %566, %570 : vector<16x16xf32>
    %c4_376 = arith.constant 4 : index
    %c0_377 = arith.constant 0 : index
    %572 = vector.load %arg9[%c4_376, %c0_377] : memref<22x16xf32, #tpu.memory_space<vmem>>, vector<16x16xf32>
    %c83 = arith.constant 83 : index
    %573 = memref.load %arg2[%c83] : memref<98xf32, #tpu.memory_space<smem>>
    %574 = vector.broadcast %573 : f32 to vector<16x16xf32>
    %575 = arith.mulf %572, %574 : vector<16x16xf32>
    %576 = arith.addf %571, %575 : vector<16x16xf32>
    %c5_378 = arith.constant 5 : index
    %c0_379 = arith.constant 0 : index
    %577 = vector.load %arg8[%c5_378, %c0_379] : memref<22x16xf32, #tpu.memory_space<vmem>>, vector<16x16xf32>
    %c41 = arith.constant 41 : index
    %578 = memref.load %arg2[%c41] : memref<98xf32, #tpu.memory_space<smem>>
    %579 = vector.broadcast %578 : f32 to vector<16x16xf32>
    %580 = arith.mulf %577, %579 : vector<16x16xf32>
    %581 = arith.addf %576, %580 : vector<16x16xf32>
    %c5_380 = arith.constant 5 : index
    %c0_381 = arith.constant 0 : index
    %582 = vector.load %arg9[%c5_380, %c0_381] : memref<22x16xf32, #tpu.memory_space<vmem>>, vector<16x16xf32>
    %c90 = arith.constant 90 : index
    %583 = memref.load %arg2[%c90] : memref<98xf32, #tpu.memory_space<smem>>
    %584 = vector.broadcast %583 : f32 to vector<16x16xf32>
    %585 = arith.mulf %582, %584 : vector<16x16xf32>
    %586 = arith.addf %581, %585 : vector<16x16xf32>
    %c6_382 = arith.constant 6 : index
    %c0_383 = arith.constant 0 : index
    %587 = vector.load %arg8[%c6_382, %c0_383] : memref<22x16xf32, #tpu.memory_space<vmem>>, vector<16x16xf32>
    %c48_384 = arith.constant 48 : index
    %588 = memref.load %arg2[%c48_384] : memref<98xf32, #tpu.memory_space<smem>>
    %589 = vector.broadcast %588 : f32 to vector<16x16xf32>
    %590 = arith.mulf %587, %589 : vector<16x16xf32>
    %591 = arith.addf %586, %590 : vector<16x16xf32>
    %c6_385 = arith.constant 6 : index
    %c0_386 = arith.constant 0 : index
    %592 = vector.load %arg9[%c6_385, %c0_386] : memref<22x16xf32, #tpu.memory_space<vmem>>, vector<16x16xf32>
    %c97 = arith.constant 97 : index
    %593 = memref.load %arg2[%c97] : memref<98xf32, #tpu.memory_space<smem>>
    %594 = vector.broadcast %593 : f32 to vector<16x16xf32>
    %595 = arith.mulf %592, %594 : vector<16x16xf32>
    %596 = arith.addf %591, %595 : vector<16x16xf32>
    %c0_387 = arith.constant 0 : index
    %597 = memref.load %arg3[%c0_387] : memref<1xf32, #tpu.memory_space<smem>>
    %598 = vector.broadcast %597 : f32 to vector<16x16xf32>
    %599 = arith.addf %596, %598 : vector<16x16xf32>
    %600 = arith.negf %599 : vector<16x16xf32>
    %601 = math.exp %600 : vector<16x16xf32>
    %cst_388 = arith.constant 1.000000e+00 : f32
    %602 = vector.broadcast %cst_388 : f32 to vector<16x16xf32>
    %603 = arith.addf %602, %601 : vector<16x16xf32>
    %604 = arith.divf %602, %603 : vector<16x16xf32>
    %c0_389 = arith.constant 0 : index
    %c0_390 = arith.constant 0 : index
    %605 = vector.load %arg10[%c0_389, %c0_390] : memref<16x16xf32, #tpu.memory_space<vmem>>, vector<16x16xf32>
    tpu.vector_store %arg10[%c0_389, %c0_390], %604 {strides = array<i32>} : memref<16x16xf32, #tpu.memory_space<vmem>>, vector<16x16xf32>,
    %c0_391 = arith.constant 0 : index
    %c0_392 = arith.constant 0 : index
    %606 = vector.load %arg10[%c0_391, %c0_392] : memref<16x16xf32, #tpu.memory_space<vmem>>, vector<1x16xf32>
    %c0_393 = arith.constant 0 : index
    %c0_394 = arith.constant 0 : index
    %607 = vector.load %arg11[%c0_393, %c0_394] : memref<1x256xf32, #tpu.memory_space<vmem>>, vector<1x16xf32>
    tpu.vector_store %arg11[%c0_393, %c0_394], %606 {strides = array<i32>} : memref<1x256xf32, #tpu.memory_space<vmem>>, vector<1x16xf32>,
    %c1_395 = arith.constant 1 : index
    %c0_396 = arith.constant 0 : index
    %608 = vector.load %arg10[%c1_395, %c0_396] : memref<16x16xf32, #tpu.memory_space<vmem>>, vector<1x16xf32>
    %c0_397 = arith.constant 0 : index
    %c16_398 = arith.constant 16 : index
    %609 = vector.load %arg11[%c0_397, %c16_398] : memref<1x256xf32, #tpu.memory_space<vmem>>, vector<1x16xf32>
    tpu.vector_store %arg11[%c0_397, %c16_398], %608 {strides = array<i32>} : memref<1x256xf32, #tpu.memory_space<vmem>>, vector<1x16xf32>,
    %c2_399 = arith.constant 2 : index
    %c0_400 = arith.constant 0 : index
    %610 = vector.load %arg10[%c2_399, %c0_400] : memref<16x16xf32, #tpu.memory_space<vmem>>, vector<1x16xf32>
    %c0_401 = arith.constant 0 : index
    %c32_402 = arith.constant 32 : index
    %611 = vector.load %arg11[%c0_401, %c32_402] : memref<1x256xf32, #tpu.memory_space<vmem>>, vector<1x16xf32>
    tpu.vector_store %arg11[%c0_401, %c32_402], %610 {strides = array<i32>} : memref<1x256xf32, #tpu.memory_space<vmem>>, vector<1x16xf32>,
    %c3_403 = arith.constant 3 : index
    %c0_404 = arith.constant 0 : index
    %612 = vector.load %arg10[%c3_403, %c0_404] : memref<16x16xf32, #tpu.memory_space<vmem>>, vector<1x16xf32>
    %c0_405 = arith.constant 0 : index
    %c48_406 = arith.constant 48 : index
    %613 = vector.load %arg11[%c0_405, %c48_406] : memref<1x256xf32, #tpu.memory_space<vmem>>, vector<1x16xf32>
    tpu.vector_store %arg11[%c0_405, %c48_406], %612 {strides = array<i32>} : memref<1x256xf32, #tpu.memory_space<vmem>>, vector<1x16xf32>,
    %c4_407 = arith.constant 4 : index
    %c0_408 = arith.constant 0 : index
    %614 = vector.load %arg10[%c4_407, %c0_408] : memref<16x16xf32, #tpu.memory_space<vmem>>, vector<1x16xf32>
    %c0_409 = arith.constant 0 : index
    %c64_410 = arith.constant 64 : index
    %615 = vector.load %arg11[%c0_409, %c64_410] : memref<1x256xf32, #tpu.memory_space<vmem>>, vector<1x16xf32>
    tpu.vector_store %arg11[%c0_409, %c64_410], %614 {strides = array<i32>} : memref<1x256xf32, #tpu.memory_space<vmem>>, vector<1x16xf32>,
    %c5_411 = arith.constant 5 : index
    %c0_412 = arith.constant 0 : index
    %616 = vector.load %arg10[%c5_411, %c0_412] : memref<16x16xf32, #tpu.memory_space<vmem>>, vector<1x16xf32>
    %c0_413 = arith.constant 0 : index
    %c80_414 = arith.constant 80 : index
    %617 = vector.load %arg11[%c0_413, %c80_414] : memref<1x256xf32, #tpu.memory_space<vmem>>, vector<1x16xf32>
    tpu.vector_store %arg11[%c0_413, %c80_414], %616 {strides = array<i32>} : memref<1x256xf32, #tpu.memory_space<vmem>>, vector<1x16xf32>,
    %c6_415 = arith.constant 6 : index
    %c0_416 = arith.constant 0 : index
    %618 = vector.load %arg10[%c6_415, %c0_416] : memref<16x16xf32, #tpu.memory_space<vmem>>, vector<1x16xf32>
    %c0_417 = arith.constant 0 : index
    %c96_418 = arith.constant 96 : index
    %619 = vector.load %arg11[%c0_417, %c96_418] : memref<1x256xf32, #tpu.memory_space<vmem>>, vector<1x16xf32>
    tpu.vector_store %arg11[%c0_417, %c96_418], %618 {strides = array<i32>} : memref<1x256xf32, #tpu.memory_space<vmem>>, vector<1x16xf32>,
    %c7_419 = arith.constant 7 : index
    %c0_420 = arith.constant 0 : index
    %620 = vector.load %arg10[%c7_419, %c0_420] : memref<16x16xf32, #tpu.memory_space<vmem>>, vector<1x16xf32>
    %c0_421 = arith.constant 0 : index
    %c112_422 = arith.constant 112 : index
    %621 = vector.load %arg11[%c0_421, %c112_422] : memref<1x256xf32, #tpu.memory_space<vmem>>, vector<1x16xf32>
    tpu.vector_store %arg11[%c0_421, %c112_422], %620 {strides = array<i32>} : memref<1x256xf32, #tpu.memory_space<vmem>>, vector<1x16xf32>,
    %c8_423 = arith.constant 8 : index
    %c0_424 = arith.constant 0 : index
    %622 = vector.load %arg10[%c8_423, %c0_424] : memref<16x16xf32, #tpu.memory_space<vmem>>, vector<1x16xf32>
    %c0_425 = arith.constant 0 : index
    %c128_426 = arith.constant 128 : index
    %623 = vector.load %arg11[%c0_425, %c128_426] : memref<1x256xf32, #tpu.memory_space<vmem>>, vector<1x16xf32>
    tpu.vector_store %arg11[%c0_425, %c128_426], %622 {strides = array<i32>} : memref<1x256xf32, #tpu.memory_space<vmem>>, vector<1x16xf32>,
    %c9_427 = arith.constant 9 : index
    %c0_428 = arith.constant 0 : index
    %624 = vector.load %arg10[%c9_427, %c0_428] : memref<16x16xf32, #tpu.memory_space<vmem>>, vector<1x16xf32>
    %c0_429 = arith.constant 0 : index
    %c144_430 = arith.constant 144 : index
    %625 = vector.load %arg11[%c0_429, %c144_430] : memref<1x256xf32, #tpu.memory_space<vmem>>, vector<1x16xf32>
    tpu.vector_store %arg11[%c0_429, %c144_430], %624 {strides = array<i32>} : memref<1x256xf32, #tpu.memory_space<vmem>>, vector<1x16xf32>,
    %c10_431 = arith.constant 10 : index
    %c0_432 = arith.constant 0 : index
    %626 = vector.load %arg10[%c10_431, %c0_432] : memref<16x16xf32, #tpu.memory_space<vmem>>, vector<1x16xf32>
    %c0_433 = arith.constant 0 : index
    %c160_434 = arith.constant 160 : index
    %627 = vector.load %arg11[%c0_433, %c160_434] : memref<1x256xf32, #tpu.memory_space<vmem>>, vector<1x16xf32>
    tpu.vector_store %arg11[%c0_433, %c160_434], %626 {strides = array<i32>} : memref<1x256xf32, #tpu.memory_space<vmem>>, vector<1x16xf32>,
    %c11_435 = arith.constant 11 : index
    %c0_436 = arith.constant 0 : index
    %628 = vector.load %arg10[%c11_435, %c0_436] : memref<16x16xf32, #tpu.memory_space<vmem>>, vector<1x16xf32>
    %c0_437 = arith.constant 0 : index
    %c176_438 = arith.constant 176 : index
    %629 = vector.load %arg11[%c0_437, %c176_438] : memref<1x256xf32, #tpu.memory_space<vmem>>, vector<1x16xf32>
    tpu.vector_store %arg11[%c0_437, %c176_438], %628 {strides = array<i32>} : memref<1x256xf32, #tpu.memory_space<vmem>>, vector<1x16xf32>,
    %c12_439 = arith.constant 12 : index
    %c0_440 = arith.constant 0 : index
    %630 = vector.load %arg10[%c12_439, %c0_440] : memref<16x16xf32, #tpu.memory_space<vmem>>, vector<1x16xf32>
    %c0_441 = arith.constant 0 : index
    %c192_442 = arith.constant 192 : index
    %631 = vector.load %arg11[%c0_441, %c192_442] : memref<1x256xf32, #tpu.memory_space<vmem>>, vector<1x16xf32>
    tpu.vector_store %arg11[%c0_441, %c192_442], %630 {strides = array<i32>} : memref<1x256xf32, #tpu.memory_space<vmem>>, vector<1x16xf32>,
    %c13_443 = arith.constant 13 : index
    %c0_444 = arith.constant 0 : index
    %632 = vector.load %arg10[%c13_443, %c0_444] : memref<16x16xf32, #tpu.memory_space<vmem>>, vector<1x16xf32>
    %c0_445 = arith.constant 0 : index
    %c208_446 = arith.constant 208 : index
    %633 = vector.load %arg11[%c0_445, %c208_446] : memref<1x256xf32, #tpu.memory_space<vmem>>, vector<1x16xf32>
    tpu.vector_store %arg11[%c0_445, %c208_446], %632 {strides = array<i32>} : memref<1x256xf32, #tpu.memory_space<vmem>>, vector<1x16xf32>,
    %c14_447 = arith.constant 14 : index
    %c0_448 = arith.constant 0 : index
    %634 = vector.load %arg10[%c14_447, %c0_448] : memref<16x16xf32, #tpu.memory_space<vmem>>, vector<1x16xf32>
    %c0_449 = arith.constant 0 : index
    %c224_450 = arith.constant 224 : index
    %635 = vector.load %arg11[%c0_449, %c224_450] : memref<1x256xf32, #tpu.memory_space<vmem>>, vector<1x16xf32>
    tpu.vector_store %arg11[%c0_449, %c224_450], %634 {strides = array<i32>} : memref<1x256xf32, #tpu.memory_space<vmem>>, vector<1x16xf32>,
    %c15_451 = arith.constant 15 : index
    %c0_452 = arith.constant 0 : index
    %636 = vector.load %arg10[%c15_451, %c0_452] : memref<16x16xf32, #tpu.memory_space<vmem>>, vector<1x16xf32>
    %c0_453 = arith.constant 0 : index
    %c240_454 = arith.constant 240 : index
    %637 = vector.load %arg11[%c0_453, %c240_454] : memref<1x256xf32, #tpu.memory_space<vmem>>, vector<1x16xf32>
    tpu.vector_store %arg11[%c0_453, %c240_454], %636 {strides = array<i32>} : memref<1x256xf32, #tpu.memory_space<vmem>>, vector<1x16xf32>,
    %c0_455 = arith.constant 0 : index
    %c0_456 = arith.constant 0 : index
    %638 = vector.load %arg11[%c0_455, %c0_456] : memref<1x256xf32, #tpu.memory_space<vmem>>, vector<1x256xf32>
    %639 = vector.broadcast %638 : vector<1x256xf32> to vector<4x256xf32>
    %640 = arith.mulf %5, %639 : vector<4x256xf32>
    %c0_457 = arith.constant 0 : index
    %c0_458 = arith.constant 0 : index
    %c0_459 = arith.constant 0 : index
    %641 = vector.load %arg4[%c0_457, %c0_458, %c0_459] : memref<1x4x256xf32, #tpu.memory_space<vmem>>, vector<1x4x256xf32>
    %642 = vector.shape_cast %641 : vector<1x4x256xf32> to vector<4x256xf32>
    %643 = vector.shape_cast %640 : vector<4x256xf32> to vector<1x4x256xf32>
    tpu.vector_store %arg4[%c0_457, %c0_458, %c0_459], %643 {strides = array<i32>} : memref<1x4x256xf32, #tpu.memory_space<vmem>>, vector<1x4x256xf32>,
    return
  }
  func.func @transform_0(%arg0: i32) -> (i32, i32, i32) {
    %c0_i32 = arith.constant 0 : i32
    %c0_i32_0 = arith.constant 0 : i32
    %c0_i32_1 = arith.constant 0 : i32
    return %arg0, %c0_i32, %c0_i32_0 : i32, i32, i32
  }
  func.func @transform_1(%arg0: i32) -> i32 {
    %c0_i32 = arith.constant 0 : i32
    %c0_i32_0 = arith.constant 0 : i32
    return %c0_i32 : i32
  }
  func.func @transform_2(%arg0: i32) -> i32 {
    %c0_i32 = arith.constant 0 : i32
    %c0_i32_0 = arith.constant 0 : i32
    return %c0_i32 : i32
  }
  func.func @transform_3(%arg0: i32) -> (i32, i32, i32) {
    %c0_i32 = arith.constant 0 : i32
    %c0_i32_0 = arith.constant 0 : i32
    %c0_i32_1 = arith.constant 0 : i32
    return %arg0, %c0_i32, %c0_i32_0 : i32, i32, i32
  }
}

</mosaic_0001>

<bundles_post_ra>
// kernel: tpu_custom_call.1
= control target key start
LH: loop header
LB: loop body
LE: loop exit
PB: predicated region body
PF: predicated region fallthrough
CT: control target
= control target key end

     0   :  { %s3601_s0 = inlined_call_operand.hbm [shape: f32[2,4,256], index: 0, kind: input, shape index: {}]   ;;  %s3602_s1 = inlined_call_operand.vmem [shape: f32[98], index: 1, kind: input, shape index: {}]   ;;  %s3603_s2 = inlined_call_operand.<no memory space> [shape: f32[1], index: 2, kind: input, shape index: {}]   ;;  %s3604_s3 = inlined_call_operand.hbm [shape: f32[2,4,256], index: 3, kind: output, shape index: {}]  }
   0x1   :  { %8 = sst [smem:[#allocation9]] %s3603_s2 }
   0x2   :  { %9 = vsyncpa [#allocation11], 0 }
   0x3   :  { %11 = vsyncpa [#allocation11 + $0x1], 0 }
   0x4   :  { %12 = vsyncpa [#allocation13], 0 }
   0x5   :  { %13 = vsyncpa [#allocation12], 0 }
   0x6   :  { %15 = vsyncpa [#allocation12 + $0x1], 0  ;;  %s2174_s14 = smov 0   ;;  %s2176_s15 = smov 0  }
   0x7   :  { %s2178_s16 = smov 0   ;;  %s2180_s17 = smov 0  }
   0x8 LB: > { %s2195_s2 = sadd.s32 4294967295, %s2126_s17   ;;  %s1775_s18 = sadd.s32 4294967294, %s2126_s17   ;;  %s2126_s17 = sphi %s2180_s17, %s3696_s17   ;;  %s2122_s16 = sphi %s2178_s16, %s3695_s16   ;;  %s2118_s15 = sphi %s2176_s15, %s3694_s15   ;;  %s2114_s14 = sphi %s2174_s14, %s3693_s14  }
   0x9   : > { %p41_p0 = scmp.ne.s32.totalorder %s2118_s15, %s2114_s14  ;;  %p42_p1 = scmp.eq.s32.totalorder %s2195_s2, 0 }
   0xa   : > { %p107_p2 = scmp.eq.s32.totalorder %s2195_s2, 1  ;;  %p113_p3 = scmp.eq.s32.totalorder %s1775_s18, 1 }
   0xb   : > { %p2204_p4 = por %p42_p1, %p41_p0  ;;  %p1776_p5 = scmp.ge.s32.totalorder %s2126_s17, 1 }
   0xc   : > { %p2209_p6 = por %p113_p3, %p41_p0  ;;  %p120_p7 = scmp.lt.s32.totalorder %s2126_s17, 3 }
   0xd   : > { %s132_s23 = sshll.u32 %s3602_s1, 4  ;;  %s2225_s25 = sadd.s32 1, %s2126_s17   ;;  %s133_s23 = int_to_ptr.vmem [resolvable:$true] %s132_s23 }
   0xe   : > { %p2217_p8 = pnand %p1776_p5, %p120_p7  ;;  %s25_s26 = ssub.s32 %s2126_s17, %s2225_s25 }
   0xf   : > { %p26_p12 = scmp.eq.s32.totalorder %s25_s26, 0  ;;  %s28_s27 = sadd.s32 1, %s2122_s16 }
  0x10   : > { %p1900_p10 = pneg %p2217_p8  ;;  %p35_p13 = scmp.ne.s32.totalorder %s2122_s16, %s2118_s15 }
  0x11   : > { %s2128_s28 = smov [#allocation14]   ;;  %p36_p0 = scmp.eq.s32.totalorder %s2126_s17, 0 }
  0x12   : > { %p1901_p11 = pnand %p1900_p10, %p42_p1  ;;  %p2240_p3 = por %p107_p2, %p35_p13 }
  0x13   : > { %s2235_s29 = scalar_select %p26_p12, %s2122_s16, %s28_s27  }
  0x14   : > { %1903 = dma.vmem_to_smem (!%p1901_p11), %s133_s23, 16, %s2128_s28, [#allocation13]  }
  0x15   : > { %s146_s4 = sand.u32 1, %s2122_s16   ;;  %p37_p5 = por %p36_p0, %p35_p13 }
  0x16   : > { %p1913_p7 = scmp.lt.s32.totalorder %s2126_s17, 2  ;;  %s1779_s5 = sshll.u32 %s146_s4, 3 }
  0x17   : > { %s1890_s6 = sshll.u32 %s2126_s17, 3  ;;  %s150_s11 = scalar_lea.vmem [#allocation10], %s1779_s5 }
  0x18   : > { %s155_s9 = scalar_lea.hbm %s3601_s0, %s1890_s6  ;;  %s159_s12 = sshll.u32 %s150_s11, 4  ;;  %s160_s12 = int_to_ptr.vmem [resolvable:$true] %s159_s12 }
  0x19   : > { %s157_s10 = sshll.u32 %s155_s9, 4  ;;  %p2250_p10 = pnand %p1913_p7, %p37_p5  ;;  %s158_s10 = int_to_ptr.hbm [resolvable:$true] %s157_s10 }
  0x1a   : > { %s147_s18 = scalar_lea.sflag [#allocation11], %s146_s4  ;;  %s2026_s21 = sshra.s32 %s158_s10, 4  ;;  %s2027_s21 = int_to_ptr.hbm [resolvable:$true] %s2026_s21 }
  0x1b   : > { %s2028_s22 = scalar_lea.hbm %s2027_s21, 8  ;;  %p2030_p11 = pneg %p2250_p10 }
  0x1c   : > { %p2029_p2 = scmp.ne.s32.totalorder %s2027_s21, %s2028_s22  ;;  %s2033_s27 = scalar_lea.hbm %s3601_s0, 16 }
  0x1d   : > { %p2034_p0 = scmp.lt.s32.totalorder %s2027_s21, %s3601_s0  ;;  %p2035_p5 = scmp.lt.s32.totalorder %s2033_s27, %s2028_s22 }
  0x1e   : > { %p2031_p12 = pnand %p2030_p11, %p2029_p2 }
  0x1f   : > { %p2036_p7 = por %p2035_p5, %p2034_p0 }
  0x20   : > { %p2032_p13 = pneg %p2031_p12 }
  0x22   : > { %p2037_p9 = pnand %p2036_p7, %p2032_p13 }
  0x24   : > { %2040 = shalt.err (!%p2037_p9)
}
  0x25   : > { %1907 = dma.hbm_to_vmem [thread:$0]  (!%p2250_p10), %s158_s10, 128, %s160_s12, %s147_s18  }
  0x26   : > { %168 = sbr.rel (%p2217_p8) target bundleno = 790 (0x316), region = 32 }
  0x2b   : > { %s2267_s4 = sand.u32 1, %s2118_s15  }
  0x2c   : > { %s1783_s6 = sshll.u32 %s2267_s4, 3  ;;  %s171_s7 = scalar_lea.sflag [#allocation11], %s2267_s4 }
  0x2d   : > { %s174_s8 = scalar_lea.vmem [#allocation10], %s1783_s6 }
  0x2e   : > { %2101 = dma.done.wait (%p2204_p4), %s171_s7, 128  }
  0x2f   : > { %2103 = vsyncadd (%p2204_p4), %s171_s7, 4294967168 }
  0x30   : > { %2105 = dma.done.wait (%p42_p1), [#allocation13], 16  }
  0x31   : > { %2107 = vsyncadd (%p42_p1), [#allocation13], 4294967280 }
  0x32   : > { %185 = sfence }
  0x33   : > { %v2281_v0 = vld [vmem:[%s174_s8] sm:$0xff]  ;;  %vm219_vm0 = vcmask 1043456   ;;  %v3605_v21 = vlaneseq  ;;  %vm239_vm1 = vcmask 1040384   ;;  %s2129_s19 = smov 99   ;;  %s2130_s24 = smov 3   ;;  %vm204_vm3 = vcmask 179200  }
  0x34   : > { %3625 = vst [vmem:[#allocation19_spill] sm:$0xff] %v2281_v0  ;;  %s2131_s9 = smov 67   ;;  %s2132_s10 = smov 83   ;;  %vm279_vm4 = vcmask 147480   ;;  %vm501_vm5 = vcmask 130048   ;;  %vm207_vm6 = vcmask 177152  }
  0x35   : > { %214 = vst [vmem:[#allocation1] ss:$2 sm:$0xff] %v2281_v0  ;;  %vm244_vm2 = vcmp.lt.s32.totalorder %v3605_v21, 256  ;;  %s2133_s11 = smov 115   ;;  %s2134_s12 = smov 51   ;;  %vm504_vm7 = vcmask 128000  }
  0x36   : > { %s2135_s13 = smov 19   ;;  %s2136_s18 = smov 35  }
  0x37   : > { %s2138_s21 = smov 127   ;;  %s2139_s22 = smov 126  }
  0x38   : > { %s2140_s23 = smov 125   ;;  %s2402_s26 = sld [smem:[#allocation14 + $0x31]] }
  0x39   : > { %s2404_s27 = sld [smem:[#allocation14]]  ;;  %s2141_s28 = smov 124  }
  0x3a   : > { %s2409_s5 = sld [smem:[#allocation14 + $0x7]] }
  0x3b   : > { %s2411_s7 = sld [smem:[#allocation14 + $0x38]] }
  0x3c   : > { %v215_v1 = vld.sshfl [vmem:[#allocation1] sm:$0xff pattern:$0x75316420]  ;;  %v216_v2 = vld.sshfl [vmem:[#allocation1 + $0x8] sm:$0xff pattern:$0x75316420] }
  0x3d   : > { %v220_v3 = vsel %vm219_vm0, %v215_v1, 0.0  ;;  %v227_v4 = vsel %vm219_vm0, %v216_v2, 0.0  ;;  %247 = vst [vmem:[#allocation1] ss:$2 sm:$0xff] %v2281_v0  ;;  %s2421_s8 = sld [smem:[#allocation14 + $0xe]] }
  0x3e   : > { %v221_v5 = vrot.slane %v220_v3, 4  ;;  %v228_v6 = vrot.slane %v227_v4, 4 }
  0x40   : > { %v222_v7 = vadd.f32 %v221_v5, %v220_v3  ;;  %v229_v8 = vadd.f32 %v228_v6, %v227_v4  ;;  %v2137_v3 = vmov 0.0  }
  0x41   : > { %205 = vst.msk [vmem:[#allocation2] sm:$0xff] %vm204_vm3, %v2137_v3 }
  0x42   : > { %v223_v9 = vrot.slane %v222_v7, 2  ;;  %v230_v10 = vrot.slane %v229_v8, 2  ;;  %206 = vst.msk [vmem:[#allocation2 + $0x8] sm:$0xff] %vm204_vm3, %v2137_v3 }
  0x43   : > { %209 = vst.msk [vmem:[#allocation3] sm:$0xff] %vm204_vm3, %v2137_v3 }
  0x44   : > { %v224_v11 = vadd.f32 %v223_v9, %v222_v7  ;;  %v231_v12 = vadd.f32 %v230_v10, %v229_v8  ;;  %v248_v13 = vld.sshfl [vmem:[#allocation1] sm:$0xff pattern:$0x75316420]  ;;  %v249_v14 = vld.sshfl [vmem:[#allocation1 + $0x8] sm:$0xff pattern:$0x75316420] }
  0x45   : > { %v252_v15 = vsel %vm219_vm0, %v248_v13, -inf  ;;  %v259_v16 = vsel %vm219_vm0, %v249_v14, -inf  ;;  %210 = vst.msk [vmem:[#allocation3 + $0x8] sm:$0xff] %vm204_vm3, %v2137_v3 }
  0x46   : > { %v225_v17 = vrot.slane %v224_v11, 1  ;;  %v232_v18 = vrot.slane %v231_v12, 1  ;;  %v253_v19 = vrot.slane %v252_v15, 4  ;;  %v260_v20 = vrot.slane %v259_v16, 4  ;;  %208 = vst.msk [vmem:[#allocation2 + $0x10] sm:$0x3f] %vm207_vm6, %v2137_v3 }
  0x47   : > { %211 = vst.msk [vmem:[#allocation3 + $0x10] sm:$0x3f] %vm207_vm6, %v2137_v3 }
  0x48   : > { %v226_v22 = vadd.f32 %v225_v17, %v224_v11  ;;  %v233_v23 = vadd.f32 %v232_v18, %v231_v12  ;;  %v254_v24 = vmax.f32 %v252_v15, %v253_v19  ;;  %v261_v25 = vmax.f32 %v259_v16, %v260_v20 }
  0x4a   : > { %v234_v26 = vmul.f32 0.25, %v226_v22  ;;  %v235_v27 = vmul.f32 0.25, %v233_v23  ;;  %v255_v28 = vrot.slane %v254_v24, 2  ;;  %v262_v29 = vrot.slane %v261_v25, 2 }
  0x4c   : > { %v238_v30 = vrot.slane %v235_v27, 7  ;;  %v256_v31 = vmax.f32 %v254_v24, %v255_v28  ;;  %v263_v32 = vmax.f32 %v261_v25, %v262_v29 }
  0x4e   : > { %v240_v33 = vsel %vm239_vm1, %v234_v26, %v238_v30  ;;  %v257_v34 = vrot.slane %v256_v31, 1  ;;  %v264_v35 = vrot.slane %v263_v32, 1 }
  0x4f   : > { %246 = vst.msk [vmem:[#allocation4] ss:$2 sm:$0x3] %vm244_vm2, %v240_v33 }
  0x50   : > { %v258_v36 = vmax.f32 %v256_v31, %v257_v34  ;;  %v265_v37 = vmax.f32 %v263_v32, %v264_v35 }
  0x52   : > { %v268_v38 = vrot.slane %v265_v37, 7 }
  0x54   : > { %v269_v39 = vsel %vm239_vm1, %v258_v36, %v268_v38 }
  0x55   : > { %272 = vst.msk [vmem:[#allocation4 + $0x1] ss:$2 sm:$0x3] %vm244_vm2, %v269_v39 }
  0x56   : > { %v1971_v40 = vld [vmem:[#allocation4] ss:$0 sm:$0xff]  ;;  %v1983_v48 = vld [vmem:[#allocation4 + $0x2] ss:$0 sm:$0xff] }
  0x57   : > { %v1972_v41 = vld [vmem:[#allocation4] ss:$0 sm:$0xff]  ;;  %305 = vrot.lane.b32.xlu1 %v1971_v40, %s2129_s19  ;;  %v1978_v49 = vld [vmem:[#allocation4 + $0x2] ss:$0 sm:$0xff] }
  0x58   : > { %276 = vrot.lane.b32.xlu0 %v1972_v41, %s2130_s24  ;;  %v1977_v42 = vld [vmem:[#allocation4] ss:$0 sm:$0xff]  ;;  %v1979_v50 = vld [vmem:[#allocation4 + $0x2] ss:$0 sm:$0xff] }
  0x59   : > { %v1973_v43 = vld [vmem:[#allocation4] ss:$0 sm:$0xff]  ;;  %333 = vrot.lane.b32.xlu2 %v1977_v42, %s2131_s9  ;;  %v1986_v51 = vld [vmem:[#allocation4 + $0x2] ss:$0 sm:$0xff] }
  0x5a   : > { %v1974_v44 = vld [vmem:[#allocation4] ss:$0 sm:$0xff]  ;;  %v1982_v53 = vld [vmem:[#allocation4 + $0x2] ss:$0 sm:$0xff] }
  0x5b   : > { %v1980_v45 = vld [vmem:[#allocation4] ss:$0 sm:$0xff]  ;;  %v2001_v4 = vld [vmem:[#allocation4 + $0x2] ss:$0 sm:$0xff] }
  0x5c   : > { %v1975_v46 = vld [vmem:[#allocation4] ss:$0 sm:$0xff]  ;;  %v1981_v52 = vld [vmem:[#allocation4 + $0x1] ss:$0 sm:$0xff]  ;;  %v1990_v61 = vld [vmem:[#allocation4 + $0x3] ss:$0 sm:$0xff] }
  0x5d   : > { %v1976_v47 = vld [vmem:[#allocation4] ss:$0 sm:$0xff]  ;;  %v1989_v54 = vld [vmem:[#allocation4 + $0x1] ss:$0 sm:$0xff]  ;;  %v1991_v62 = vld [vmem:[#allocation4 + $0x3] ss:$0 sm:$0xff] }
  0x5e   : > { %v1984_v55 = vld [vmem:[#allocation4 + $0x1] ss:$0 sm:$0xff]  ;;  %v2000_v63 = vld [vmem:[#allocation4 + $0x3] ss:$0 sm:$0xff]  ;;  %v1995_v5 = vld [vmem:[#allocation4 + $0x2] ss:$0 sm:$0xff] }
  0x5f   : > { %319 = vrot.lane.b32.xlu1 %v1973_v43, %s2132_s10  ;;  %v1985_v56 = vld [vmem:[#allocation4 + $0x1] ss:$0 sm:$0xff]  ;;  %v1993_v1 = vld [vmem:[#allocation4 + $0x3] ss:$0 sm:$0xff]  ;;  %v1996_v6 = vld [vmem:[#allocation4 + $0x2] ss:$0 sm:$0xff] }
  0x60   : > { %291 = vrot.lane.b32.xlu0 %v1974_v44, %s2133_s11  ;;  %v1992_v57 = vld [vmem:[#allocation4 + $0x1] ss:$0 sm:$0xff]  ;;  %v1994_v2 = vld [vmem:[#allocation4 + $0x3] ss:$0 sm:$0xff] }
  0x61   : > { %347 = vrot.lane.b32.xlu2 %v1980_v45, %s2134_s12  ;;  %v1987_v58 = vld [vmem:[#allocation4 + $0x1] ss:$0 sm:$0xff]  ;;  %v2002_v7 = vld [vmem:[#allocation4 + $0x3] ss:$0 sm:$0xff] }
  0x62   : > { %v1988_v59 = vld [vmem:[#allocation4 + $0x1] ss:$0 sm:$0xff]  ;;  %v1998_v8 = vld [vmem:[#allocation4 + $0x3] ss:$0 sm:$0xff] }
  0x63   : > { %v1997_v60 = vld [vmem:[#allocation4 + $0x1] ss:$0 sm:$0xff]  ;;  %v1999_v9 = vld [vmem:[#allocation4 + $0x3] ss:$0 sm:$0xff] }
  0x67   : > { %375 = vrot.lane.b32.xlu1 %v1975_v46, %s2135_s13 }
  0x68   : > { %361 = vrot.lane.b32.xlu0 %v1976_v47, %s2136_s18 }
  0x69   : > { %389 = vrot.lane.b32.xlu2 %v1983_v48, %s2130_s24 }
  0x6f   : > { %417 = vrot.lane.b32.xlu1 %v1978_v49, %s2129_s19 }
  0x70   : > { %403 = vrot.lane.b32.xlu0 %v1979_v50, %s2133_s11 }
  0x71   : > { %431 = vrot.lane.b32.xlu2 %v1986_v51, %s2132_s10 }
  0x77   : > { %284 = vrot.lane.b32.xlu1 %v1981_v52, %s2130_s24 }
  0x78   : > { %445 = vrot.lane.b32.xlu0 %v1982_v53, %s2131_s9 }
  0x79   : > { %298 = vrot.lane.b32.xlu2 %v1989_v54, %s2133_s11 }
  0x7f   : > { %326 = vrot.lane.b32.xlu1 %v1984_v55, %s2132_s10 }
  0x80   : > { %312 = vrot.lane.b32.xlu0 %v1985_v56, %s2129_s19 }
  0x81   : > { %340 = vrot.lane.b32.xlu2 %v1992_v57, %s2131_s9 }
  0x87   : > { %368 = vrot.lane.b32.xlu1 %v1987_v58, %s2136_s18 }
  0x88   : > { %354 = vrot.lane.b32.xlu0 %v1988_v59, %s2134_s12 }
  0x89   : > { %382 = vrot.lane.b32.xlu2 %v1997_v60, %s2135_s13 }
  0x8f   : > { %410 = vrot.lane.b32.xlu1 %v1990_v61, %s2133_s11  ;;  %s2454_s11 = sld [smem:[#allocation14 + $0x1c]] }
  0x90   : > { %396 = vrot.lane.b32.xlu0 %v1991_v62, %s2130_s24  ;;  %v523_v62 = vstv %s2402_s26  ;;  %s2142_s24 = smov 123   ;;  %s2518_s26 = sld [smem:[#allocation14 + $0x32]] }
  0x91   : > { %424 = vrot.lane.b32.xlu2 %v2000_v63, %s2129_s19  ;;  %s2427_s19 = sld [smem:[#allocation14 + $0x3f]] }
  0x97   : > { %452 = vrot.lane.b32.xlu1 %v1993_v1, %s2131_s9  ;;  %v515_v1 = vstv %s2404_s27  ;;  %s2439_s9 = sld [smem:[#allocation14 + $0x15]] }
  0x98   : > { %438 = vrot.lane.b32.xlu0 %v1994_v2, %s2132_s10  ;;  %s2444_s10 = sld [smem:[#allocation14 + $0x46]] }
  0x99   : > { %459 = vrot.lane.b32.xlu2 %v2001_v4, %s2134_s12  ;;  %s2526_s27 = sld [smem:[#allocation14 + $0x8]] }
  0x9f   : > { %487 = vrot.lane.b32.xlu1 %v1995_v5, %s2135_s13  ;;  %v531_v5 = vstv %s2409_s5  ;;  %s2535_s5 = sld [smem:[#allocation14 + $0x39]] }
  0xa0   : > { %473 = vrot.lane.b32.xlu0 %v1996_v6, %s2136_s18  ;;  %v539_v6 = vstv %s2411_s7  ;;  %s2539_s7 = sld [smem:[#allocation14 + $0xf]] }
  0xa1   : > { %466 = vrot.lane.b32.xlu2 %v2002_v7, %s2134_s12  ;;  %s2459_s12 = sld [smem:[#allocation14 + $0x4d]] }
  0xa7   : > { %494 = vrot.lane.b32.xlu1 %v1998_v8, %s2135_s13  ;;  %s2143_s13 = smov 122  }
  0xa8   : > { %480 = vrot.lane.b32.xlu0 %v1999_v9, %s2136_s18  ;;  %s2469_s18 = sld [smem:[#allocation14 + $0x23]] }
  0xb3   : > { %v334_v10 = vpop.permute.xlu2 %333 }
  0xb4   : > { %336 = vst.msk [vmem:[#allocation2 + $0x7] sm:$0x1] %vm279_vm4, %v334_v10 }
  0xbb   : > { %v348_v11 = vpop.permute.xlu2 %347 }
  0xbc   : > { %350 = vst.msk [vmem:[#allocation2 + $0x8] sm:$0x1] %vm279_vm4, %v348_v11 }
  0xc3   : > { %v390_v12 = vpop.permute.xlu2 %389 }
  0xc4   : > { %392 = vst.msk [vmem:[#allocation2 + $0xb] sm:$0x1] %vm279_vm4, %v390_v12 }
  0xc9   : > { %v306_v13 = vpop.permute.xlu1 %305 }
  0xca   : > { %308 = vst.msk [vmem:[#allocation2 + $0x5] sm:$0x1] %vm279_vm4, %v306_v13  ;;  %v277_v14 = vpop.permute.xlu0 %276  ;;  %v547_v13 = vstv %s2421_s8  ;;  %s2551_s8 = sld [smem:[#allocation14 + $0x40]] }
  0xcb   : > { %280 = vst.msk [vmem:[#allocation2 + $0x3] sm:$0x1] %vm279_vm4, %v277_v14  ;;  %v432_v15 = vpop.permute.xlu2 %431 }
  0xcc   : > { %434 = vst.msk [vmem:[#allocation2 + $0xe] sm:$0x1] %vm279_vm4, %v432_v15 }
  0xd1   : > { %v320_v16 = vpop.permute.xlu1 %319 }
  0xd2   : > { %322 = vst.msk [vmem:[#allocation2 + $0x6] sm:$0x1] %vm279_vm4, %v320_v16  ;;  %v292_v17 = vpop.permute.xlu0 %291  ;;  %v555_v16 = vstv %s2427_s19  ;;  %s2573_s19 = sld [smem:[#allocation14 + $0x47]] }
  0xd3   : > { %294 = vst.msk [vmem:[#allocation2 + $0x4] sm:$0x1] %vm279_vm4, %v292_v17  ;;  %v299_v18 = vpop.permute.xlu2 %298 }
  0xd4   : > { %301 = vst.msk [vmem:[#allocation3 + $0x4] sm:$0x1] %vm279_vm4, %v299_v18 }
  0xd9   : > { %v376_v19 = vpop.permute.xlu1 %375 }
  0xda   : > { %v2335_v20 = vld [vmem:[#allocation2] sm:$0xff]  ;;  %378 = vst.msk [vmem:[#allocation2 + $0xa] sm:$0x1] %vm279_vm4, %v376_v19  ;;  %v362_v22 = vpop.permute.xlu0 %361 }
  0xdb   : > { %502 = vst.msk [vmem:[#allocation5] sm:$0xff] %vm501_vm5, %v2335_v20  ;;  %630 = vrot.lane.b32.xlu2 %v2335_v20, %s2138_s21  ;;  %v341_v23 = vpop.permute.xlu2 %340 }
  0xdc   : > { %364 = vst.msk [vmem:[#allocation2 + $0x9] sm:$0x1] %vm279_vm4, %v362_v22 }
  0xdd   : > { %343 = vst.msk [vmem:[#allocation3 + $0x7] sm:$0x1] %vm279_vm4, %v341_v23  ;;  %v563_v23 = vstv %s2439_s9  ;;  %s2580_s9 = sld [smem:[#allocation14 + $0x1d]] }
  0xe1   : > { %v418_v24 = vpop.permute.xlu1 %417 }
  0xe2   : > { %420 = vst.msk [vmem:[#allocation2 + $0xd] sm:$0x1] %vm279_vm4, %v418_v24  ;;  %v404_v25 = vpop.permute.xlu0 %403  ;;  %v512_v53 = vld [vmem:[#allocation5] sm:$0xff] }
  0xe3   : > { %406 = vst.msk [vmem:[#allocation2 + $0xc] sm:$0x1] %vm279_vm4, %v404_v25  ;;  %v383_v26 = vpop.permute.xlu2 %382  ;;  %v516_v4 = vmul.f32 %v515_v1, %v512_v53 }
  0xe4   : > { %385 = vst.msk [vmem:[#allocation3 + $0xa] sm:$0x1] %vm279_vm4, %v383_v26  ;;  %v571_v26 = vstv %s2444_s10  ;;  %s2588_s10 = sld [smem:[#allocation14 + $0x4e]] }
  0xe9   : > { %v285_v27 = vpop.permute.xlu1 %284 }
  0xea   : > { %287 = vst.msk [vmem:[#allocation3 + $0x3] sm:$0x1] %vm279_vm4, %v285_v27  ;;  %v446_v28 = vpop.permute.xlu0 %445 }
  0xeb   : > { %448 = vst.msk [vmem:[#allocation2 + $0xf] sm:$0x1] %vm279_vm4, %v446_v28  ;;  %v425_v29 = vpop.permute.xlu2 %424 }
  0xec   : > { %427 = vst.msk [vmem:[#allocation3 + $0xd] sm:$0x1] %vm279_vm4, %v425_v29 }
  0xf1   : > { %v327_v30 = vpop.permute.xlu1 %326 }
  0xf2   : > { %v2350_v31 = vld [vmem:[#allocation2 + $0x8] sm:$0xff]  ;;  %329 = vst.msk [vmem:[#allocation3 + $0x6] sm:$0x1] %vm279_vm4, %v327_v30  ;;  %v313_v32 = vpop.permute.xlu0 %312 }
  0xf3   : > { %503 = vst.msk [vmem:[#allocation5 + $0x8] sm:$0xff] %vm501_vm5, %v2350_v31  ;;  %632 = vrot.lane.b32.xlu0 %v2350_v31, %s2138_s21  ;;  %v460_v33 = vpop.permute.xlu2 %459 }
  0xf4   : > { %315 = vst.msk [vmem:[#allocation3 + $0x5] sm:$0x1] %vm279_vm4, %v313_v32  ;;  %v579_v32 = vstv %s2454_s11  ;;  %s2596_s11 = sld [smem:[#allocation14 + $0x24]] }
  0xf5   : > { %462 = vst.msk [vmem:[#allocation2 + $0x10] sm:$0x1] %vm279_vm4, %v460_v33 }
  0xf9   : > { %v369_v34 = vpop.permute.xlu1 %368 }
  0xfa   : > { %371 = vst.msk [vmem:[#allocation3 + $0x9] sm:$0x1] %vm279_vm4, %v369_v34  ;;  %v355_v35 = vpop.permute.xlu0 %354  ;;  %v528_v54 = vld [vmem:[#allocation5 + $0x1] sm:$0xff] }
  0xfb   : > { %v2362_v36 = vld [vmem:[#allocation3] sm:$0xff]  ;;  %357 = vst.msk [vmem:[#allocation3 + $0x8] sm:$0x1] %vm279_vm4, %v355_v35  ;;  %v467_v37 = vpop.permute.xlu2 %466  ;;  %v532_v9 = vmul.f32 %v531_v5, %v528_v54  ;;  %v587_v35 = vstv %s2459_s12  ;;  %s2606_s12 = sld [smem:[#allocation14 + $0x55]] }
  0xfc   : > { %509 = vst.msk [vmem:[#allocation6] sm:$0xff] %vm501_vm5, %v2362_v36  ;;  %648 = vrot.lane.b32.xlu1 %v2362_v36, %s2138_s21  ;;  %v544_v55 = vld [vmem:[#allocation5 + $0x2] sm:$0xff] }
  0xfd   : > { %469 = vst.msk [vmem:[#allocation3 + $0x10] sm:$0x1] %vm279_vm4, %v467_v37  ;;  %v560_v56 = vld [vmem:[#allocation5 + $0x3] sm:$0xff]  ;;  %v548_v15 = vmul.f32 %v547_v13, %v544_v55 }
  0xfe   : > { %v2395_v58 = vld [vmem:[#allocation5 + $0x4] sm:$0xff]  ;;  %v564_v25 = vmul.f32 %v563_v23, %v560_v56 }
  0xff   : > { %v2397_v59 = vld [vmem:[#allocation5 + $0x5] sm:$0xff]  ;;  %v580_v34 = vmul.f32 %v579_v32, %v2395_v58 }
 0x100   : > { %v2399_v60 = vld [vmem:[#allocation5 + $0x6] sm:$0xff] }
 0x101   : > { %v411_v38 = vpop.permute.xlu1 %410 }
 0x102   : > { %413 = vst.msk [vmem:[#allocation3 + $0xc] sm:$0x1] %vm279_vm4, %v411_v38  ;;  %v397_v39 = vpop.permute.xlu0 %396 }
 0x103   : > { %399 = vst.msk [vmem:[#allocation3 + $0xb] sm:$0x1] %vm279_vm4, %v397_v39  ;;  %v520_v63 = vld [vmem:[#allocation6] sm:$0xff] }
 0x104   : > { %v524_v3 = vmul.f32 %v523_v62, %v520_v63 }
 0x106   : > { %v526_v8 = vadd.f32 %v524_v3, %v516_v4 }
 0x108   : > { %v534_v12 = vadd.f32 %v532_v9, %v526_v8 }
 0x109   : > { %v453_v40 = vpop.permute.xlu1 %452 }
 0x10a   : > { %455 = vst.msk [vmem:[#allocation3 + $0xf] sm:$0x1] %vm279_vm4, %v453_v40  ;;  %v439_v41 = vpop.permute.xlu0 %438 }
 0x10b   : > { %441 = vst.msk [vmem:[#allocation3 + $0xe] sm:$0x1] %vm279_vm4, %v439_v41 }
 0x111   : > { %v488_v42 = vpop.permute.xlu1 %487 }
 0x112   : > { %v2374_v43 = vld [vmem:[#allocation3 + $0x8] sm:$0xff]  ;;  %490 = vst.msk [vmem:[#allocation2 + $0x12] sm:$0x1] %vm279_vm4, %v488_v42  ;;  %v474_v44 = vpop.permute.xlu0 %473 }
 0x113   : > { %510 = vst.msk [vmem:[#allocation6 + $0x8] sm:$0xff] %vm501_vm5, %v2374_v43  ;;  %650 = vrot.lane.b32.xlu2 %v2374_v43, %s2138_s21 }
 0x114   : > { %476 = vst.msk [vmem:[#allocation2 + $0x11] sm:$0x1] %vm279_vm4, %v474_v44 }
 0x119   : > { %v495_v45 = vpop.permute.xlu1 %494 }
 0x11a   : > { %497 = vst.msk [vmem:[#allocation3 + $0x12] sm:$0x1] %vm279_vm4, %v495_v45  ;;  %v481_v46 = vpop.permute.xlu0 %480  ;;  %v536_v7 = vld [vmem:[#allocation6 + $0x1] sm:$0xff] }
 0x11b   : > { %v500_v47 = vld [vmem:[#allocation2 + $0x10] sm:$0x3f]  ;;  %483 = vst.msk [vmem:[#allocation3 + $0x11] sm:$0x1] %vm279_vm4, %v481_v46  ;;  %778 = vrot.lane.b32.xlu2 %v2335_v20, %s2139_s22  ;;  %v540_v10 = vmul.f32 %v539_v6, %v536_v7  ;;  %v595_v46 = vstv %s2469_s18  ;;  %s2624_s18 = sld [smem:[#allocation14 + $0x5c]] }
 0x11c   : > { %v626_v48 = vld [vmem:[#allocation2 + $0x10] sm:$0x3f]  ;;  %505 = vst.msk [vmem:[#allocation5 + $0x10] sm:$0x3f] %vm504_vm7, %v500_v47 }
 0x11d   : > { %634 = vrot.lane.b32.xlu0 %v626_v48, %s2138_s21  ;;  %v774_v51 = vld [vmem:[#allocation2 + $0x10] sm:$0x3f]  ;;  %v542_v14 = vadd.f32 %v540_v10, %v534_v12 }
 0x11e   : > { %v922_v61 = vld [vmem:[#allocation2 + $0x10] sm:$0x3f] }
 0x11f   : > { %v1070_v11 = vld [vmem:[#allocation2 + $0x10] sm:$0x3f]  ;;  %v550_v18 = vadd.f32 %v548_v15, %v542_v14 }
 0x120   : > { %v552_v17 = vld [vmem:[#allocation6 + $0x2] sm:$0xff] }
 0x121   : > { %v556_v22 = vmul.f32 %v555_v16, %v552_v17  ;;  %v568_v27 = vld [vmem:[#allocation6 + $0x3] sm:$0xff] }
 0x122   : > { %v508_v49 = vld [vmem:[#allocation3 + $0x10] sm:$0x3f]  ;;  %v1218_v29 = vld [vmem:[#allocation2 + $0x10] sm:$0x3f]  ;;  %v572_v30 = vmul.f32 %v571_v26, %v568_v27 }
 0x123   : > { %v644_v50 = vld [vmem:[#allocation3 + $0x10] sm:$0x3f]  ;;  %511 = vst.msk [vmem:[#allocation6 + $0x10] sm:$0x3f] %vm504_vm7, %v508_v49  ;;  %798 = vrot.lane.b32.xlu2 %v2374_v43, %s2139_s22  ;;  %v558_v24 = vadd.f32 %v556_v22, %v550_v18  ;;  %v584_v37 = vld [vmem:[#allocation6 + $0x4] sm:$0xff]  ;;  %v529_v42 = vld [vmem:[#allocation5 + $0x9] sm:$0xff] }
 0x124   : > { %652 = vrot.lane.b32.xlu1 %v644_v50, %s2138_s21  ;;  %v792_v52 = vld [vmem:[#allocation3 + $0x10] sm:$0x3f]  ;;  %s2475_s21 = sld [smem:[#allocation14 + $0x54]]  ;;  %v521_v40 = vld [vmem:[#allocation6 + $0x8] sm:$0xff]  ;;  %v588_v41 = vmul.f32 %v587_v35, %v584_v37  ;;  %v545_v44 = vld [vmem:[#allocation5 + $0xa] sm:$0xff] }
 0x125   : > { %780 = vrot.lane.b32.xlu0 %v2350_v31, %s2139_s22  ;;  %v940_v2 = vld [vmem:[#allocation3 + $0x10] sm:$0x3f]  ;;  %v566_v28 = vadd.f32 %v564_v25, %v558_v24  ;;  %v2484_v45 = vld [vmem:[#allocation5 + $0xb] sm:$0xff]  ;;  %v600_v53 = vld [vmem:[#allocation6 + $0x5] sm:$0xff]  ;;  %v549_v18 = vmul.f32 %v547_v13, %v545_v44  ;;  %v687_v44 = vstv %s2535_s5  ;;  %s2696_s5 = sld [smem:[#allocation14 + $0x17]] }
 0x126   : > { %v1088_v19 = vld [vmem:[#allocation3 + $0x10] sm:$0x3f]  ;;  %v1366_v58 = vld [vmem:[#allocation2 + $0x10] sm:$0x3f] }
 0x127   : > { %v574_v33 = vadd.f32 %v572_v30, %v566_v28  ;;  %v1236_v39 = vld [vmem:[#allocation3 + $0x10] sm:$0x3f]  ;;  %v671_v28 = vstv %s2518_s26  ;;  %s2681_s26 = sld [smem:[#allocation14 + $0x10]] }
 0x128   : > { %v2491_v48 = vld [vmem:[#allocation5 + $0xd] sm:$0xff] }
 0x129   : > { %v582_v38 = vadd.f32 %v580_v34, %v574_v33  ;;  %v2493_v49 = vld [vmem:[#allocation5 + $0xe] sm:$0xff] }
 0x12a   : > { %v537_v54 = vld [vmem:[#allocation6 + $0x9] sm:$0xff] }
 0x12b   : > { %926 = vrot.lane.b32.xlu2 %v2335_v20, %s2140_s23  ;;  %v590_v50 = vadd.f32 %v588_v41, %v582_v38  ;;  %v569_v3 = vld [vmem:[#allocation6 + $0xb] sm:$0xff]  ;;  %v679_v38 = vstv %s2526_s27  ;;  %s2689_s27 = sld [smem:[#allocation14 + $0x41]] }
 0x12c   : > { %796 = vrot.lane.b32.xlu1 %v2362_v36, %s2139_s22  ;;  %v2524_v7 = vld [vmem:[#allocation6 + $0xe] sm:$0xff] }
 0x12d   : > { %782 = vrot.lane.b32.xlu0 %v774_v51, %s2139_s22  ;;  %v525_v51 = vmul.f32 %v523_v62, %v521_v40 }
 0x133   : > { %946 = vrot.lane.b32.xlu2 %v2374_v43, %s2140_s23 }
 0x134   : > { %800 = vrot.lane.b32.xlu1 %v792_v52, %s2139_s22  ;;  %s2487_s22 = sld [smem:[#allocation14 + $0x2a]]  ;;  %v603_v52 = vstv %s2475_s21 }
 0x135   : > { %928 = vrot.lane.b32.xlu0 %v2350_v31, %s2140_s23  ;;  %v631_v57 = vpop.permute.xlu2 %630  ;;  %s2644_s21 = sld [smem:[#allocation14 + $0x2]] }
 0x136   : > { %639 = vst.msk [vmem:[#allocation5] sm:$0xff] %vm501_vm5, %v631_v57  ;;  %v533_v57 = vmul.f32 %v531_v5, %v529_v42  ;;  %v2520_v5 = vld [vmem:[#allocation6 + $0xc] sm:$0xff] }
 0x13a   : > { %v611_v62 = vstv %s2487_s22  ;;  %s2648_s22 = sld [smem:[#allocation14 + $0x33]] }
 0x13b   : > { %1074 = vrot.lane.b32.xlu2 %v2335_v20, %s2141_s28  ;;  %v612_v10 = vmul.f32 %v611_v62, %v2399_v60 }
 0x13c   : > { %944 = vrot.lane.b32.xlu1 %v2362_v36, %s2140_s23 }
 0x13d   : > { %930 = vrot.lane.b32.xlu0 %v922_v61, %s2140_s23  ;;  %v604_v61 = vmul.f32 %v603_v52, %v600_v53  ;;  %v660_v12 = vld [vmem:[#allocation5] sm:$0xff] }
 0x143   : > { %1094 = vrot.lane.b32.xlu2 %v2374_v43, %s2141_s28 }
 0x144   : > { %948 = vrot.lane.b32.xlu1 %v940_v2, %s2140_s23  ;;  %s2496_s23 = sld [smem:[#allocation14 + $0x5b]]  ;;  %v616_v2 = vld [vmem:[#allocation6 + $0x6] sm:$0xff] }
 0x145   : > { %1076 = vrot.lane.b32.xlu0 %v2350_v31, %s2141_s28 }
 0x14a   : > { %v619_v14 = vstv %s2496_s23  ;;  %s2654_s23 = sld [smem:[#allocation14 + $0x9]] }
 0x14b   : > { %1222 = vrot.lane.b32.xlu2 %v2335_v20, %s2142_s24  ;;  %v620_v60 = vmul.f32 %v619_v14, %v616_v2 }
 0x14c   : > { %1092 = vrot.lane.b32.xlu1 %v2362_v36, %s2141_s28 }
 0x14d   : > { %1078 = vrot.lane.b32.xlu0 %v1070_v11, %s2141_s28 }
 0x153   : > { %1242 = vrot.lane.b32.xlu2 %v2374_v43, %s2142_s24 }
 0x154   : > { %1096 = vrot.lane.b32.xlu1 %v1088_v19, %s2141_s28  ;;  %s2501_s28 = sld [smem:[#allocation14 + $0x1]]  ;;  %v1384_v19 = vld [vmem:[#allocation3 + $0x10] sm:$0x3f] }
 0x155   : > { %1224 = vrot.lane.b32.xlu0 %v2350_v31, %s2142_s24 }
 0x15a   : > { %v663_v11 = vstv %s2501_s28  ;;  %s2665_s28 = sld [smem:[#allocation14 + $0x3a]] }
 0x15b   : > { %1370 = vrot.lane.b32.xlu2 %v2335_v20, %s2143_s13  ;;  %v513_v20 = vld [vmem:[#allocation5 + $0x8] sm:$0xff]  ;;  %v664_v22 = vmul.f32 %v663_v11, %v660_v12 }
 0x15c   : > { %1240 = vrot.lane.b32.xlu1 %v2362_v36, %s2142_s24  ;;  %v517_v56 = vmul.f32 %v515_v1, %v513_v20  ;;  %v553_v1 = vld [vmem:[#allocation6 + $0xa] sm:$0xff] }
 0x15d   : > { %1226 = vrot.lane.b32.xlu0 %v1218_v29, %s2142_s24  ;;  %v557_v20 = vmul.f32 %v555_v16, %v553_v1  ;;  %v565_v16 = vmul.f32 %v563_v23, %v2484_v45 }
 0x15e   : > { %v527_v63 = vadd.f32 %v525_v51, %v517_v56  ;;  %v695_v51 = vstv %s2539_s7  ;;  %s2704_s7 = sld [smem:[#allocation14 + $0x48]] }
 0x160   : > { %v535_v9 = vadd.f32 %v533_v57, %v527_v63 }
 0x163   : > { %1390 = vrot.lane.b32.xlu2 %v2374_v43, %s2143_s13  ;;  %v2489_v43 = vld [vmem:[#allocation5 + $0xc] sm:$0xff] }
 0x164   : > { %1244 = vrot.lane.b32.xlu1 %v1236_v39, %s2142_s24  ;;  %s2562_s24 = sld [smem:[#allocation14 + $0x16]]  ;;  %v581_v1 = vmul.f32 %v579_v32, %v2489_v43  ;;  %v727_v32 = vstv %s2580_s9  ;;  %v597_v43 = vmul.f32 %v595_v46, %v2491_v48 }
 0x165   : > { %1372 = vrot.lane.b32.xlu0 %v2350_v31, %s2143_s13  ;;  %v633_v47 = vpop.permute.xlu0 %632  ;;  %v596_v31 = vmul.f32 %v595_v46, %v2397_v59  ;;  %v541_v59 = vmul.f32 %v539_v6, %v537_v54  ;;  %s2767_s9 = sld [smem:[#allocation14 + $0x56]] }
 0x166   : > { %640 = vst.msk [vmem:[#allocation5 + $0x8] sm:$0xff] %vm501_vm5, %v633_v47 }
 0x167   : > { %v598_v55 = vadd.f32 %v596_v31, %v590_v50  ;;  %v543_v15 = vadd.f32 %v541_v59, %v535_v9  ;;  %v573_v59 = vmul.f32 %v571_v26, %v569_v3  ;;  %v719_v26 = vstv %s2573_s19  ;;  %s2746_s19 = sld [smem:[#allocation14 + $0x25]] }
 0x168   : > { %v589_v3 = vmul.f32 %v587_v35, %v2520_v5 }
 0x169   : > { %v606_v4 = vadd.f32 %v604_v61, %v598_v55  ;;  %v551_v29 = vadd.f32 %v549_v18, %v543_v15 }
 0x16a   : > { %v711_v45 = vstv %s2562_s24  ;;  %s2733_s24 = sld [smem:[#allocation14 + $0x4f]] }
 0x16b   : > { %v614_v17 = vadd.f32 %v612_v10, %v606_v4  ;;  %v559_v47 = vadd.f32 %v557_v20, %v551_v29  ;;  %v743_v29 = vstv %s2596_s11  ;;  %s2791_s11 = sld [smem:[#allocation14 + $0x5d]] }
 0x16c   : > { %1388 = vrot.lane.b32.xlu1 %v2362_v36, %s2143_s13  ;;  %v2522_v36 = vld [vmem:[#allocation6 + $0xd] sm:$0xff] }
 0x16d   : > { %1374 = vrot.lane.b32.xlu0 %v1366_v58, %s2143_s13  ;;  %v651_v8 = vpop.permute.xlu2 %650  ;;  %v692_v24 = vld [vmem:[#allocation5 + $0x2] sm:$0xff]  ;;  %v622_v33 = vadd.f32 %v620_v60, %v614_v17  ;;  %v567_v55 = vadd.f32 %v565_v16, %v559_v47  ;;  %v703_v58 = vstv %s2551_s8  ;;  %s2716_s8 = sld [smem:[#allocation14 + $0x1e]] }
 0x16e   : > { %v649_v6 = vpop.permute.xlu1 %648  ;;  %658 = vst.msk [vmem:[#allocation6 + $0x8] sm:$0xff] %vm501_vm5, %v651_v8  ;;  %v708_v25 = vld [vmem:[#allocation5 + $0x3] sm:$0xff]  ;;  %v696_v57 = vmul.f32 %v695_v51, %v692_v24  ;;  %v605_v24 = vmul.f32 %v603_v52, %v2522_v36 }
 0x16f   : > { %657 = vst.msk [vmem:[#allocation6] sm:$0xff] %vm501_vm5, %v649_v6  ;;  %v724_v27 = vld [vmem:[#allocation5 + $0x4] sm:$0xff]  ;;  %v666_v40 = vadd.f32 %v664_v22, %v622_v33  ;;  %v575_v2 = vadd.f32 %v573_v59, %v567_v55  ;;  %v712_v8 = vmul.f32 %v711_v45, %v708_v25  ;;  %v735_v22 = vstv %s2588_s10  ;;  %s2779_s10 = sld [smem:[#allocation14 + $0x2c]] }
 0x170   : > { %v2547_v30 = vld [vmem:[#allocation5 + $0x5] sm:$0xff] }
 0x171   : > { %v2549_v13 = vld [vmem:[#allocation5 + $0x6] sm:$0xff]  ;;  %v583_v6 = vadd.f32 %v581_v1, %v575_v2 }
 0x172   : > { %v676_v34 = vld [vmem:[#allocation5 + $0x1] sm:$0xff] }
 0x173   : > { %v680_v31 = vmul.f32 %v679_v38, %v676_v34  ;;  %v591_v12 = vadd.f32 %v589_v3, %v583_v6  ;;  %v661_v34 = vld [vmem:[#allocation5 + $0x8] sm:$0xff] }
 0x174   : > { %1392 = vrot.lane.b32.xlu1 %v1384_v19, %s2143_s13  ;;  %v728_v19 = vmul.f32 %v727_v32, %v724_v27  ;;  %s2615_s13 = sld [smem:[#allocation14 + $0x2b]]  ;;  %v613_v27 = vmul.f32 %v611_v62, %v2493_v49 }
 0x175   : > { %v779_v37 = vpop.permute.xlu2 %778  ;;  %v599_v35 = vadd.f32 %v597_v43, %v591_v12 }
 0x176   : > { %v668_v39 = vld [vmem:[#allocation6] sm:$0xff]  ;;  %787 = vst.msk [vmem:[#allocation5] sm:$0xff] %vm501_vm5, %v779_v37  ;;  %v744_v37 = vmul.f32 %v743_v29, %v2547_v30  ;;  %v621_v30 = vmul.f32 %v619_v14, %v2524_v7 }
 0x177   : > { %v672_v41 = vmul.f32 %v671_v28, %v668_v39  ;;  %v684_v42 = vld [vmem:[#allocation6 + $0x1] sm:$0xff]  ;;  %v607_v46 = vadd.f32 %v605_v24, %v599_v35  ;;  %v751_v39 = vstv %s2606_s12  ;;  %v811_v24 = vstv %s2644_s21  ;;  %s2811_s12 = sld [smem:[#allocation14 + $0x3]] }
 0x178   : > { %v688_v54 = vmul.f32 %v687_v44, %v684_v42  ;;  %v700_v56 = vld [vmem:[#allocation6 + $0x2] sm:$0xff]  ;;  %s2859_s21 = sld [smem:[#allocation14 + $0x3b]] }
 0x179   : > { %v674_v50 = vadd.f32 %v672_v41, %v666_v40  ;;  %v704_v23 = vmul.f32 %v703_v58, %v700_v56  ;;  %v716_v9 = vld [vmem:[#allocation6 + $0x3] sm:$0xff]  ;;  %v615_v52 = vadd.f32 %v613_v27, %v607_v46  ;;  %v665_v41 = vmul.f32 %v663_v11, %v661_v34 }
 0x17a   : > { %v720_v15 = vmul.f32 %v719_v26, %v716_v9  ;;  %v732_v5 = vld [vmem:[#allocation6 + $0x4] sm:$0xff]  ;;  %v759_v7 = vstv %s2615_s13  ;;  %s2821_s13 = sld [smem:[#allocation14 + $0x34]] }
 0x17b   : > { %v682_v53 = vadd.f32 %v680_v31, %v674_v50  ;;  %v736_v48 = vmul.f32 %v735_v22, %v732_v5  ;;  %v748_v36 = vld [vmem:[#allocation6 + $0x5] sm:$0xff] }
 0x17c   : > { %v669_v40 = vld [vmem:[#allocation6 + $0x8] sm:$0xff]  ;;  %v752_v56 = vmul.f32 %v751_v39, %v748_v36  ;;  %v827_v36 = vstv %s2654_s23  ;;  %s2899_s23 = sld [smem:[#allocation14 + $0x42]] }
 0x17d   : > { %v690_v61 = vadd.f32 %v688_v54, %v682_v53  ;;  %v2601_v18 = vpop.permute.xlu2 %798  ;;  %v623_v54 = vadd.f32 %v621_v30, %v615_v52  ;;  %v673_v55 = vmul.f32 %v671_v28, %v669_v40  ;;  %v764_v59 = vld [vmem:[#allocation6 + $0x6] sm:$0xff]  ;;  %v767_v28 = vstv %s2624_s18  ;;  %s2834_s18 = sld [smem:[#allocation14 + $0xa]] }
 0x17e   : > { %v768_v35 = vmul.f32 %v767_v28, %v764_v59 }
 0x17f   : > { %v698_v63 = vadd.f32 %v696_v57, %v690_v61  ;;  %v667_v57 = vadd.f32 %v665_v41, %v623_v54 }
 0x181   : > { %v706_v4 = vadd.f32 %v704_v23, %v698_v63  ;;  %v760_v63 = vmul.f32 %v759_v7, %v2549_v13  ;;  %v675_v2 = vadd.f32 %v673_v55, %v667_v57 }
 0x183   : > { %v714_v10 = vadd.f32 %v712_v8, %v706_v4 }
 0x185   : > { %v722_v17 = vadd.f32 %v720_v15, %v714_v10  ;;  %v927_v42 = vpop.permute.xlu2 %926 }
 0x187   : > { %v730_v25 = vadd.f32 %v728_v19, %v722_v17 }
 0x189   : > { %v738_v33 = vadd.f32 %v736_v48, %v730_v25  ;;  %v808_v25 = vld [vmem:[#allocation5] sm:$0xff] }
 0x18a   : > { %v812_v52 = vmul.f32 %v811_v24, %v808_v25 }
 0x18b   : > { %v746_v50 = vadd.f32 %v744_v37, %v738_v33  ;;  %v819_v33 = vstv %s2648_s22  ;;  %s2877_s22 = sld [smem:[#allocation14 + $0x11]] }
 0x18d   : > { %v754_v61 = vadd.f32 %v752_v56, %v746_v50  ;;  %v2669_v17 = vpop.permute.xlu2 %946  ;;  %v843_v56 = vstv %s2681_s26  ;;  %s2929_s26 = sld [smem:[#allocation14 + $0x49]] }
 0x18f   : > { %v635_v60 = vpop.permute.xlu0 %634  ;;  %v762_v10 = vadd.f32 %v760_v63, %v754_v61 }
 0x190   : > { %641 = vst.msk [vmem:[#allocation5 + $0x10] sm:$0x3f] %vm504_vm7, %v635_v60 }
 0x191   : > { %v770_v27 = vadd.f32 %v768_v35, %v762_v10  ;;  %v859_v35 = vstv %s2696_s5  ;;  %s2961_s5 = sld [smem:[#allocation14 + $0x50]] }
 0x195   : > { %v2726_v59 = vpop.permute.xlu2 %1074 }
 0x196   : > { %v653_v20 = vpop.permute.xlu1 %652 }
 0x197   : > { %v677_v47 = vld [vmem:[#allocation5 + $0x9] sm:$0xff]  ;;  %659 = vst.msk [vmem:[#allocation6 + $0x10] sm:$0x3f] %vm504_vm7, %v653_v20  ;;  %v781_v31 = vpop.permute.xlu0 %780 }
 0x198   : > { %v693_v49 = vld [vmem:[#allocation5 + $0xa] sm:$0xff]  ;;  %v681_v14 = vmul.f32 %v679_v38, %v677_v47 }
 0x199   : > { %v709_v62 = vld [vmem:[#allocation5 + $0xb] sm:$0xff] }
 0x19a   : > { %v2632_v16 = vld [vmem:[#allocation5 + $0xc] sm:$0xff]  ;;  %v683_v6 = vadd.f32 %v681_v14, %v675_v2  ;;  %v713_v34 = vmul.f32 %v711_v45, %v709_v62 }
 0x19b   : > { %v2634_v53 = vld [vmem:[#allocation5 + $0xd] sm:$0xff]  ;;  %v729_v30 = vmul.f32 %v727_v32, %v2632_v16 }
 0x19c   : > { %v2636_v11 = vld [vmem:[#allocation5 + $0xe] sm:$0xff] }
 0x19d   : > { %788 = vst.msk [vmem:[#allocation5 + $0x8] sm:$0xff] %vm501_vm5, %v781_v31 }
 0x19e   : > { %v685_v23 = vld [vmem:[#allocation6 + $0x9] sm:$0xff]  ;;  %v797_v8 = vpop.permute.xlu1 %796 }
 0x19f   : > { %v701_v1 = vld [vmem:[#allocation6 + $0xa] sm:$0xff]  ;;  %v689_v38 = vmul.f32 %v687_v44, %v685_v23  ;;  %805 = vst.msk [vmem:[#allocation6] sm:$0xff] %vm501_vm5, %v797_v8  ;;  %v783_v13 = vpop.permute.xlu0 %782  ;;  %v697_v44 = vmul.f32 %v695_v51, %v693_v49  ;;  %v835_v49 = vstv %s2665_s28  ;;  %s2911_s28 = sld [smem:[#allocation14 + $0x18]] }
 0x1a0   : > { %v717_v4 = vld [vmem:[#allocation6 + $0xb] sm:$0xff]  ;;  %789 = vst.msk [vmem:[#allocation5 + $0x10] sm:$0x3f] %vm504_vm7, %v783_v13  ;;  %v705_v48 = vmul.f32 %v703_v58, %v701_v1 }
 0x1a1   : > { %v733_v9 = vld [vmem:[#allocation6 + $0xc] sm:$0xff]  ;;  %v691_v19 = vadd.f32 %v689_v38, %v683_v6  ;;  %v721_v41 = vmul.f32 %v719_v26, %v717_v4  ;;  %v851_v4 = vstv %s2689_s27  ;;  %s2942_s27 = sld [smem:[#allocation14 + $0x1f]] }
 0x1a2   : > { %v2658_v3 = vld [vmem:[#allocation6 + $0xd] sm:$0xff]  ;;  %v737_v16 = vmul.f32 %v735_v22, %v733_v9  ;;  %v745_v22 = vmul.f32 %v743_v29, %v2634_v53 }
 0x1a3   : > { %v2660_v12 = vld [vmem:[#allocation6 + $0xe] sm:$0xff]  ;;  %v699_v46 = vadd.f32 %v697_v44, %v691_v19 }
 0x1a4   : > { %806 = vst.msk [vmem:[#allocation6 + $0x8] sm:$0xff] %vm501_vm5, %v2601_v18  ;;  %v824_v15 = vld [vmem:[#allocation5 + $0x1] sm:$0xff] }
 0x1a5   : > { %v840_v43 = vld [vmem:[#allocation5 + $0x2] sm:$0xff]  ;;  %v707_v37 = vadd.f32 %v705_v48, %v699_v46  ;;  %v828_v26 = vmul.f32 %v827_v36, %v824_v15  ;;  %v3611_v21 = vstv %s2911_s28 }
 0x1a6   : > { %v2673_v5 = vld [vmem:[#allocation5 + $0x3] sm:$0xff]  ;;  %v816_v20 = vld [vmem:[#allocation6] sm:$0xff]  ;;  %v801_v40 = vpop.permute.xlu1 %800  ;;  %v844_v13 = vmul.f32 %v843_v56, %v840_v43  ;;  %v753_v43 = vmul.f32 %v751_v39, %v2658_v3  ;;  %v761_v39 = vmul.f32 %v759_v7, %v2636_v11 }
 0x1a7   : > { %v2676_v18 = vld [vmem:[#allocation5 + $0x4] sm:$0xff]  ;;  %v715_v58 = vadd.f32 %v713_v34, %v707_v37  ;;  %v820_v47 = vmul.f32 %v819_v33, %v816_v20  ;;  %807 = vst.msk [vmem:[#allocation6 + $0x10] sm:$0x3f] %vm504_vm7, %v801_v40  ;;  %v929_v45 = vpop.permute.xlu0 %928  ;;  %v2720_v57 = vld [vmem:[#allocation5 + $0xc] sm:$0xff] }
 0x1a8   : > { %v2678_v60 = vld [vmem:[#allocation5 + $0x5] sm:$0xff]  ;;  %v2722_v61 = vld [vmem:[#allocation5 + $0xd] sm:$0xff] }
 0x1a9   : > { %v2683_v51 = vld [vmem:[#allocation5 + $0x6] sm:$0xff]  ;;  %v723_v50 = vadd.f32 %v721_v41, %v715_v58  ;;  %v2730_v1 = vld [vmem:[#allocation5 + $0xe] sm:$0xff]  ;;  %v867_v58 = vstv %s2704_s7  ;;  %s2977_s7 = sld [smem:[#allocation14 + $0x26]] }
 0x1aa   : > { %935 = vst.msk [vmem:[#allocation5] sm:$0xff] %vm501_vm5, %v927_v42  ;;  %v814_v42 = vadd.f32 %v812_v52, %v770_v27  ;;  %v2711_v54 = vld [vmem:[#allocation5 + $0x9] sm:$0xff] }
 0x1ab   : > { %v832_v62 = vld [vmem:[#allocation6 + $0x1] sm:$0xff]  ;;  %v2713_v55 = vld [vmem:[#allocation5 + $0xa] sm:$0xff]  ;;  %v731_v32 = vadd.f32 %v729_v30, %v723_v50 }
 0x1ac   : > { %v822_v31 = vadd.f32 %v820_v47, %v814_v42  ;;  %v2718_v14 = vld [vmem:[#allocation5 + $0xb] sm:$0xff]  ;;  %v836_v23 = vmul.f32 %v835_v49, %v832_v62  ;;  %v848_v8 = vld [vmem:[#allocation6 + $0x2] sm:$0xff]  ;;  %v860_v42 = vmul.f32 %v859_v35, %v2673_v5  ;;  %v875_v47 = vstv %s2716_s8  ;;  %s2992_s8 = sld [smem:[#allocation14 + $0x57]] }
 0x1ad   : > { %v809_v63 = vld [vmem:[#allocation5 + $0x8] sm:$0xff]  ;;  %v864_v6 = vld [vmem:[#allocation6 + $0x3] sm:$0xff]  ;;  %v739_v38 = vadd.f32 %v737_v16, %v731_v32  ;;  %v852_v34 = vmul.f32 %v851_v4, %v848_v8  ;;  %v769_v62 = vmul.f32 %v767_v28, %v2660_v12  ;;  %v883_v5 = vstv %s2733_s24  ;;  %v2804_v16 = vpop.permute.xlu2 %1094  ;;  %s3017_s24 = sld [smem:[#allocation14 + $0x2d]] }
 0x1ae   : > { %v830_v2 = vadd.f32 %v828_v26, %v822_v31  ;;  %936 = vst.msk [vmem:[#allocation5 + $0x8] sm:$0xff] %vm501_vm5, %v929_v45  ;;  %v817_v9 = vld [vmem:[#allocation6 + $0x8] sm:$0xff]  ;;  %v945_v53 = vpop.permute.xlu1 %944  ;;  %v868_v11 = vmul.f32 %v867_v58, %v864_v6  ;;  %v813_v12 = vmul.f32 %v811_v24, %v809_v63  ;;  %v876_v32 = vmul.f32 %v875_v47, %v2676_v18 }
 0x1af   : > { %v880_v15 = vld [vmem:[#allocation6 + $0x4] sm:$0xff]  ;;  %v747_v48 = vadd.f32 %v745_v22, %v739_v38  ;;  %v2759_v37 = vld [vmem:[#allocation6 + $0xc] sm:$0xff]  ;;  %v931_v40 = vpop.permute.xlu0 %930  ;;  %v891_v6 = vstv %s2746_s19  ;;  %v821_v18 = vmul.f32 %v819_v33, %v817_v9  ;;  %s3034_s19 = sld [smem:[#allocation14 + $0x5e]] }
 0x1b0   : > { %v838_v10 = vadd.f32 %v836_v23, %v830_v2  ;;  %v2741_v44 = vld [vmem:[#allocation6 + $0x5] sm:$0xff]  ;;  %v2761_v52 = vld [vmem:[#allocation6 + $0xd] sm:$0xff]  ;;  %937 = vst.msk [vmem:[#allocation5 + $0x10] sm:$0x3f] %vm504_vm7, %v931_v40  ;;  %v884_v38 = vmul.f32 %v883_v5, %v880_v15 }
 0x1b1   : > { %v2743_v19 = vld [vmem:[#allocation6 + $0x6] sm:$0xff]  ;;  %v2763_v20 = vld [vmem:[#allocation6 + $0xe] sm:$0xff]  ;;  %v755_v3 = vadd.f32 %v753_v43, %v747_v48  ;;  %v829_v48 = vmul.f32 %v827_v36, %v2711_v54  ;;  %v907_v43 = vstv %s2779_s10  ;;  %s3067_s10 = sld [smem:[#allocation14 + $0x35]] }
 0x1b2   : > { %v2748_v25 = vld [vmem:[#allocation6 + $0x9] sm:$0xff]  ;;  %v846_v27 = vadd.f32 %v844_v13, %v838_v10  ;;  %953 = vst.msk [vmem:[#allocation6] sm:$0xff] %vm501_vm5, %v945_v53  ;;  %v899_v13 = vstv %s2767_s9  ;;  %s3048_s9 = sld [smem:[#allocation14 + $0x4]] }
 0x1b3   : > { %v2750_v46 = vld [vmem:[#allocation6 + $0xa] sm:$0xff]  ;;  %v763_v45 = vadd.f32 %v761_v39, %v755_v3  ;;  %v900_v39 = vmul.f32 %v899_v13, %v2741_v44  ;;  %v908_v44 = vmul.f32 %v907_v43, %v2683_v51 }
 0x1b4   : > { %v2752_v29 = vld [vmem:[#allocation6 + $0xb] sm:$0xff]  ;;  %v854_v41 = vadd.f32 %v852_v34, %v846_v27 }
 0x1b5   : > { %954 = vst.msk [vmem:[#allocation6 + $0x8] sm:$0xff] %vm501_vm5, %v2669_v17  ;;  %v2786_v7 = vld [vmem:[#allocation5 + $0x1] sm:$0xff]  ;;  %v771_v28 = vadd.f32 %v769_v62, %v763_v45 }
 0x1b6   : > { %v862_v17 = vadd.f32 %v860_v42, %v854_v41  ;;  %v2788_v30 = vld [vmem:[#allocation5 + $0x2] sm:$0xff]  ;;  %v949_v22 = vpop.permute.xlu1 %948  ;;  %v915_v42 = vstv %s2791_s11  ;;  %s3077_s11 = sld [smem:[#allocation14 + $0xb]] }
 0x1b7   : > { %v2793_v50 = vld [vmem:[#allocation5 + $0x3] sm:$0xff]  ;;  %v815_v24 = vadd.f32 %v813_v12, %v771_v28  ;;  %955 = vst.msk [vmem:[#allocation6 + $0x10] sm:$0x3f] %vm504_vm7, %v949_v22  ;;  %v1077_v10 = vpop.permute.xlu0 %1076  ;;  %v2836_v27 = vld [vmem:[#allocation5 + $0xb] sm:$0xff] }
 0x1b8   : > { %v2795_v31 = vld [vmem:[#allocation5 + $0x4] sm:$0xff]  ;;  %v870_v2 = vadd.f32 %v868_v11, %v862_v17  ;;  %v2838_v34 = vld [vmem:[#allocation5 + $0xc] sm:$0xff] }
 0x1b9   : > { %v2797_v26 = vld [vmem:[#allocation5 + $0x5] sm:$0xff]  ;;  %v823_v53 = vadd.f32 %v821_v18, %v815_v24  ;;  %v2840_v40 = vld [vmem:[#allocation5 + $0xd] sm:$0xff]  ;;  %v964_v45 = vld [vmem:[#allocation6] sm:$0xff]  ;;  %v3613_v24 = vstv %s2811_s12 }
 0x1ba   : > { %v2806_v23 = vld [vmem:[#allocation5] sm:$0xff]  ;;  %v878_v63 = vadd.f32 %v876_v32, %v870_v2  ;;  %v2829_v9 = vld [vmem:[#allocation5 + $0x9] sm:$0xff] }
 0x1bb   : > { %v2808_v8 = vld [vmem:[#allocation5 + $0x6] sm:$0xff]  ;;  %v831_v36 = vadd.f32 %v829_v48, %v823_v53  ;;  %v2850_v41 = vld [vmem:[#allocation5 + $0xe] sm:$0xff]  ;;  %v916_v53 = vmul.f32 %v915_v42, %v2743_v19  ;;  %v1223_v48 = vpop.permute.xlu2 %1222 }
 0x1bc   : > { %1083 = vst.msk [vmem:[#allocation5] sm:$0xff] %vm501_vm5, %v2726_v59  ;;  %v892_v59 = vmul.f32 %v891_v6, %v2678_v60  ;;  %v886_v33 = vadd.f32 %v884_v38, %v878_v63  ;;  %v2831_v15 = vld [vmem:[#allocation5 + $0xa] sm:$0xff]  ;;  %v837_v60 = vmul.f32 %v835_v49, %v2748_v25  ;;  %v2853_v62 = vld [vmem:[#allocation6 + $0x1] sm:$0xff]  ;;  %v845_v49 = vmul.f32 %v843_v56, %v2713_v55 }
 0x1bd   : > { %v2848_v3 = vld [vmem:[#allocation5 + $0x8] sm:$0xff]  ;;  %v2855_v17 = vld [vmem:[#allocation6 + $0x2] sm:$0xff]  ;;  %v853_v38 = vmul.f32 %v851_v4, %v2750_v46  ;;  %v861_v4 = vmul.f32 %v859_v35, %v2718_v14 }
 0x1be   : > { %v894_v54 = vadd.f32 %v892_v59, %v886_v33  ;;  %v2857_v11 = vld [vmem:[#allocation6 + $0x3] sm:$0xff]  ;;  %1084 = vst.msk [vmem:[#allocation5 + $0x8] sm:$0xff] %vm501_vm5, %v1077_v10  ;;  %v839_v25 = vadd.f32 %v837_v60, %v831_v36  ;;  %v2883_v51 = vld [vmem:[#allocation6 + $0xb] sm:$0xff]  ;;  %v1093_v56 = vpop.permute.xlu1 %1092 }
 0x1bf   : > { %v2868_v12 = vld [vmem:[#allocation6 + $0x8] sm:$0xff]  ;;  %v1079_v60 = vpop.permute.xlu0 %1078 }
 0x1c0   : > { %v902_v28 = vadd.f32 %v900_v39, %v894_v54  ;;  %v2870_v32 = vld [vmem:[#allocation6 + $0x4] sm:$0xff]  ;;  %v847_v63 = vadd.f32 %v845_v49, %v839_v25  ;;  %v2891_v59 = vld [vmem:[#allocation6 + $0xc] sm:$0xff]  ;;  %v3612_v54 = vstv %s2821_s13  ;;  %v960_v39 = vmul.f32 %v3613_v24, %v2806_v23  ;;  %1085 = vst.msk [vmem:[#allocation5 + $0x10] sm:$0x3f] %vm504_vm7, %v1079_v60 }
 0x1c1   : > { %v2872_v2 = vld [vmem:[#allocation6 + $0x5] sm:$0xff]  ;;  %v2893_v33 = vld [vmem:[#allocation6 + $0xd] sm:$0xff]  ;;  %v3610_v49 = vstv %s2834_s18  ;;  %v869_v25 = vmul.f32 %v867_v58, %v2752_v29  ;;  %v968_v14 = vmul.f32 %v3612_v54, %v964_v45  ;;  %v877_v29 = vmul.f32 %v875_v47, %v2720_v57 }
 0x1c2   : > { %v2874_v22 = vld [vmem:[#allocation6 + $0x6] sm:$0xff]  ;;  %v910_v10 = vadd.f32 %v908_v44, %v902_v28  ;;  %v2895_v36 = vld [vmem:[#allocation6 + $0xe] sm:$0xff]  ;;  %v855_v19 = vadd.f32 %v853_v38, %v847_v63  ;;  %v885_v57 = vmul.f32 %v883_v5, %v2759_v37  ;;  %v893_v37 = vmul.f32 %v891_v6, %v2722_v61 }
 0x1c3   : > { %v2879_v18 = vld [vmem:[#allocation6 + $0x9] sm:$0xff]  ;;  %1101 = vst.msk [vmem:[#allocation6] sm:$0xff] %vm501_vm5, %v1093_v56  ;;  %v3609_v56 = vstv %s2859_s21  ;;  %v901_v6 = vmul.f32 %v899_v13, %v2761_v52  ;;  %v909_v52 = vmul.f32 %v907_v43, %v2730_v1 }
 0x1c4   : > { %v2881_v55 = vld [vmem:[#allocation6 + $0xa] sm:$0xff]  ;;  %v918_v46 = vadd.f32 %v916_v53, %v910_v10  ;;  %v863_v44 = vadd.f32 %v861_v4, %v855_v19  ;;  %v976_v10 = vmul.f32 %v3610_v49, %v2786_v7  ;;  %v3607_v4 = vstv %s2877_s22 }
 0x1c5   : > { %1102 = vst.msk [vmem:[#allocation6 + $0x8] sm:$0xff] %vm501_vm5, %v2804_v16  ;;  %v2918_v35 = vld [vmem:[#allocation5 + $0x1] sm:$0xff]  ;;  %v984_v7 = vmul.f32 %v3609_v56, %v2853_v62  ;;  %v992_v62 = vmul.f32 %v3607_v4, %v2788_v30  ;;  %v3615_v4 = vstv %s2929_s26 }
 0x1c6   : > { %v962_v16 = vadd.f32 %v960_v39, %v918_v46  ;;  %v2920_v28 = vld [vmem:[#allocation5 + $0x2] sm:$0xff]  ;;  %v871_v58 = vadd.f32 %v869_v25, %v863_v44  ;;  %v1097_v19 = vpop.permute.xlu1 %1096  ;;  %v3608_v25 = vstv %s2899_s23  ;;  %v1016_v0 = vmul.f32 %v3615_v4, %v2857_v11 }
 0x1c7   : > { %v2923_v23 = vld [vmem:[#allocation5 + $0x3] sm:$0xff]  ;;  %1103 = vst.msk [vmem:[#allocation6 + $0x10] sm:$0x3f] %vm504_vm7, %v1097_v19  ;;  %v1225_v44 = vpop.permute.xlu0 %1224  ;;  %v2973_v19 = vld [vmem:[#allocation5 + $0xe] sm:$0xff]  ;;  %v1000_v30 = vmul.f32 %v3608_v25, %v2855_v17  ;;  %v1008_v25 = vmul.f32 %v3611_v21, %v2793_v50 }
 0x1c8   : > { %v2925_v63 = vld [vmem:[#allocation5 + $0x4] sm:$0xff]  ;;  %v970_v45 = vadd.f32 %v968_v14, %v962_v16  ;;  %v879_v46 = vadd.f32 %v877_v29, %v871_v58  ;;  %v1243_v29 = vpop.permute.xlu2 %1242 }
 0x1c9   : > { %v2927_v38 = vld [vmem:[#allocation5 + $0x5] sm:$0xff] }
 0x1ca   : > { %v2937_v53 = vld [vmem:[#allocation5 + $0x6] sm:$0xff]  ;;  %v978_v47 = vadd.f32 %v976_v10, %v970_v45  ;;  %v887_v5 = vadd.f32 %v885_v57, %v879_v46 }
 0x1cb   : > { %v2939_v60 = vld [vmem:[#allocation5] sm:$0xff]  ;;  %v2951_v39 = vld [vmem:[#allocation5 + $0x8] sm:$0xff] }
 0x1cc   : > { %1231 = vst.msk [vmem:[#allocation5] sm:$0xff] %vm501_vm5, %v1223_v48  ;;  %v2955_v16 = vld [vmem:[#allocation5 + $0x9] sm:$0xff]  ;;  %v986_v58 = vadd.f32 %v984_v7, %v978_v47  ;;  %v895_v61 = vadd.f32 %v893_v37, %v887_v5  ;;  %v2985_v57 = vld [vmem:[#allocation6 + $0x1] sm:$0xff] }
 0x1cd   : > { %v2957_v14 = vld [vmem:[#allocation5 + $0xa] sm:$0xff]  ;;  %v2987_v47 = vld [vmem:[#allocation6 + $0x2] sm:$0xff] }
 0x1ce   : > { %v2959_v48 = vld [vmem:[#allocation5 + $0xb] sm:$0xff]  ;;  %v994_v46 = vadd.f32 %v992_v62, %v986_v58  ;;  %v2989_v7 = vld [vmem:[#allocation6 + $0x3] sm:$0xff]  ;;  %v903_v13 = vadd.f32 %v901_v6, %v895_v61  ;;  %v3014_v1 = vld [vmem:[#allocation6 + $0xb] sm:$0xff]  ;;  %v1241_v43 = vpop.permute.xlu1 %1240 }
 0x1cf   : > { %v2969_v45 = vld [vmem:[#allocation5 + $0xc] sm:$0xff]  ;;  %v2999_v37 = vld [vmem:[#allocation6 + $0x8] sm:$0xff]  ;;  %v1227_v54 = vpop.permute.xlu0 %1226 }
 0x1d0   : > { %v2971_v10 = vld [vmem:[#allocation5 + $0xd] sm:$0xff]  ;;  %v3001_v17 = vld [vmem:[#allocation6 + $0x4] sm:$0xff]  ;;  %v1002_v58 = vadd.f32 %v1000_v30, %v994_v46  ;;  %v911_v6 = vadd.f32 %v909_v52, %v903_v13  ;;  %v917_v30 = vmul.f32 %v915_v42, %v2763_v20  ;;  %v3022_v46 = vld [vmem:[#allocation6 + $0xc] sm:$0xff]  ;;  %v3616_v52 = vstv %s2961_s5 }
 0x1d1   : > { %1232 = vst.msk [vmem:[#allocation5 + $0x8] sm:$0xff] %vm501_vm5, %v1225_v44  ;;  %v2994_v44 = vld [vmem:[#allocation6] sm:$0xff]  ;;  %v3010_v56 = vld [vmem:[#allocation6 + $0x9] sm:$0xff]  ;;  %v3627_v42 = vstv %s2811_s12  ;;  %s3095_s12 = sld [smem:[#allocation14 + $0x3c]] }
 0x1d2   : > { %v3003_v5 = vld [vmem:[#allocation6 + $0x5] sm:$0xff]  ;;  %v3024_v50 = vld [vmem:[#allocation6 + $0xd] sm:$0xff]  ;;  %v1010_v24 = vadd.f32 %v1008_v25, %v1002_v58  ;;  %v919_v20 = vadd.f32 %v917_v30, %v911_v6  ;;  %v961_v13 = vmul.f32 %v3627_v42, %v2848_v3  ;;  %1233 = vst.msk [vmem:[#allocation5 + $0x10] sm:$0x3f] %vm504_vm7, %v1227_v54  ;;  %v3628_v25 = vstv %s2942_s27  ;;  %v1371_v54 = vpop.permute.xlu2 %1370 }
 0x1d3   : > { %v3005_v62 = vld [vmem:[#allocation6 + $0x6] sm:$0xff]  ;;  %v3026_v21 = vld [vmem:[#allocation6 + $0xe] sm:$0xff]  ;;  %v1024_v11 = vmul.f32 %v3628_v25, %v2795_v31  ;;  %v1032_v25 = vmul.f32 %v3616_v52, %v2870_v32  ;;  %v3617_v52 = vstv %s3017_s24 }
 0x1d4   : > { %v3012_v49 = vld [vmem:[#allocation6 + $0xa] sm:$0xff]  ;;  %3626 = vst [vmem:[#allocation20_spill] sm:$0xff] %v3026_v21  ;;  %v1018_v61 = vadd.f32 %v1016_v0, %v1010_v24  ;;  %v963_v0 = vadd.f32 %v961_v13, %v919_v20  ;;  %v3631_v24 = vstv %s2821_s13  ;;  %v3633_v13 = vstv %s2834_s18  ;;  %s3110_s13 = sld [smem:[#allocation14 + $0x12]] }
 0x1d5   : > { %1249 = vst.msk [vmem:[#allocation6] sm:$0xff] %vm501_vm5, %v1241_v43  ;;  %v969_v31 = vmul.f32 %v3631_v24, %v2868_v12  ;;  %v3062_v4 = vld [vmem:[#allocation5] sm:$0xff]  ;;  %v977_v12 = vmul.f32 %v3633_v13, %v2829_v9  ;;  %v3635_v21 = vstv %s2859_s21  ;;  %s3120_s18 = sld [smem:[#allocation14 + $0x43]] }
 0x1d6   : > { %1250 = vst.msk [vmem:[#allocation6 + $0x8] sm:$0xff] %vm501_vm5, %v1243_v29  ;;  %v1026_v42 = vadd.f32 %v1024_v11, %v1018_v61  ;;  %v3634_v61 = vstv %s2977_s7  ;;  %v1245_v32 = vpop.permute.xlu1 %1244  ;;  %s3149_s21 = sld [smem:[#allocation14 + $0x19]] }
 0x1d7   : > { %v971_v20 = vadd.f32 %v969_v31, %v963_v0  ;;  %v1040_v11 = vmul.f32 %v3634_v61, %v2797_v26  ;;  %1251 = vst.msk [vmem:[#allocation6 + $0x10] sm:$0x3f] %vm504_vm7, %v1245_v32  ;;  %v1373_v9 = vpop.permute.xlu0 %1372  ;;  %v3636_v31 = vstv %s2992_s8  ;;  %v3641_v61 = vstv %s2877_s22  ;;  %s3165_s22 = sld [smem:[#allocation14 + $0x4a]] }
 0x1d8   : > { %v3043_v58 = vld [vmem:[#allocation5 + $0x1] sm:$0xff]  ;;  %v1034_v24 = vadd.f32 %v1032_v25, %v1026_v42  ;;  %v1048_v26 = vmul.f32 %v3636_v31, %v2872_v2  ;;  %v3619_v32 = vstv %s3048_s9  ;;  %v3642_v31 = vstv %s2899_s23  ;;  %s3175_s23 = sld [smem:[#allocation14 + $0x20]] }
 0x1d9   : > { %v3045_v43 = vld [vmem:[#allocation5 + $0x2] sm:$0xff]  ;;  %v3090_v42 = vld [vmem:[#allocation5 + $0xa] sm:$0xff] }
 0x1da   : > { %v3050_v6 = vld [vmem:[#allocation5 + $0x3] sm:$0xff]  ;;  %v1042_v0 = vadd.f32 %v1040_v11, %v1034_v24  ;;  %v3092_v25 = vld [vmem:[#allocation5 + $0xb] sm:$0xff]  ;;  %v1056_v24 = vmul.f32 %v3617_v52, %v2808_v8  ;;  %v993_v11 = vmul.f32 %v3641_v61, %v2831_v15 }
 0x1db   : > { %v3052_v30 = vld [vmem:[#allocation5 + $0x4] sm:$0xff]  ;;  %3637 = vst [vmem:[#allocation24_spill] sm:$0xff] %v3092_v25  ;;  %v3099_v13 = vld [vmem:[#allocation5 + $0xd] sm:$0xff]  ;;  %v3648_v25 = vstv %s3067_s10 }
 0x1dc   : > { %3629 = vst [vmem:[#allocation21_spill] sm:$0xff] %v3052_v30  ;;  %v3054_v3 = vld [vmem:[#allocation5 + $0x5] sm:$0xff]  ;;  %v1050_v2 = vadd.f32 %v1048_v26, %v1042_v0  ;;  %v1001_v0 = vmul.f32 %v3642_v31, %v2881_v55  ;;  %v3122_v8 = vld [vmem:[#allocation6] sm:$0xff] }
 0x1dd   : > { %3630 = vst [vmem:[#allocation22_spill] sm:$0xff] %v3054_v3  ;;  %v3064_v29 = vld [vmem:[#allocation5 + $0x6] sm:$0xff]  ;;  %v985_v3 = vmul.f32 %v3635_v21, %v2879_v18  ;;  %v3618_v21 = vstv %s3034_s19  ;;  %v3124_v15 = vld [vmem:[#allocation6 + $0x1] sm:$0xff] }
 0x1de   : > { %3632 = vst [vmem:[#allocation23_spill] sm:$0xff] %v3064_v29  ;;  %v979_v29 = vadd.f32 %v977_v12, %v971_v20  ;;  %v3082_v30 = vld [vmem:[#allocation5 + $0x8] sm:$0xff]  ;;  %v3126_v61 = vld [vmem:[#allocation6 + $0x2] sm:$0xff] }
 0x1df   : > { %1379 = vst.msk [vmem:[#allocation5] sm:$0xff] %vm501_vm5, %v1371_v54  ;;  %v3088_v54 = vld [vmem:[#allocation5 + $0x9] sm:$0xff]  ;;  %v3128_v52 = vld [vmem:[#allocation6 + $0x3] sm:$0xff] }
 0x1e0   : > { %v987_v18 = vadd.f32 %v985_v3, %v979_v29  ;;  %v3097_v20 = vld [vmem:[#allocation5 + $0xc] sm:$0xff]  ;;  %3639 = vst [vmem:[#allocation26_spill] sm:$0xff] %v3099_v13  ;;  %v1058_v29 = vadd.f32 %v1056_v24, %v1050_v2  ;;  %v1064_v3 = vmul.f32 %v3618_v21, %v2874_v22  ;;  %v1108_v22 = vmul.f32 %v3619_v32, %v2939_v60  ;;  %v3133_v24 = vld [vmem:[#allocation6 + $0x4] sm:$0xff] }
 0x1e1   : > { %3638 = vst [vmem:[#allocation25_spill] sm:$0xff] %v3097_v20  ;;  %v3101_v12 = vld [vmem:[#allocation5 + $0xe] sm:$0xff]  ;;  %v3135_v55 = vld [vmem:[#allocation6 + $0x5] sm:$0xff]  ;;  %v3643_v21 = vstv %s2911_s28  ;;  %v3153_v32 = vld [vmem:[#allocation6 + $0xd] sm:$0xff]  ;;  %s3184_s28 = sld [smem:[#allocation14 + $0x51]] }
 0x1e2   : > { %3640 = vst [vmem:[#allocation27_spill] sm:$0xff] %v3101_v12  ;;  %v1066_v2 = vadd.f32 %v1064_v3, %v1058_v29  ;;  %v3137_v31 = vld [vmem:[#allocation6 + $0x6] sm:$0xff]  ;;  %v1009_v26 = vmul.f32 %v3643_v21, %v2836_v27  ;;  %v3155_v27 = vld [vmem:[#allocation6 + $0xe] sm:$0xff]  ;;  %v1375_v21 = vpop.permute.xlu0 %1374  ;;  %v1391_v29 = vpop.permute.xlu2 %1390 }
 0x1e3   : > { %1380 = vst.msk [vmem:[#allocation5 + $0x8] sm:$0xff] %vm501_vm5, %v1373_v9  ;;  %v995_v9 = vadd.f32 %v993_v11, %v987_v18  ;;  %v3142_v12 = vld [vmem:[#allocation6 + $0x9] sm:$0xff]  ;;  %v1389_v11 = vpop.permute.xlu1 %1388 }
 0x1e4   : > { %v3144_v13 = vld [vmem:[#allocation6 + $0xa] sm:$0xff]  ;;  %3646 = vst [vmem:[#allocation30_spill] sm:$0xff] %v3153_v32  ;;  %v1110_v20 = vadd.f32 %v1108_v22, %v1066_v2  ;;  %v3649_v2 = vstv %s2929_s26  ;;  %s3193_s26 = sld [smem:[#allocation14 + $0x27]] }
 0x1e5   : > { %v3146_v18 = vld [vmem:[#allocation6 + $0xb] sm:$0xff]  ;;  %v1003_v60 = vadd.f32 %v1001_v0, %v995_v9  ;;  %3647 = vst [vmem:[#allocation31_spill] sm:$0xff] %v3155_v27  ;;  %v1017_v22 = vmul.f32 %v3649_v2, %v2883_v51  ;;  %v3651_v9 = vstv %s2942_s27  ;;  %s3203_s27 = sld [smem:[#allocation14 + $0x58]] }
 0x1e6   : > { %3644 = vst [vmem:[#allocation28_spill] sm:$0xff] %v3146_v18  ;;  %v3151_v3 = vld [vmem:[#allocation6 + $0xc] sm:$0xff]  ;;  %v1116_v18 = vmul.f32 %v3648_v25, %v2994_v44  ;;  %v3650_v44 = vstv %s3077_s11 }
 0x1e7   : > { %3645 = vst [vmem:[#allocation29_spill] sm:$0xff] %v3151_v3  ;;  %v3161_v0 = vld [vmem:[#allocation6 + $0x8] sm:$0xff]  ;;  %v1011_v27 = vadd.f32 %v1009_v26, %v1003_v60  ;;  %v1124_v25 = vmul.f32 %v3650_v44, %v2918_v35  ;;  %v1025_v3 = vmul.f32 %v3651_v9, %v2838_v34  ;;  %v3652_v60 = vstv %s3095_s12 }
 0x1e8   : > { %1397 = vst.msk [vmem:[#allocation6] sm:$0xff] %vm501_vm5, %v1389_v11  ;;  %v1118_v32 = vadd.f32 %v1116_v18, %v1110_v20  ;;  %v1139_v11 = vstv %s3110_s13  ;;  %v1132_v51 = vmul.f32 %v3652_v60, %v2985_v57  ;;  %v1147_v20 = vstv %s3120_s18  ;;  %s3293_s13 = sld [smem:[#allocation14 + $0x4b]] }
 0x1e9   : > { %1381 = vst.msk [vmem:[#allocation5 + $0x10] sm:$0x3f] %vm504_vm7, %v1375_v21  ;;  %v1019_v21 = vadd.f32 %v1017_v22, %v1011_v27  ;;  %v3653_v18 = vstv %s2961_s5  ;;  %v1140_v34 = vmul.f32 %v1139_v11, %v2920_v28  ;;  %v3654_v9 = vstv %s2977_s7  ;;  %s3212_s5 = sld [smem:[#allocation14 + $0x2e]] }
 0x1ea   : > { %1398 = vst.msk [vmem:[#allocation6 + $0x8] sm:$0xff] %vm501_vm5, %v1391_v29  ;;  %v1126_v26 = vadd.f32 %v1124_v25, %v1118_v32  ;;  %v1033_v29 = vmul.f32 %v3653_v18, %v2891_v59  ;;  %v1155_v32 = vstv %s3149_s21  ;;  %v1041_v22 = vmul.f32 %v3654_v9, %v2840_v40  ;;  %s3221_s7 = sld [smem:[#allocation14 + $0x5f]] }
 0x1eb   : > { %v1027_v35 = vadd.f32 %v1025_v3, %v1019_v21  ;;  %v1393_v27 = vpop.permute.xlu1 %1392  ;;  %v1148_v3 = vmul.f32 %v1147_v20, %v2987_v47  ;;  %v1163_v44 = vstv %s3165_s22  ;;  %v3655_v25 = vstv %s2992_s8  ;;  %s3230_s8 = sld [smem:[#allocation14 + $0x5]] }
 0x1ec   : > { %v1134_v2 = vadd.f32 %v1132_v51, %v1126_v26  ;;  %1399 = vst.msk [vmem:[#allocation6 + $0x10] sm:$0x3f] %vm504_vm7, %v1393_v27  ;;  %v1049_v21 = vmul.f32 %v3655_v25, %v2893_v33  ;;  %v1156_v40 = vmul.f32 %v1155_v32, %v2923_v23  ;;  %v1171_v60 = vstv %s3175_s23  ;;  %s3302_s18 = sld [smem:[#allocation14 + $0x21]] }
 0x1ed   : > { %v1035_v57 = vadd.f32 %v1033_v29, %v1027_v35  ;;  %v3656_v51 = vstv %s3017_s24  ;;  %v1164_v29 = vmul.f32 %v1163_v44, %v2989_v7  ;;  %v1179_v33 = vstv %s3184_s28  ;;  %s3239_s24 = sld [smem:[#allocation14 + $0x36]] }
 0x1ee   : > { %v1142_v59 = vadd.f32 %v1140_v34, %v1134_v2  ;;  %v1057_v35 = vmul.f32 %v3656_v51, %v2850_v41  ;;  %v3657_v2 = vstv %s3034_s19  ;;  %v1187_v41 = vstv %s3193_s26  ;;  %s3248_s19 = sld [smem:[#allocation14 + $0xc]] }
 0x1ef   : > { %v1043_v28 = vadd.f32 %v1041_v22, %v1035_v57  ;;  %v1065_v34 = vmul.f32 %v3657_v2, %v2895_v36  ;;  %v1172_v57 = vmul.f32 %v1171_v60, %v2925_v63  ;;  %v3658_v9 = vstv %s3048_s9  ;;  %s3257_s9 = sld [smem:[#allocation14 + $0x3d]] }
 0x1f0   : > { %v1150_v26 = vadd.f32 %v1148_v3, %v1142_v59  ;;  %v1109_v22 = vmul.f32 %v3658_v9, %v2951_v39  ;;  %v1180_v3 = vmul.f32 %v1179_v33, %v3001_v17  ;;  %v1195_v36 = vstv %s3203_s27  ;;  %s3311_s21 = sld [smem:[#allocation14 + $0x52]] }
 0x1f1   : > { %v1051_v47 = vadd.f32 %v1049_v21, %v1043_v28  ;;  %v3659_v28 = vstv %s3067_s10  ;;  %v1203_v39 = vstv %s3212_s5  ;;  %s3266_s10 = sld [smem:[#allocation14 + $0x13]] }
 0x1f2   : > { %v1158_v18 = vadd.f32 %v1156_v40, %v1150_v26  ;;  %v1117_v25 = vmul.f32 %v3659_v28, %v2999_v37  ;;  %v1188_v26 = vmul.f32 %v1187_v41, %v2927_v38  ;;  %v3660_v40 = vstv %s3077_s11  ;;  %s3275_s11 = sld [smem:[#allocation14 + $0x44]] }
 0x1f3   : > { %v1059_v23 = vadd.f32 %v1057_v35, %v1051_v47  ;;  %v1125_v47 = vmul.f32 %v3660_v40, %v2955_v16  ;;  %v1196_v35 = vmul.f32 %v1195_v36, %v3003_v5  ;;  %v1211_v37 = vstv %s3221_s7  ;;  %s3320_s22 = sld [smem:[#allocation14 + $0x28]] }
 0x1f4   : > { %v1166_v27 = vadd.f32 %v1164_v29, %v1158_v18  ;;  %v3661_v18 = vstv %s3095_s12  ;;  %v1204_v2 = vmul.f32 %v1203_v39, %v2937_v53  ;;  %v1255_v16 = vstv %s3230_s8  ;;  %s3284_s12 = sld [smem:[#allocation14 + $0x1a]] }
 0x1f5   : > { %v1067_v7 = vadd.f32 %v1065_v34, %v1059_v23  ;;  %v1133_v29 = vmul.f32 %v3661_v18, %v3010_v56  ;;  %v1141_v34 = vmul.f32 %v1139_v11, %v2957_v14  ;;  %v1263_v56 = vstv %s3239_s24  ;;  %s3329_s23 = sld [smem:[#allocation14 + $0x59]] }
 0x1f6   : > { %v1174_v59 = vadd.f32 %v1172_v57, %v1166_v27  ;;  %v1212_v57 = vmul.f32 %v1211_v37, %v3005_v62  ;;  %v1271_v14 = vstv %s3248_s19  ;;  %v1157_v11 = vmul.f32 %v1155_v32, %v2959_v48  ;;  %s3338_s28 = sld [smem:[#allocation14 + $0x2f]] }
 0x1f7   : > { %v1111_v63 = vadd.f32 %v1109_v22, %v1067_v7  ;;  %v1149_v7 = vmul.f32 %v1147_v20, %v3012_v49  ;;  %v1256_v22 = vmul.f32 %v1255_v16, %v3062_v4  ;;  %v1279_v49 = vstv %s3257_s9  ;;  %s3347_s26 = sld [smem:[#allocation14 + $0x60]] }
 0x1f8   : > { %v1182_v21 = vadd.f32 %v1180_v3, %v1174_v59  ;;  %v1264_v3 = vmul.f32 %v1263_v56, %v3122_v8  ;;  %v1165_v20 = vmul.f32 %v1163_v44, %v3014_v1  ;;  %v1272_v28 = vmul.f32 %v1271_v14, %v3043_v58  ;;  %s3356_s27 = sld [smem:[#allocation14 + $0x6]] }
 0x1f9   : > { %v1119_v17 = vadd.f32 %v1117_v25, %v1111_v63  ;;  %v1287_v48 = vstv %s3266_s10  ;;  %v1173_v32 = vmul.f32 %v1171_v60, %v2969_v45  ;;  %v1295_v1 = vstv %s3275_s11  ;;  %s3365_s5 = sld [smem:[#allocation14 + $0x37]] }
 0x1fa   : > { %v1190_v51 = vadd.f32 %v1188_v26, %v1182_v21  ;;  %v1280_v21 = vmul.f32 %v1279_v49, %v3124_v15  ;;  %v1181_v44 = vmul.f32 %v1179_v33, %v3022_v46  ;;  %v1303_v45 = vstv %s3284_s12  ;;  %s3374_s7 = sld [smem:[#allocation14 + $0xd]] }
 0x1fb   : > { %v1127_v38 = vadd.f32 %v1125_v47, %v1119_v17  ;;  %v1288_v17 = vmul.f32 %v1287_v48, %v3045_v43  ;;  %v1189_v60 = vmul.f32 %v1187_v41, %v2971_v10  ;;  %v1296_v47 = vmul.f32 %v1295_v1, %v3126_v61  ;;  %s3383_s8 = sld [smem:[#allocation14 + $0x3e]] }
 0x1fc   : > { %v1198_v23 = vadd.f32 %v1196_v35, %v1190_v51  ;;  %v1311_v46 = vstv %s3293_s13  ;;  %v1197_v33 = vmul.f32 %v1195_v36, %v3024_v50  ;;  %v1304_v35 = vmul.f32 %v1303_v45, %v3050_v6  ;;  %v3662_v36 = vld [vmem:[#allocation20_spill] sm:$0xff]  ;;  %s3392_s24 = sld [smem:[#allocation14 + $0x14]] }
 0x1fd   : > { %v1135_v5 = vadd.f32 %v1133_v29, %v1127_v38  ;;  %v1319_v10 = vstv %s3302_s18  ;;  %v1205_v41 = vmul.f32 %v1203_v39, %v2973_v19  ;;  %v1312_v18 = vmul.f32 %v1311_v46, %v3128_v52  ;;  %s3401_s19 = sld [smem:[#allocation14 + $0x45]] }
 0x1fe   : > { %v1206_v27 = vadd.f32 %v1204_v2, %v1198_v23  ;;  %v1327_v50 = vstv %s3311_s21  ;;  %v1213_v29 = vmul.f32 %v1211_v37, %v3662_v36  ;;  %v3663_v2 = vld [vmem:[#allocation21_spill] sm:$0xff]  ;;  %v1335_v19 = vstv %s3320_s22  ;;  %s3409_s9 = sld [smem:[#allocation14 + $0x1b]] }
 0x1ff   : > { %v1143_v53 = vadd.f32 %v1141_v34, %v1135_v5  ;;  %v1320_v5 = vmul.f32 %v1319_v10, %v3663_v2  ;;  %v1257_v39 = vmul.f32 %v1255_v16, %v3082_v30  ;;  %v1343_v37 = vstv %s3329_s23  ;;  %s3417_s10 = sld [smem:[#allocation14 + $0x4c]] }
 0x200   : > { %v1214_v9 = vadd.f32 %v1212_v57, %v1206_v27  ;;  %v1328_v27 = vmul.f32 %v1327_v50, %v3133_v24  ;;  %v1273_v24 = vmul.f32 %v1271_v14, %v3088_v54  ;;  %v1400_v54 = vld [vmem:[#allocation5] sm:$0xff]  ;;  %v1403_v14 = vstv %s3356_s27  ;;  %s3425_s11 = sld [smem:[#allocation14 + $0x22]]  ;;  %s2146_s27 = smov 48  }
 0x201   : > { %v1151_v62 = vadd.f32 %v1149_v7, %v1143_v53  ;;  %v1265_v53 = vmul.f32 %v1263_v56, %v3161_v0  ;;  %v1359_v0 = vstv %s3347_s26  ;;  %s3433_s12 = sld [smem:[#allocation14 + $0x53]]  ;;  %s2145_s26 = smov 16  }
 0x202   : > { %v1258_v59 = vadd.f32 %v1256_v22, %v1214_v9  ;;  %v3664_v9 = vld [vmem:[#allocation22_spill] sm:$0xff]  ;;  %s3441_s13 = sld [smem:[#allocation14 + $0x29]] }
 0x203   : > { %v1159_v4 = vadd.f32 %v1157_v11, %v1151_v62  ;;  %v1336_v22 = vmul.f32 %v1335_v19, %v3664_v9  ;;  %v1351_v62 = vstv %s3338_s28  ;;  %v1344_v11 = vmul.f32 %v1343_v37, %v3135_v55  ;;  %s3449_s18 = sld [smem:[#allocation14 + $0x5a]]  ;;  %s2144_s28 = smov 32  }
 0x204   : > { %v1266_v63 = vadd.f32 %v1264_v3, %v1258_v59  ;;  %v1281_v59 = vmul.f32 %v1279_v49, %v3142_v12  ;;  %v1360_v12 = vmul.f32 %v1359_v0, %v3137_v31  ;;  %v1408_v49 = vld [vmem:[#allocation6] sm:$0xff]  ;;  %s3457_s21 = sld [smem:[#allocation14 + $0x30]] }
 0x205   : > { %v1167_v8 = vadd.f32 %v1165_v20, %v1159_v4  ;;  %v3665_v4 = vld [vmem:[#allocation23_spill] sm:$0xff]  ;;  %s3465_s22 = sld [smem:[#allocation14 + $0x61]] }
 0x206   : > { %v1274_v25 = vadd.f32 %v1272_v28, %v1266_v63  ;;  %v1352_v20 = vmul.f32 %v1351_v62, %v3665_v4  ;;  %v1289_v63 = vmul.f32 %v1287_v48, %v3090_v42  ;;  %v1416_v42 = vld [vmem:[#allocation5 + $0x1] sm:$0xff]  ;;  %v1419_v48 = vstv %s3374_s7  ;;  %s3476_s23 = sld [smem:[#allocation9]]  ;;  %s2148_s7 = smov 64  }
 0x207   : > { %v1175_v58 = vadd.f32 %v1173_v32, %v1167_v8  ;;  %v1411_v8 = vstv %s3365_s5  ;;  %s2147_s5 = smov 80  }
 0x208   : > { %v1282_v26 = vadd.f32 %v1280_v21, %v1274_v25  ;;  %v1297_v25 = vmul.f32 %v1295_v1, %v3144_v13  ;;  %v1424_v13 = vld [vmem:[#allocation6 + $0x1] sm:$0xff]  ;;  %v1427_v1 = vstv %s3383_s8  ;;  %s2149_s8 = smov 96  }
 0x209   : > { %v1183_v15 = vadd.f32 %v1181_v44, %v1175_v58  ;;  %v1404_v58 = vmul.f32 %v1403_v14, %v1400_v54  ;;  %v3666_v44 = vld [vmem:[#allocation24_spill] sm:$0xff] }
 0x20a   : > { %v1290_v40 = vadd.f32 %v1288_v17, %v1282_v26  ;;  %v1305_v26 = vmul.f32 %v1303_v45, %v3666_v44  ;;  %v1432_v45 = vld [vmem:[#allocation5 + $0x2] sm:$0xff] }
 0x20b   : > { %v1191_v43 = vadd.f32 %v1189_v60, %v1183_v15  ;;  %v1412_v15 = vmul.f32 %v1411_v8, %v1408_v49  ;;  %v1401_v54 = vld [vmem:[#allocation5 + $0x8] sm:$0xff] }
 0x20c   : > { %v1298_v51 = vadd.f32 %v1296_v47, %v1290_v40  ;;  %v3667_v40 = vld [vmem:[#allocation28_spill] sm:$0xff] }
 0x20d   : > { %v1199_v61 = vadd.f32 %v1197_v33, %v1191_v43  ;;  %v1313_v47 = vmul.f32 %v1311_v46, %v3667_v40  ;;  %v1420_v33 = vmul.f32 %v1419_v48, %v1416_v42  ;;  %v1440_v46 = vld [vmem:[#allocation6 + $0x2] sm:$0xff]  ;;  %v1405_v42 = vmul.f32 %v1403_v14, %v1401_v54 }
 0x20e   : > { %v1306_v38 = vadd.f32 %v1304_v35, %v1298_v51  ;;  %v1435_v51 = vstv %s3392_s24  ;;  %s2150_s24 = smov 112  }
 0x20f   : > { %v1207_v6 = vadd.f32 %v1205_v41, %v1199_v61  ;;  %v3668_v61 = vld [vmem:[#allocation25_spill] sm:$0xff] }
 0x210   : > { %v1314_v23 = vadd.f32 %v1312_v18, %v1306_v38  ;;  %v1321_v41 = vmul.f32 %v1319_v10, %v3668_v61  ;;  %v1428_v18 = vmul.f32 %v1427_v1, %v1424_v13  ;;  %v1448_v10 = vld [vmem:[#allocation5 + $0x3] sm:$0xff] }
 0x211   : > { %v1215_v52 = vadd.f32 %v1213_v29, %v1207_v6  ;;  %v1443_v6 = vstv %s3401_s19  ;;  %v3669_v29 = vld [vmem:[#allocation29_spill] sm:$0xff]  ;;  %s1891_s19 = sshll.u32 %s2195_s2, 3  ;;  %s1677_s2 = scalar_lea.sflag [#allocation12], %s2267_s4 }
 0x212   : > { %v1322_v34 = vadd.f32 %v1320_v5, %v1314_v23  ;;  %v1329_v23 = vmul.f32 %v1327_v50, %v3669_v29  ;;  %v1436_v5 = vmul.f32 %v1435_v51, %v1432_v45  ;;  %v1459_v50 = vstv %s3417_s10 }
 0x213   : > { %v1259_v57 = vadd.f32 %v1257_v39, %v1215_v52  ;;  %v1451_v52 = vstv %s3409_s9 }
 0x214   : > { %v1330_v7 = vadd.f32 %v1328_v27, %v1322_v34  ;;  %v3670_v34 = vld [vmem:[#allocation26_spill] sm:$0xff] }
 0x215   : > { %v1267_v30 = vadd.f32 %v1265_v53, %v1259_v57  ;;  %v1337_v27 = vmul.f32 %v1335_v19, %v3670_v34  ;;  %v1444_v53 = vmul.f32 %v1443_v6, %v1440_v46  ;;  %v1467_v19 = vstv %s3425_s11  ;;  %s1688_s11 = scalar_lea.hbm %s3604_s3, %s1891_s19 }
 0x216   : > { %v1338_v16 = vadd.f32 %v1336_v22, %v1330_v7  ;;  %v1456_v7 = vld [vmem:[#allocation6 + $0x3] sm:$0xff]  ;;  %v1513_v34 = vstv %s3476_s23 }
 0x217   : > { %v1275_v56 = vadd.f32 %v1273_v24, %v1267_v30  ;;  %v3671_v22 = vld [vmem:[#allocation30_spill] sm:$0xff] }
 0x218   : > { %v1346_v3 = vadd.f32 %v1344_v11, %v1338_v16  ;;  %v1345_v30 = vmul.f32 %v1343_v37, %v3671_v22  ;;  %v1452_v16 = vmul.f32 %v1451_v52, %v1448_v10  ;;  %v1464_v11 = vld [vmem:[#allocation5 + $0x4] sm:$0xff]  ;;  %v1475_v37 = vstv %s3433_s12  ;;  %s203_s12 = scalar_lea.vmem [#allocation15], %s1783_s6  ;;  %s2076_s6 = scalar_lea.hbm %s3604_s3, 16 }
 0x219   : > { %v1283_v55 = vadd.f32 %v1281_v59, %v1275_v56  ;;  %v3672_v59 = vld [vmem:[#allocation27_spill] sm:$0xff] }
 0x21a   : > { %v1354_v28 = vadd.f32 %v1352_v20, %v1346_v3  ;;  %v1353_v3 = vmul.f32 %v1351_v62, %v3672_v59  ;;  %v1460_v20 = vmul.f32 %v1459_v50, %v1456_v7  ;;  %v1483_v62 = vstv %s3441_s13  ;;  %v1457_v7 = vld [vmem:[#allocation6 + $0xb] sm:$0xff]  ;;  %s1690_s13 = sshll.u32 %s203_s12, 4  ;;  %s1691_s13 = int_to_ptr.vmem [resolvable:$true] %s1690_s13 }
 0x21b   : > { %v1291_v32 = vadd.f32 %v1289_v63, %v1283_v55  ;;  %v1472_v55 = vld [vmem:[#allocation6 + $0x4] sm:$0xff] }
 0x21c   : > { %v1362_v21 = vadd.f32 %v1360_v12, %v1354_v28  ;;  %v3673_v28 = vld [vmem:[#allocation31_spill] sm:$0xff]  ;;  %v1476_v44 = vmul.f32 %v1475_v37, %v1472_v55 }
 0x21d   : > { %v1299_v31 = vadd.f32 %v1297_v25, %v1291_v32  ;;  %v1361_v12 = vmul.f32 %v1359_v0, %v3673_v28  ;;  %v1468_v32 = vmul.f32 %v1467_v19, %v1464_v11  ;;  %v1409_v25 = vld [vmem:[#allocation6 + $0x8] sm:$0xff] }
 0x21e   : > { %v1406_v17 = vadd.f32 %v1404_v58, %v1362_v21  ;;  %v1480_v21 = vld [vmem:[#allocation5 + $0x5] sm:$0xff]  ;;  %v1413_v13 = vmul.f32 %v1411_v8, %v1409_v25 }
 0x21f   : > { %v1307_v60 = vadd.f32 %v1305_v26, %v1299_v31  ;;  %v1417_v26 = vld [vmem:[#allocation5 + $0x9] sm:$0xff]  ;;  %v1484_v40 = vmul.f32 %v1483_v62, %v1480_v21 }
 0x220   : > { %v1414_v43 = vadd.f32 %v1412_v15, %v1406_v17  ;;  %v1488_v17 = vld [vmem:[#allocation6 + $0x5] sm:$0xff]  ;;  %v1491_v15 = vstv %s3449_s18  ;;  %v1421_v14 = vmul.f32 %v1419_v48, %v1417_v26  ;;  %v1505_v25 = vld [vmem:[#allocation6 + $0xe] sm:$0xff]  ;;  %s1692_s18 = sshll.u32 %s1688_s11, 4  ;;  %s1693_s18 = int_to_ptr.hbm [resolvable:$true] %s1692_s18 }
 0x221   : > { %v1315_v35 = vadd.f32 %v1313_v47, %v1307_v60  ;;  %v1425_v47 = vld [vmem:[#allocation6 + $0x9] sm:$0xff]  ;;  %v1492_v61 = vmul.f32 %v1491_v15, %v1488_v17 }
 0x222   : > { %v1422_v38 = vadd.f32 %v1420_v33, %v1414_v43  ;;  %v1496_v43 = vld [vmem:[#allocation5 + $0x6] sm:$0xff]  ;;  %v1499_v33 = vstv %s3457_s21  ;;  %v1429_v8 = vmul.f32 %v1427_v1, %v1425_v47  ;;  %s2070_s21 = sshra.s32 %s1693_s18, 4  ;;  %s2071_s21 = int_to_ptr.hbm [resolvable:$true] %s2070_s21 }
 0x223   : > { %v1323_v36 = vadd.f32 %v1321_v41, %v1315_v35  ;;  %v1433_v41 = vld [vmem:[#allocation5 + $0xa] sm:$0xff]  ;;  %v1500_v29 = vmul.f32 %v1499_v33, %v1496_v43  ;;  %p2077_p9 = scmp.lt.s32.totalorder %s2071_s21, %s3604_s3 }
 0x224   : > { %v1430_v2 = vadd.f32 %v1428_v18, %v1422_v38  ;;  %v1504_v38 = vld [vmem:[#allocation6 + $0x6] sm:$0xff]  ;;  %v1507_v18 = vstv %s3465_s22  ;;  %s2072_s22 = scalar_lea.hbm %s2071_s21, 8 }
 0x225   : > { %v1331_v39 = vadd.f32 %v1329_v23, %v1323_v36  ;;  %v1441_v23 = vld [vmem:[#allocation6 + $0xa] sm:$0xff]  ;;  %v1508_v48 = vmul.f32 %v1507_v18, %v1504_v38  ;;  %p2073_p1 = scmp.ne.s32.totalorder %s2071_s21, %s2072_s22  ;;  %p2078_p10 = scmp.lt.s32.totalorder %s2076_s6, %s2072_s22 }
 0x226   : > { %v1438_v57 = vadd.f32 %v1436_v5, %v1430_v2  ;;  %v1437_v5 = vmul.f32 %v1435_v51, %v1433_v41  ;;  %v1473_v51 = vld [vmem:[#allocation6 + $0xc] sm:$0xff] }
 0x227   : > { %v1339_v9 = vadd.f32 %v1337_v27, %v1331_v39  ;;  %v1449_v39 = vld [vmem:[#allocation5 + $0xb] sm:$0xff]  ;;  %p2074_p4 = pnand %p2073_p1, %p2240_p3  ;;  %p2079_p2 = por %p2078_p10, %p2077_p9 }
 0x228   : > { %v1446_v24 = vadd.f32 %v1444_v53, %v1438_v57  ;;  %v1445_v57 = vmul.f32 %v1443_v6, %v1441_v23  ;;  %v1453_v1 = vmul.f32 %v1451_v52, %v1449_v39  ;;  %v1489_v6 = vld [vmem:[#allocation6 + $0xd] sm:$0xff]  ;;  %v1497_v52 = vld [vmem:[#allocation5 + $0xe] sm:$0xff] }
 0x229   : > { %v1347_v56 = vadd.f32 %v1345_v30, %v1339_v9  ;;  %v1465_v30 = vld [vmem:[#allocation5 + $0xc] sm:$0xff]  ;;  %v1493_v28 = vmul.f32 %v1491_v15, %v1489_v6  ;;  %p2075_p8 = pneg %p2074_p4 }
 0x22a   : > { %v1454_v4 = vadd.f32 %v1452_v16, %v1446_v24  ;;  %v1461_v16 = vmul.f32 %v1459_v50, %v1457_v7  ;;  %v1469_v59 = vmul.f32 %v1467_v19, %v1465_v30  ;;  %v1501_v50 = vmul.f32 %v1499_v33, %v1497_v52 }
 0x22b   : > { %v1355_v63 = vadd.f32 %v1353_v3, %v1347_v56  ;;  %v1481_v3 = vld [vmem:[#allocation5 + $0xd] sm:$0xff]  ;;  %p2080_p11 = pnand %p2079_p2, %p2075_p8 }
 0x22c   : > { %v1462_v49 = vadd.f32 %v1460_v20, %v1454_v4  ;;  %v1477_v20 = vmul.f32 %v1475_v37, %v1473_v51  ;;  %v1485_v55 = vmul.f32 %v1483_v62, %v1481_v3 }
 0x22d   : > { %v1363_v58 = vadd.f32 %v1361_v12, %v1355_v63 }
 0x22e   : > { %v1470_v31 = vadd.f32 %v1468_v32, %v1462_v49 }
 0x22f   : > { %v1407_v0 = vadd.f32 %v1405_v42, %v1363_v58  ;;  %v1509_v58 = vmul.f32 %v1507_v18, %v1505_v25 }
 0x230   : > { %v1478_v60 = vadd.f32 %v1476_v44, %v1470_v31 }
 0x231   : > { %v1415_v45 = vadd.f32 %v1413_v13, %v1407_v0 }
 0x232   : > { %v1486_v35 = vadd.f32 %v1484_v40, %v1478_v60 }
 0x233   : > { %v1423_v46 = vadd.f32 %v1421_v14, %v1415_v45 }
 0x234   : > { %v1494_v36 = vadd.f32 %v1492_v61, %v1486_v35  ;;  %v3674_v35 = vlaneseq }
 0x235   : > { %v1431_v2 = vadd.f32 %v1429_v8, %v1423_v46 }
 0x236   : > { %v1502_v10 = vadd.f32 %v1500_v29, %v1494_v36  ;;  %vm3499_vm12 = vcmp.lt.s32.totalorder %v3674_v35, 16  ;;  %vm3509_vm2 = vcmp.ge.s32.totalorder %v3674_v35, 16  ;;  %vm3514_vm3 = vcmp.lt.s32.totalorder %v3674_v35, 32 }
 0x237   : > { %v1439_v27 = vadd.f32 %v1437_v5, %v1431_v2  ;;  %vm1567_vm4 = vmand %vm3509_vm2, %vm3514_vm3  ;;  %vm1575_vm6 = vcmp.lt.s32.totalorder %v3674_v35, 48  ;;  %vm1610_vm2 = vcmp.ge.s32.totalorder %v3674_v35, 96  ;;  %vm1611_vm3 = vcmp.lt.s32.totalorder %v3674_v35, 112 }
 0x238   : > { %v1510_v53 = vadd.f32 %v1508_v48, %v1502_v10 }
 0x239   : > { %v1447_v9 = vadd.f32 %v1445_v57, %v1439_v27 }
 0x23a   : > { %v1514_v22 = vadd.f32 %v1513_v34, %v1510_v53 }
 0x23b   : > { %v1455_v24 = vadd.f32 %v1453_v1, %v1447_v9 }
 0x23c   : > { %v1883_v11 = vmul.f32 -1.442695, %v1514_v22 }
 0x23d   : > { %v1463_v56 = vadd.f32 %v1461_v16, %v1455_v24 }
 0x23e   : > { %2003 = vpow2.f32 %v1883_v11 }
 0x23f   : > { %v1471_v4 = vadd.f32 %v1469_v59, %v1463_v56 }
 0x241   : > { %v1479_v54 = vadd.f32 %v1477_v20, %v1471_v4 }
 0x243   : > { %v1487_v63 = vadd.f32 %v1485_v55, %v1479_v54 }
 0x244   : > { %v2004_v12 = vpop.eup %2003 }
 0x245   : > { %v1522_v49 = vadd.f32 1.0, %v2004_v12  ;;  %v1495_v32 = vadd.f32 %v1493_v28, %v1487_v63 }
 0x247   : > { %2005 = vrcp.f32 %v1522_v49  ;;  %v1503_v21 = vadd.f32 %v1501_v50, %v1495_v32  ;;  %v1535_v17 = vand.u32 2147483648, %v1522_v49  ;;  %v1533_v15 = vand.u32 2147483647, %v1522_v49 }
 0x248   : > { %vm1529_vm9 = vweird.f32 %v1522_v49 }
 0x249   : > { %v1511_v42 = vadd.f32 %v1509_v58, %v1503_v21  ;;  %v1536_v13 = vor.u32 1.1754944e-38, %v1535_v17  ;;  %vm1534_vm11 = vcmp.eq.f32.partialorder %v1533_v15, 8.507059e+37 }
 0x24b   : > { %v1515_v19 = vadd.f32 %v1513_v34, %v1511_v42 }
 0x24d   : > { %v2006_v31 = vpop.eup %2005  ;;  %v1884_v26 = vmul.f32 -1.442695, %v1515_v19 }
 0x24e   : > { %v1525_v44 = vmul.f32 %v2006_v31, %v1522_v49  ;;  %vm1530_vm8 = vweird.f32 %v2006_v31 }
 0x24f   : > { %2007 = vpow2.f32 %v1884_v26  ;;  %vm1531_vm10 = vmor %vm1529_vm9, %vm1530_vm8  ;;  %vm3525_vm8 = vcmp.ge.s32.totalorder %v3674_v35, 48  ;;  %vm3530_vm9 = vcmp.lt.s32.totalorder %v3674_v35, 64 }
 0x250   : > { %v1526_v37 = vsub.f32 1.0, %v1525_v44 }
 0x252   : > { %v1527_v62 = vmul.f32 %v2006_v31, %v1526_v37  ;;  %v3691_v37 = vld [vmem:[#allocation19_spill] sm:$0xff] }
 0x254   : > { %v1528_v0 = vadd.f32 %v2006_v31, %v1527_v62 }
 0x255   : > { %v2008_v60 = vpop.eup %2007 }
 0x256   : > { %v1532_v40 = vsel %vm1531_vm10, %v2006_v31, %v1528_v0  ;;  %v1523_v43 = vadd.f32 1.0, %v2008_v60  ;;  %vm1585_vm10 = vmand %vm3525_vm8, %vm3530_vm9 }
 0x257   : > { %v1537_v47 = vsel %vm1534_vm11, %v1536_v13, %v1532_v40  ;;  %vm3539_vm11 = vcmp.ge.s32.totalorder %v3674_v35, 64 }
 0x258   : > { %1554 = vst.msk [vmem:[#allocation7] sm:$0xff] %vm501_vm5, %v1537_v47  ;;  %2009 = vrcp.f32 %v1523_v43  ;;  %v1550_v46 = vand.u32 2147483648, %v1523_v43  ;;  %v1548_v36 = vand.u32 2147483647, %v1523_v43  ;;  %vm1544_vm14 = vweird.f32 %v1523_v43 }
 0x25a   : > { %v1551_v23 = vor.u32 1.1754944e-38, %v1550_v46  ;;  %vm1549_vm1 = vcmp.eq.f32.partialorder %v1548_v36, 8.507059e+37 }
 0x25e   : > { %v2010_v33 = vpop.eup %2009 }
 0x25f   : > { %v1569_v45 = vld [vmem:[#allocation7 + $0x2] sm:$0x1]  ;;  %v1560_v14 = vld [vmem:[#allocation7 + $0x1] sm:$0x1]  ;;  %v1540_v41 = vmul.f32 %v2010_v33, %v1523_v43  ;;  %v1556_v38 = vld [vmem:[#allocation7] sm:$0x1]  ;;  %vm1545_vm13 = vweird.f32 %v2010_v33 }
 0x260   : > { %1571 = vrot.lane.b32.xlu1 %v1569_v45, %s2144_s28  ;;  %1562 = vrot.lane.b32.xlu2 %v1560_v14, %s2145_s26  ;;  %1559 = vst.msk [vmem:[#allocation8] sm:$0x1] %vm3499_vm12, %v1556_v38  ;;  %vm1546_vm15 = vmor %vm1544_vm14, %vm1545_vm13  ;;  %v1578_v27 = vld [vmem:[#allocation7 + $0x3] sm:$0x1]  ;;  %v1596_v57 = vld [vmem:[#allocation7 + $0x5] sm:$0x1] }
 0x261   : > { %v1541_v18 = vsub.f32 1.0, %v1540_v41  ;;  %v1587_v53 = vld [vmem:[#allocation7 + $0x4] sm:$0x1]  ;;  %v1605_v22 = vld [vmem:[#allocation7 + $0x6] sm:$0x1]  ;;  %vm3549_vm13 = vcmp.ge.s32.totalorder %v3674_v35, 80 }
 0x262   : > { %v1614_v30 = vld [vmem:[#allocation7 + $0x7] sm:$0x1]  ;;  %vm1602_vm14 = vcmp.lt.s32.totalorder %v3674_v35, 96 }
 0x263   : > { %v1542_v8 = vmul.f32 %v2010_v33, %v1541_v18 }
 0x265   : > { %v1543_v29 = vadd.f32 %v2010_v33, %v1542_v8 }
 0x267   : > { %v1547_v2 = vsel %vm1546_vm15, %v2010_v33, %v1543_v29 }
 0x268   : > { %v1552_v5 = vsel %vm1549_vm1, %v1551_v23, %v1547_v2  ;;  %vm1603_vm1 = vmand %vm3549_vm13, %vm1602_vm14 }
 0x269   : > { %1555 = vst.msk [vmem:[#allocation7 + $0x8] sm:$0xff] %vm501_vm5, %v1552_v5  ;;  %vm1574_vm5 = vcmp.ge.s32.totalorder %v3674_v35, 32 }
 0x26a   : > { %vm1576_vm7 = vmand %vm1574_vm5, %vm1575_vm6  ;;  %vm1619_vm5 = vcmp.ge.s32.totalorder %v3674_v35, 112  ;;  %vm1620_vm6 = vcmp.lt.s32.totalorder %v3674_v35, 128 }
 0x270   : > { %v1625_v10 = vld [vmem:[#allocation7 + $0x9] sm:$0x1]  ;;  %v1637_v48 = vld [vmem:[#allocation7 + $0xb] sm:$0x1]  ;;  %v1631_v39 = vld [vmem:[#allocation7 + $0xa] sm:$0x1] }
 0x271   : > { %1627 = vrot.lane.b32.xlu0 %v1625_v10, %s2145_s26  ;;  %1639 = vrot.lane.b32.xlu1 %v1637_v48, %s2146_s27  ;;  %v1623_v34 = vld [vmem:[#allocation7 + $0x8] sm:$0x1]  ;;  %v1643_v7 = vld [vmem:[#allocation7 + $0xc] sm:$0x1]  ;;  %v1655_v9 = vld [vmem:[#allocation7 + $0xe] sm:$0x1] }
 0x272   : > { %1633 = vrot.lane.b32.xlu2 %v1631_v39, %s2144_s28  ;;  %1624 = vst.msk [vmem:[#allocation8 + $0x1] sm:$0x1] %vm3499_vm12, %v1623_v34  ;;  %v1649_v1 = vld [vmem:[#allocation7 + $0xd] sm:$0x1]  ;;  %v1661_v24 = vld [vmem:[#allocation7 + $0xf] sm:$0x1] }
 0x273   : > { %vm3544_vm12 = vcmp.lt.s32.totalorder %v3674_v35, 80 }
 0x274   : > { %vm1594_vm15 = vmand %vm3539_vm11, %vm3544_vm12 }
 0x279   : > { %1580 = vrot.lane.b32.xlu0 %v1578_v27, %s2146_s27  ;;  %1598 = vrot.lane.b32.xlu1 %v1596_v57, %s2147_s5 }
 0x27a   : > { %1589 = vrot.lane.b32.xlu2 %v1587_v53, %s2148_s7 }
 0x281   : > { %1645 = vrot.lane.b32.xlu0 %v1643_v7, %s2148_s7  ;;  %1657 = vrot.lane.b32.xlu1 %v1655_v9, %s2149_s8 }
 0x282   : > { %1651 = vrot.lane.b32.xlu2 %v1649_v1, %s2147_s5 }
 0x289   : > { %1607 = vrot.lane.b32.xlu0 %v1605_v22, %s2149_s8 }
 0x28a   : > { %1616 = vrot.lane.b32.xlu2 %v1614_v30, %s2150_s24 }
 0x291   : > { %1663 = vrot.lane.b32.xlu0 %v1661_v24, %s2150_s24 }
 0x2ba   : > { %v1563_v51 = vpop.permute.xlu2 %1562 }
 0x2bb   : > { %1568 = vst.msk [vmem:[#allocation8] sm:$0x1] %vm1567_vm4, %v1563_v51 }
 0x2cc   : > { %v1634_v59 = vpop.permute.xlu2 %1633 }
 0x2d2   : > { %v1572_v56 = vpop.permute.xlu1 %1571 }
 0x2d3   : > { %1577 = vst.msk [vmem:[#allocation8] sm:$0x1] %vm1576_vm7, %v1572_v56 }
 0x2d4   : > { %v1590_v63 = vpop.permute.xlu2 %1589 }
 0x2dc   : > { %v1652_v49 = vpop.permute.xlu2 %1651 }
 0x2e3   : > { %v1628_v20 = vpop.permute.xlu0 %1627  ;;  %v1640_v6 = vpop.permute.xlu1 %1639 }
 0x2e4   : > { %1630 = vst.msk [vmem:[#allocation8 + $0x1] sm:$0x1] %vm1567_vm4, %v1628_v20  ;;  %vm1612_vm4 = vmand %vm1610_vm2, %vm1611_vm3  ;;  %v1617_v21 = vpop.permute.xlu2 %1616 }
 0x2e5   : > { %1636 = vst.msk [vmem:[#allocation8 + $0x1] sm:$0x1] %vm1576_vm7, %v1634_v59  ;;  %vm1621_vm7 = vmand %vm1619_vm5, %vm1620_vm6 }
 0x2e6   : > { %1642 = vst.msk [vmem:[#allocation8 + $0x1] sm:$0x1] %vm1585_vm10, %v1640_v6 }
 0x2eb   : > { %v1581_v52 = vpop.permute.xlu0 %1580  ;;  %v1599_v12 = vpop.permute.xlu1 %1598 }
 0x2ec   : > { %1586 = vst.msk [vmem:[#allocation8] sm:$0x1] %vm1585_vm10, %v1581_v52 }
 0x2ed   : > { %1595 = vst.msk [vmem:[#allocation8] sm:$0x1] %vm1594_vm15, %v1590_v63 }
 0x2ee   : > { %1604 = vst.msk [vmem:[#allocation8] sm:$0x1] %vm1603_vm1, %v1599_v12 }
 0x2f3   : > { %v1646_v32 = vpop.permute.xlu0 %1645  ;;  %v1658_v25 = vpop.permute.xlu1 %1657 }
 0x2f4   : > { %1648 = vst.msk [vmem:[#allocation8 + $0x1] sm:$0x1] %vm1594_vm15, %v1646_v32 }
 0x2f5   : > { %1654 = vst.msk [vmem:[#allocation8 + $0x1] sm:$0x1] %vm1603_vm1, %v1652_v49 }
 0x2f6   : > { %1660 = vst.msk [vmem:[#allocation8 + $0x1] sm:$0x1] %vm1612_vm4, %v1658_v25 }
 0x2fb   : > { %v1608_v50 = vpop.permute.xlu0 %1607 }
 0x2fc   : > { %1613 = vst.msk [vmem:[#allocation8] sm:$0x1] %vm1612_vm4, %v1608_v50 }
 0x2fd   : > { %1622 = vst.msk [vmem:[#allocation8] sm:$0x1] %vm1621_vm7, %v1617_v21 }
 0x303   : > { %v1664_v58 = vpop.permute.xlu0 %1663 }
 0x304   : > { %1666 = vst.msk [vmem:[#allocation8 + $0x1] sm:$0x1] %vm1621_vm7, %v1664_v58 }
 0x30b   : > { %v1667_v42 = vld [vmem:[#allocation8] sm:$0x3] }
 0x30c   : > { %v1670_v19 = vperm.slane %v1667_v42, 1  ;;  %v1669_v31 = vperm.slane %v1667_v42, 0 }
 0x30e   : > { %v1671_v44 = vrot.slane %v1670_v19, 4 }
 0x310   : > { %v1672_v26 = vsel %vm219_vm0, %v1669_v31, %v1671_v44 }
 0x311   : > { %v1674_v17 = vmul.f32 %v1672_v26, %v3691_v37 }
 0x313   : > { %1675 = vst [vmem:[%s203_s12] sm:$0xff] %v1674_v17 }
 0x314   : > { %2083 = shalt.err (!%p2080_p11)
}
 0x315   : > { %1898 = dma.vmem_to_hbm [thread:$0]  (%p2240_p3), %s1691_s13, 128, %s1693_s18, %s1677_s2  }
 0x316 PF: > { %s1704_s4 = sand.u32 1, %s2114_s14   ;;  %p3692_p12 = scmp.ge.s32.totalorder %s2126_s17, 2 }
 0x317   : > { %s1705_s5 = scalar_lea.sflag [#allocation12], %s1704_s4 }
 0x318   : > { %p1909_p13 = pnand %p3692_p12, %p2209_p6 }
 0x31a   : > { %p1910_p0 = pneg %p1909_p13 }
 0x31c   : > { %2109 = dma.done.wait (%p1910_p0), %s1705_s5, 128  }
 0x31d   : > { %2111 = vsyncadd (%p1910_p0), %s1705_s5, 4294967168  ;;  %p18_p5 = scmp.ge.s32.totalorder %s2225_s25, 4   ;;  %s3693_s14 = smov %s2118_s15 }
 0x31e   : > { %s3694_s15 = smov %s2122_s16  ;;  %s3695_s16 = smov %s2235_s29 }
 0x31f   : > { %s3696_s17 = smov %s2225_s25  ;;  %20 = sbr.rel (!%p18_p5) target bundleno = 8 (0x8), region = 83 }
 0x324   :  { %1711 = vsyncpa [#allocation11], 1 }
 0x325   :  { %1713 = vsyncpa [#allocation11 + $0x1], 1 }
 0x326   :  { %1714 = vsyncpa [#allocation12], 1 }
 0x327   :  { %1716 = vsyncpa [#allocation12 + $0x1], 1 }
 0x328   :  { %1717 = vsyncpa [#allocation13], 1 }
 0x329   :  { %1719 = vsyncpa [#allocation13 + $0x1], 1 }

</bundles_post_ra>
